<compile_context>
chip_gen: v7x
topology: tpu7x:2x2x1
jax: 0.10.0
libtpu: 0.0.40
codegen_flags: <defaults>
</compile_context>

<pallas_src>
import functools

import jax
import jax.numpy as jnp
from jax import lax
from jax.experimental import pallas as pl
from jax.experimental.pallas import tpu as pltpu


def _round_up(x, m):
    return ((x + m - 1) // m) * m


# ---------------------------------------------------------------------------
# Pallas kernels
# ---------------------------------------------------------------------------
def _matmul_bias_relu_kernel(x_ref, w_ref, b_ref, o_ref, acc_ref):
    """out = relu(x @ w + b), accumulated over the K grid axis."""
    k = pl.program_id(2)

    @pl.when(k == 0)
    def _():
        acc_ref[...] = jnp.zeros_like(acc_ref)

    acc_ref[...] += jnp.dot(x_ref[...], w_ref[...],
                            preferred_element_type=jnp.float32)

    @pl.when(k == pl.num_programs(2) - 1)
    def _():
        out = acc_ref[...] + b_ref[...]          # (tm, tn) + (1, tn) broadcast
        o_ref[...] = jnp.maximum(out, 0.0).astype(o_ref.dtype)


def _max_reduce_kernel(x_ref, o_ref, *, kk):
    """Elementwise max over the leading window axis (kk = pool window size)."""
    acc = x_ref[0]
    for i in range(1, kk):
        acc = jnp.maximum(acc, x_ref[i])
    o_ref[...] = acc


# ---------------------------------------------------------------------------
# Wrappers around pallas_call
# ---------------------------------------------------------------------------
def _matmul_bias_relu(x, w, b, *, tm=256, tn=128, tk=256):
    """relu(x @ w + b) with a tiled Pallas MXU matmul. x:[M,K] w:[K,N] b:[N]."""
    M, K = x.shape
    _, N = w.shape

    tm = min(tm, _round_up(M, 8))
    tn = min(tn, _round_up(N, 128))
    tk = min(tk, _round_up(K, 128))
    Mp, Np, Kp = _round_up(M, tm), _round_up(N, tn), _round_up(K, tk)

    xp = jnp.pad(x, ((0, Mp - M), (0, Kp - K)))
    wp = jnp.pad(w, ((0, Kp - K), (0, Np - N)))
    bp = jnp.pad(b, (0, Np - N)).reshape(1, Np)

    out = pl.pallas_call(
        _matmul_bias_relu_kernel,
        out_shape=jax.ShapeDtypeStruct((Mp, Np), x.dtype),
        grid=(Mp // tm, Np // tn, Kp // tk),
        in_specs=[
            pl.BlockSpec((tm, tk), lambda i, j, k: (i, k)),
            pl.BlockSpec((tk, tn), lambda i, j, k: (k, j)),
            pl.BlockSpec((1, tn), lambda i, j, k: (0, j)),
        ],
        out_specs=pl.BlockSpec((tm, tn), lambda i, j, k: (i, j)),
        scratch_shapes=[pltpu.VMEM((tm, tn), jnp.float32)],
        compiler_params=pltpu.CompilerParams(
            dimension_semantics=("parallel", "parallel", "arbitrary")),
    )(xp, wp, bp)
    return out[:M, :N]


def _im2col(x, kh, kw, stride, pad):
    """NHWC -> patches [N*OH*OW, kh*kw*C] (pure layout glue, no FLOPs)."""
    N, H, W, C = x.shape
    xp = jnp.pad(x, ((0, 0), (pad, pad), (pad, pad), (0, 0)))
    OH = (H + 2 * pad - kh) // stride + 1
    OW = (W + 2 * pad - kw) // stride + 1
    cols = []
    for dh in range(kh):
        for dw in range(kw):
            sl = lax.slice(
                xp,
                (0, dh, dw, 0),
                (N, dh + (OH - 1) * stride + 1, dw + (OW - 1) * stride + 1, C),
                (1, stride, stride, 1))
            cols.append(sl)                       # [N, OH, OW, C]
    patches = jnp.concatenate(cols, axis=-1)      # [N, OH, OW, kh*kw*C]
    return patches.reshape(N * OH * OW, kh * kw * C), OH, OW


def _conv_relu(x_nhwc, w_hwio, b, stride, pad):
    kh, kw, ci, co = w_hwio.shape
    patches, OH, OW = _im2col(x_nhwc, kh, kw, stride, pad)
    out2 = _matmul_bias_relu(patches, w_hwio.reshape(kh * kw * ci, co), b)
    return out2.reshape(x_nhwc.shape[0], OH, OW, co)


def _maxpool3x3s2(x_nhwc):
    """MaxPool2d(kernel=3, stride=2): 9 strided views + Pallas max-reduce."""
    N, H, W, C = x_nhwc.shape
    k, s = 3, 2
    OH = (H - k) // s + 1
    OW = (W - k) // s + 1
    M, L = N * OH, OW * C                         # lane-dense last dim

    slabs = []
    for dh in range(k):
        for dw in range(k):
            sl = lax.slice(
                x_nhwc,
                (0, dh, dw, 0),
                (N, dh + (OH - 1) * s + 1, dw + (OW - 1) * s + 1, C),
                (1, s, s, 1))
            slabs.append(sl.reshape(M, L))
    stacked = jnp.stack(slabs, axis=0)            # [9, M, L]

    tm = min(512, _round_up(M, 8))
    Mp = _round_up(M, tm)
    stacked = jnp.pad(stacked, ((0, 0), (0, Mp - M), (0, 0)))

    out = pl.pallas_call(
        functools.partial(_max_reduce_kernel, kk=k * k),
        out_shape=jax.ShapeDtypeStruct((Mp, L), x_nhwc.dtype),
        grid=(Mp // tm,),
        in_specs=[pl.BlockSpec((k * k, tm, L), lambda i: (0, i, 0))],
        out_specs=pl.BlockSpec((tm, L), lambda i: (i, 0)),
        compiler_params=pltpu.CompilerParams(dimension_semantics=("parallel",)),
    )(stacked)
    return out[:M].reshape(N, OH, OW, C)


# ---------------------------------------------------------------------------
# AlexNet features (5 slices), parameters and forward pass
# ---------------------------------------------------------------------------
_ALEXNET_CFG = [
    # (out_ch, kernel, stride, pad)
    (64, 11, 4, 2),    # conv1
    (192, 5, 1, 2),    # conv2
    (384, 3, 1, 1),    # conv3
    (256, 3, 1, 1),    # conv4
    (256, 3, 1, 1),    # conv5
]


def init_alexnet_params(key, in_ch=3, dtype=jnp.float32):
    params = []
    c_in = in_ch
    for c_out, kk, _, _ in _ALEXNET_CFG:
        key, kw_, kb_ = jax.random.split(key, 3)
        fan_in = kk * kk * c_in
        w = jax.random.normal(kw_, (kk, kk, c_in, c_out), dtype) / float(fan_in) ** 0.5
        b = 0.1 * jax.random.normal(kb_, (c_out,), dtype)
        params.append((w, b))
        c_in = c_out
    return params


def alexnet_forward(x_nchw, params):
    """NCHW float32 input -> (relu1..relu5), each NCHW, matching the torch slices."""
    x = jnp.transpose(x_nchw, (0, 2, 3, 1))       # NHWC internally (lane-dense C)
    (w1, b1), (w2, b2), (w3, b3), (w4, b4), (w5, b5) = params

    h1 = _conv_relu(x, w1, b1, stride=4, pad=2)                    # slice1 -> relu1
    h2 = _conv_relu(_maxpool3x3s2(h1), w2, b2, stride=1, pad=2)    # slice2 -> relu2
    h3 = _conv_relu(_maxpool3x3s2(h2), w3, b3, stride=1, pad=1)    # slice3 -> relu3
    h4 = _conv_relu(h3, w4, b4, stride=1, pad=1)                   # slice4 -> relu4
    h5 = _conv_relu(h4, w5, b5, stride=1, pad=1)                   # slice5 -> relu5

    to_nchw = lambda t: jnp.transpose(t, (0, 3, 1, 2))
    return tuple(to_nchw(t) for t in (h1, h2, h3, h4, h5))


# ---------------------------------------------------------------------------
# Pure-JAX reference (same math, no Pallas) for correctness checking
# ---------------------------------------------------------------------------
def _ref_conv_relu(x, w, b, stride, pad):
    kh, kw, ci, co = w.shape
    patches, OH, OW = _im2col(x, kh, kw, stride, pad)
    o = jnp.maximum(patches @ w.reshape(kh * kw * ci, co) + b, 0.0)
    return o.reshape(x.shape[0], OH, OW, co)


def _ref_maxpool(x):
    return lax.reduce_window(x, -jnp.inf, lax.max,
                             (1, 3, 3, 1), (1, 2, 2, 1), "VALID")


def alexnet_ref(x_nchw, params):
    x = jnp.transpose(x_nchw, (0, 2, 3, 1))
    (w1, b1), (w2, b2), (w3, b3), (w4, b4), (w5, b5) = params
    h1 = _ref_conv_relu(x, w1, b1, 4, 2)
    h2 = _ref_conv_relu(_ref_maxpool(h1), w2, b2, 1, 2)
    h3 = _ref_conv_relu(_ref_maxpool(h2), w3, b3, 1, 1)
    h4 = _ref_conv_relu(h3, w4, b4, 1, 1)
    h5 = _ref_conv_relu(h4, w5, b5, 1, 1)
    to_nchw = lambda t: jnp.transpose(t, (0, 3, 1, 2))
    return tuple(to_nchw(t) for t in (h1, h2, h3, h4, h5))


if __name__ == "__main__":
    key = jax.random.PRNGKey(0)
    k_x, k_p = jax.random.split(key)

    N, C, H, W = 2, 3, 64, 64                     # small but survives both pools
    x = jax.random.normal(k_x, (N, C, H, W), dtype=jnp.float32)
    params = init_alexnet_params(k_p)

    fwd = jax.jit(alexnet_forward)
    outs = jax.block_until_ready(fwd(x, params))

    refs = alexnet_ref(x, params)
    expected = [(N, 64, 15, 15), (N, 192, 7, 7), (N, 384, 3, 3),
                (N, 256, 3, 3), (N, 256, 3, 3)]
    for o, r, shp in zip(outs, refs, expected):
        assert o.shape == shp and o.dtype == jnp.float32
        # Loose-ish tolerance: XLA's reference dot and the Mosaic MXU matmul may
        # use different f32 precision modes; structural errors would be O(1).
        assert jnp.allclose(o, r, atol=5e-2, rtol=5e-2)

    print("KERNEL_OK")
</pallas_src>

<mosaic_0001>
module attributes {stable_mosaic.version = 11 : i64} {
  func.func @_matmul_bias_relu_kernel(%arg0: i32, %arg1: i32, %arg2: i32, %arg3: memref<256x256xf32, #tpu.memory_space<vmem>>, %arg4: memref<256x128xf32, #tpu.memory_space<vmem>>, %arg5: memref<1x128xf32, #tpu.memory_space<vmem>>, %arg6: memref<256x128xf32, #tpu.memory_space<vmem>>, %arg7: memref<256x128xf32, #tpu.memory_space<vmem>>) attributes {dimension_semantics = [#tpu.dimension_semantics<parallel>, #tpu.dimension_semantics<parallel>, #tpu.dimension_semantics<arbitrary>], iteration_bounds = array<i64: 2, 1, 2>, scalar_prefetch = 0 : i64, scratch_operands = 1 : i64, tpu.core_type = #tpu.core_type<tc>, window_params = [{transform_indices = @transform_0, window_bounds = array<i64: 256, 256>}, {transform_indices = @transform_1, window_bounds = array<i64: 256, 128>}, {transform_indices = @transform_2, window_bounds = array<i64: 1, 128>}, {transform_indices = @transform_3, window_bounds = array<i64: 256, 128>}]} {
    %c0_i32 = arith.constant 0 : i32
    %0 = arith.cmpi eq, %arg2, %c0_i32 : i32
    %1 = arith.extui %0 : i1 to i32
    %c0_i32_0 = arith.constant 0 : i32
    %2 = arith.cmpi ne, %1, %c0_i32_0 : i32
    scf.if %2 {
      %cst_9 = arith.constant 0.000000e+00 : f32
      %12 = vector.broadcast %cst_9 : f32 to vector<256x128xf32>
      %c0_10 = arith.constant 0 : index
      %c0_11 = arith.constant 0 : index
      %13 = vector.load %arg7[%c0_10, %c0_11] : memref<256x128xf32, #tpu.memory_space<vmem>>, vector<256x128xf32>
      tpu.vector_store %arg7[%c0_10, %c0_11], %12 {strides = array<i32>} : memref<256x128xf32, #tpu.memory_space<vmem>>, vector<256x128xf32>,
    } else {
    }
    %c0 = arith.constant 0 : index
    %c0_1 = arith.constant 0 : index
    %3 = vector.load %arg7[%c0, %c0_1] : memref<256x128xf32, #tpu.memory_space<vmem>>, vector<256x128xf32>
    %c0_2 = arith.constant 0 : index
    %c0_3 = arith.constant 0 : index
    %4 = vector.load %arg3[%c0_2, %c0_3] : memref<256x256xf32, #tpu.memory_space<vmem>>, vector<256x256xf32>
    %c0_4 = arith.constant 0 : index
    %c0_5 = arith.constant 0 : index
    %5 = vector.load %arg4[%c0_4, %c0_5] : memref<256x128xf32, #tpu.memory_space<vmem>>, vector<256x128xf32>
    %cst = arith.constant dense<0.000000e+00> : vector<256x128xf32>
    %6 = tpu.matmul %4, %5, %cst {dimension_numbers = #tpu.dot_dimension_numbers<[1], [0], [0], [1], [0, 0, 1, 1], [], []>} : vector<256x256xf32>, vector<256x128xf32>, vector<256x128xf32> -> vector<256x128xf32>
    %7 = arith.addf %3, %6 : vector<256x128xf32>
    %c0_6 = arith.constant 0 : index
    %c0_7 = arith.constant 0 : index
    %8 = vector.load %arg7[%c0_6, %c0_7] : memref<256x128xf32, #tpu.memory_space<vmem>>, vector<256x128xf32>
    tpu.vector_store %arg7[%c0_6, %c0_7], %7 {strides = array<i32>} : memref<256x128xf32, #tpu.memory_space<vmem>>, vector<256x128xf32>,
    %c1_i32 = arith.constant 1 : i32
    %9 = arith.cmpi eq, %arg2, %c1_i32 : i32
    %10 = arith.extui %9 : i1 to i32
    %c0_i32_8 = arith.constant 0 : i32
    %11 = arith.cmpi ne, %10, %c0_i32_8 : i32
    scf.if %11 {
      %c0_9 = arith.constant 0 : index
      %c0_10 = arith.constant 0 : index
      %12 = vector.load %arg7[%c0_9, %c0_10] : memref<256x128xf32, #tpu.memory_space<vmem>>, vector<256x128xf32>
      %c0_11 = arith.constant 0 : index
      %c0_12 = arith.constant 0 : index
      %13 = vector.load %arg5[%c0_11, %c0_12] : memref<1x128xf32, #tpu.memory_space<vmem>>, vector<1x128xf32>
      %14 = vector.broadcast %13 : vector<1x128xf32> to vector<256x128xf32>
      %15 = arith.addf %12, %14 : vector<256x128xf32>
      %cst_13 = arith.constant 0.000000e+00 : f32
      %16 = vector.broadcast %cst_13 : f32 to vector<256x128xf32>
      %17 = arith.maximumf %15, %16 : vector<256x128xf32>
      %c0_14 = arith.constant 0 : index
      %c0_15 = arith.constant 0 : index
      %18 = vector.load %arg6[%c0_14, %c0_15] : memref<256x128xf32, #tpu.memory_space<vmem>>, vector<256x128xf32>
      tpu.vector_store %arg6[%c0_14, %c0_15], %17 {strides = array<i32>} : memref<256x128xf32, #tpu.memory_space<vmem>>, vector<256x128xf32>,
    } else {
    }
    return
  }
  func.func @transform_0(%arg0: i32, %arg1: i32, %arg2: i32) -> (i32, i32) {
    %c0_i32 = arith.constant 0 : i32
    return %arg0, %arg2 : i32, i32
  }
  func.func @transform_1(%arg0: i32, %arg1: i32, %arg2: i32) -> (i32, i32) {
    %c0_i32 = arith.constant 0 : i32
    return %arg2, %arg1 : i32, i32
  }
  func.func @transform_2(%arg0: i32, %arg1: i32, %arg2: i32) -> (i32, i32) {
    %c0_i32 = arith.constant 0 : i32
    %c0_i32_0 = arith.constant 0 : i32
    return %c0_i32, %arg1 : i32, i32
  }
  func.func @transform_3(%arg0: i32, %arg1: i32, %arg2: i32) -> (i32, i32) {
    %c0_i32 = arith.constant 0 : i32
    return %arg0, %arg1 : i32, i32
  }
}

module attributes {stable_mosaic.version = 11 : i64} {
  func.func @_max_reduce_kernel(%arg0: i32, %arg1: memref<9x16x448xf32, #tpu.memory_space<vmem>>, %arg2: memref<16x448xf32, #tpu.memory_space<vmem>>) attributes {dimension_semantics = [#tpu.dimension_semantics<parallel>], iteration_bounds = array<i64: 1>, scalar_prefetch = 0 : i64, scratch_operands = 0 : i64, tpu.core_type = #tpu.core_type<tc>, window_params = [{transform_indices = @transform_0, window_bounds = array<i64: 9, 16, 448>}, {transform_indices = @transform_1, window_bounds = array<i64: 16, 448>}]} {
    %c0 = arith.constant 0 : index
    %c0_0 = arith.constant 0 : index
    %c0_1 = arith.constant 0 : index
    %0 = vector.load %arg1[%c0, %c0_0, %c0_1] : memref<9x16x448xf32, #tpu.memory_space<vmem>>, vector<1x16x448xf32>
    %1 = vector.shape_cast %0 : vector<1x16x448xf32> to vector<16x448xf32>
    %c1 = arith.constant 1 : index
    %c0_2 = arith.constant 0 : index
    %c0_3 = arith.constant 0 : index
    %2 = vector.load %arg1[%c1, %c0_2, %c0_3] : memref<9x16x448xf32, #tpu.memory_space<vmem>>, vector<1x16x448xf32>
    %3 = vector.shape_cast %2 : vector<1x16x448xf32> to vector<16x448xf32>
    %4 = arith.maximumf %1, %3 : vector<16x448xf32>
    %c2 = arith.constant 2 : index
    %c0_4 = arith.constant 0 : index
    %c0_5 = arith.constant 0 : index
    %5 = vector.load %arg1[%c2, %c0_4, %c0_5] : memref<9x16x448xf32, #tpu.memory_space<vmem>>, vector<1x16x448xf32>
    %6 = vector.shape_cast %5 : vector<1x16x448xf32> to vector<16x448xf32>
    %7 = arith.maximumf %4, %6 : vector<16x448xf32>
    %c3 = arith.constant 3 : index
    %c0_6 = arith.constant 0 : index
    %c0_7 = arith.constant 0 : index
    %8 = vector.load %arg1[%c3, %c0_6, %c0_7] : memref<9x16x448xf32, #tpu.memory_space<vmem>>, vector<1x16x448xf32>
    %9 = vector.shape_cast %8 : vector<1x16x448xf32> to vector<16x448xf32>
    %10 = arith.maximumf %7, %9 : vector<16x448xf32>
    %c4 = arith.constant 4 : index
    %c0_8 = arith.constant 0 : index
    %c0_9 = arith.constant 0 : index
    %11 = vector.load %arg1[%c4, %c0_8, %c0_9] : memref<9x16x448xf32, #tpu.memory_space<vmem>>, vector<1x16x448xf32>
    %12 = vector.shape_cast %11 : vector<1x16x448xf32> to vector<16x448xf32>
    %13 = arith.maximumf %10, %12 : vector<16x448xf32>
    %c5 = arith.constant 5 : index
    %c0_10 = arith.constant 0 : index
    %c0_11 = arith.constant 0 : index
    %14 = vector.load %arg1[%c5, %c0_10, %c0_11] : memref<9x16x448xf32, #tpu.memory_space<vmem>>, vector<1x16x448xf32>
    %15 = vector.shape_cast %14 : vector<1x16x448xf32> to vector<16x448xf32>
    %16 = arith.maximumf %13, %15 : vector<16x448xf32>
    %c6 = arith.constant 6 : index
    %c0_12 = arith.constant 0 : index
    %c0_13 = arith.constant 0 : index
    %17 = vector.load %arg1[%c6, %c0_12, %c0_13] : memref<9x16x448xf32, #tpu.memory_space<vmem>>, vector<1x16x448xf32>
    %18 = vector.shape_cast %17 : vector<1x16x448xf32> to vector<16x448xf32>
    %19 = arith.maximumf %16, %18 : vector<16x448xf32>
    %c7 = arith.constant 7 : index
    %c0_14 = arith.constant 0 : index
    %c0_15 = arith.constant 0 : index
    %20 = vector.load %arg1[%c7, %c0_14, %c0_15] : memref<9x16x448xf32, #tpu.memory_space<vmem>>, vector<1x16x448xf32>
    %21 = vector.shape_cast %20 : vector<1x16x448xf32> to vector<16x448xf32>
    %22 = arith.maximumf %19, %21 : vector<16x448xf32>
    %c8 = arith.constant 8 : index
    %c0_16 = arith.constant 0 : index
    %c0_17 = arith.constant 0 : index
    %23 = vector.load %arg1[%c8, %c0_16, %c0_17] : memref<9x16x448xf32, #tpu.memory_space<vmem>>, vector<1x16x448xf32>
    %24 = vector.shape_cast %23 : vector<1x16x448xf32> to vector<16x448xf32>
    %25 = arith.maximumf %22, %24 : vector<16x448xf32>
    %c0_18 = arith.constant 0 : index
    %c0_19 = arith.constant 0 : index
    %26 = vector.load %arg2[%c0_18, %c0_19] : memref<16x448xf32, #tpu.memory_space<vmem>>, vector<16x448xf32>
    tpu.vector_store %arg2[%c0_18, %c0_19], %25 {strides = array<i32>} : memref<16x448xf32, #tpu.memory_space<vmem>>, vector<16x448xf32>,
    return
  }
  func.func @transform_0(%arg0: i32) -> (i32, i32, i32) {
    %c0_i32 = arith.constant 0 : i32
    %c0_i32_0 = arith.constant 0 : i32
    %c0_i32_1 = arith.constant 0 : i32
    return %c0_i32, %arg0, %c0_i32_0 : i32, i32, i32
  }
  func.func @transform_1(%arg0: i32) -> (i32, i32) {
    %c0_i32 = arith.constant 0 : i32
    %c0_i32_0 = arith.constant 0 : i32
    return %arg0, %c0_i32 : i32, i32
  }
}

module attributes {stable_mosaic.version = 11 : i64} {
  func.func @_matmul_bias_relu_kernel(%arg0: i32, %arg1: i32, %arg2: i32, %arg3: memref<104x256xf32, #tpu.memory_space<vmem>>, %arg4: memref<256x128xf32, #tpu.memory_space<vmem>>, %arg5: memref<1x128xf32, #tpu.memory_space<vmem>>, %arg6: memref<104x128xf32, #tpu.memory_space<vmem>>, %arg7: memref<104x128xf32, #tpu.memory_space<vmem>>) attributes {dimension_semantics = [#tpu.dimension_semantics<parallel>, #tpu.dimension_semantics<parallel>, #tpu.dimension_semantics<arbitrary>], iteration_bounds = array<i64: 1, 2, 7>, scalar_prefetch = 0 : i64, scratch_operands = 1 : i64, tpu.core_type = #tpu.core_type<tc>, window_params = [{transform_indices = @transform_0, window_bounds = array<i64: 104, 256>}, {transform_indices = @transform_1, window_bounds = array<i64: 256, 128>}, {transform_indices = @transform_2, window_bounds = array<i64: 1, 128>}, {transform_indices = @transform_3, window_bounds = array<i64: 104, 128>}]} {
    %c0_i32 = arith.constant 0 : i32
    %0 = arith.cmpi eq, %arg2, %c0_i32 : i32
    %1 = arith.extui %0 : i1 to i32
    %c0_i32_0 = arith.constant 0 : i32
    %2 = arith.cmpi ne, %1, %c0_i32_0 : i32
    scf.if %2 {
      %cst_9 = arith.constant 0.000000e+00 : f32
      %12 = vector.broadcast %cst_9 : f32 to vector<104x128xf32>
      %c0_10 = arith.constant 0 : index
      %c0_11 = arith.constant 0 : index
      %13 = vector.load %arg7[%c0_10, %c0_11] : memref<104x128xf32, #tpu.memory_space<vmem>>, vector<104x128xf32>
      tpu.vector_store %arg7[%c0_10, %c0_11], %12 {strides = array<i32>} : memref<104x128xf32, #tpu.memory_space<vmem>>, vector<104x128xf32>,
    } else {
    }
    %c0 = arith.constant 0 : index
    %c0_1 = arith.constant 0 : index
    %3 = vector.load %arg7[%c0, %c0_1] : memref<104x128xf32, #tpu.memory_space<vmem>>, vector<104x128xf32>
    %c0_2 = arith.constant 0 : index
    %c0_3 = arith.constant 0 : index
    %4 = vector.load %arg3[%c0_2, %c0_3] : memref<104x256xf32, #tpu.memory_space<vmem>>, vector<104x256xf32>
    %c0_4 = arith.constant 0 : index
    %c0_5 = arith.constant 0 : index
    %5 = vector.load %arg4[%c0_4, %c0_5] : memref<256x128xf32, #tpu.memory_space<vmem>>, vector<256x128xf32>
    %cst = arith.constant dense<0.000000e+00> : vector<104x128xf32>
    %6 = tpu.matmul %4, %5, %cst {dimension_numbers = #tpu.dot_dimension_numbers<[1], [0], [0], [1], [0, 0, 1, 1], [], []>} : vector<104x256xf32>, vector<256x128xf32>, vector<104x128xf32> -> vector<104x128xf32>
    %7 = arith.addf %3, %6 : vector<104x128xf32>
    %c0_6 = arith.constant 0 : index
    %c0_7 = arith.constant 0 : index
    %8 = vector.load %arg7[%c0_6, %c0_7] : memref<104x128xf32, #tpu.memory_space<vmem>>, vector<104x128xf32>
    tpu.vector_store %arg7[%c0_6, %c0_7], %7 {strides = array<i32>} : memref<104x128xf32, #tpu.memory_space<vmem>>, vector<104x128xf32>,
    %c6_i32 = arith.constant 6 : i32
    %9 = arith.cmpi eq, %arg2, %c6_i32 : i32
    %10 = arith.extui %9 : i1 to i32
    %c0_i32_8 = arith.constant 0 : i32
    %11 = arith.cmpi ne, %10, %c0_i32_8 : i32
    scf.if %11 {
      %c0_9 = arith.constant 0 : index
      %c0_10 = arith.constant 0 : index
      %12 = vector.load %arg7[%c0_9, %c0_10] : memref<104x128xf32, #tpu.memory_space<vmem>>, vector<104x128xf32>
      %c0_11 = arith.constant 0 : index
      %c0_12 = arith.constant 0 : index
      %13 = vector.load %arg5[%c0_11, %c0_12] : memref<1x128xf32, #tpu.memory_space<vmem>>, vector<1x128xf32>
      %14 = vector.broadcast %13 : vector<1x128xf32> to vector<104x128xf32>
      %15 = arith.addf %12, %14 : vector<104x128xf32>
      %cst_13 = arith.constant 0.000000e+00 : f32
      %16 = vector.broadcast %cst_13 : f32 to vector<104x128xf32>
      %17 = arith.maximumf %15, %16 : vector<104x128xf32>
      %c0_14 = arith.constant 0 : index
      %c0_15 = arith.constant 0 : index
      %18 = vector.load %arg6[%c0_14, %c0_15] : memref<104x128xf32, #tpu.memory_space<vmem>>, vector<104x128xf32>
      tpu.vector_store %arg6[%c0_14, %c0_15], %17 {strides = array<i32>} : memref<104x128xf32, #tpu.memory_space<vmem>>, vector<104x128xf32>,
    } else {
    }
    return
  }
  func.func @transform_0(%arg0: i32, %arg1: i32, %arg2: i32) -> (i32, i32) {
    %c0_i32 = arith.constant 0 : i32
    return %arg0, %arg2 : i32, i32
  }
  func.func @transform_1(%arg0: i32, %arg1: i32, %arg2: i32) -> (i32, i32) {
    %c0_i32 = arith.constant 0 : i32
    return %arg2, %arg1 : i32, i32
  }
  func.func @transform_2(%arg0: i32, %arg1: i32, %arg2: i32) -> (i32, i32) {
    %c0_i32 = arith.constant 0 : i32
    %c0_i32_0 = arith.constant 0 : i32
    return %c0_i32, %arg1 : i32, i32
  }
  func.func @transform_3(%arg0: i32, %arg1: i32, %arg2: i32) -> (i32, i32) {
    %c0_i32 = arith.constant 0 : i32
    return %arg0, %arg1 : i32, i32
  }
}

module attributes {stable_mosaic.version = 11 : i64} {
  func.func @_max_reduce_kernel(%arg0: i32, %arg1: memref<9x8x576xf32, #tpu.memory_space<vmem>>, %arg2: memref<8x576xf32, #tpu.memory_space<vmem>>) attributes {dimension_semantics = [#tpu.dimension_semantics<parallel>], iteration_bounds = array<i64: 1>, scalar_prefetch = 0 : i64, scratch_operands = 0 : i64, tpu.core_type = #tpu.core_type<tc>, window_params = [{transform_indices = @transform_0, window_bounds = array<i64: 9, 8, 576>}, {transform_indices = @transform_1, window_bounds = array<i64: 8, 576>}]} {
    %c0 = arith.constant 0 : index
    %c0_0 = arith.constant 0 : index
    %c0_1 = arith.constant 0 : index
    %0 = vector.load %arg1[%c0, %c0_0, %c0_1] : memref<9x8x576xf32, #tpu.memory_space<vmem>>, vector<1x8x576xf32>
    %1 = vector.shape_cast %0 : vector<1x8x576xf32> to vector<8x576xf32>
    %c1 = arith.constant 1 : index
    %c0_2 = arith.constant 0 : index
    %c0_3 = arith.constant 0 : index
    %2 = vector.load %arg1[%c1, %c0_2, %c0_3] : memref<9x8x576xf32, #tpu.memory_space<vmem>>, vector<1x8x576xf32>
    %3 = vector.shape_cast %2 : vector<1x8x576xf32> to vector<8x576xf32>
    %4 = arith.maximumf %1, %3 : vector<8x576xf32>
    %c2 = arith.constant 2 : index
    %c0_4 = arith.constant 0 : index
    %c0_5 = arith.constant 0 : index
    %5 = vector.load %arg1[%c2, %c0_4, %c0_5] : memref<9x8x576xf32, #tpu.memory_space<vmem>>, vector<1x8x576xf32>
    %6 = vector.shape_cast %5 : vector<1x8x576xf32> to vector<8x576xf32>
    %7 = arith.maximumf %4, %6 : vector<8x576xf32>
    %c3 = arith.constant 3 : index
    %c0_6 = arith.constant 0 : index
    %c0_7 = arith.constant 0 : index
    %8 = vector.load %arg1[%c3, %c0_6, %c0_7] : memref<9x8x576xf32, #tpu.memory_space<vmem>>, vector<1x8x576xf32>
    %9 = vector.shape_cast %8 : vector<1x8x576xf32> to vector<8x576xf32>
    %10 = arith.maximumf %7, %9 : vector<8x576xf32>
    %c4 = arith.constant 4 : index
    %c0_8 = arith.constant 0 : index
    %c0_9 = arith.constant 0 : index
    %11 = vector.load %arg1[%c4, %c0_8, %c0_9] : memref<9x8x576xf32, #tpu.memory_space<vmem>>, vector<1x8x576xf32>
    %12 = vector.shape_cast %11 : vector<1x8x576xf32> to vector<8x576xf32>
    %13 = arith.maximumf %10, %12 : vector<8x576xf32>
    %c5 = arith.constant 5 : index
    %c0_10 = arith.constant 0 : index
    %c0_11 = arith.constant 0 : index
    %14 = vector.load %arg1[%c5, %c0_10, %c0_11] : memref<9x8x576xf32, #tpu.memory_space<vmem>>, vector<1x8x576xf32>
    %15 = vector.shape_cast %14 : vector<1x8x576xf32> to vector<8x576xf32>
    %16 = arith.maximumf %13, %15 : vector<8x576xf32>
    %c6 = arith.constant 6 : index
    %c0_12 = arith.constant 0 : index
    %c0_13 = arith.constant 0 : index
    %17 = vector.load %arg1[%c6, %c0_12, %c0_13] : memref<9x8x576xf32, #tpu.memory_space<vmem>>, vector<1x8x576xf32>
    %18 = vector.shape_cast %17 : vector<1x8x576xf32> to vector<8x576xf32>
    %19 = arith.maximumf %16, %18 : vector<8x576xf32>
    %c7 = arith.constant 7 : index
    %c0_14 = arith.constant 0 : index
    %c0_15 = arith.constant 0 : index
    %20 = vector.load %arg1[%c7, %c0_14, %c0_15] : memref<9x8x576xf32, #tpu.memory_space<vmem>>, vector<1x8x576xf32>
    %21 = vector.shape_cast %20 : vector<1x8x576xf32> to vector<8x576xf32>
    %22 = arith.maximumf %19, %21 : vector<8x576xf32>
    %c8 = arith.constant 8 : index
    %c0_16 = arith.constant 0 : index
    %c0_17 = arith.constant 0 : index
    %23 = vector.load %arg1[%c8, %c0_16, %c0_17] : memref<9x8x576xf32, #tpu.memory_space<vmem>>, vector<1x8x576xf32>
    %24 = vector.shape_cast %23 : vector<1x8x576xf32> to vector<8x576xf32>
    %25 = arith.maximumf %22, %24 : vector<8x576xf32>
    %c0_18 = arith.constant 0 : index
    %c0_19 = arith.constant 0 : index
    %26 = vector.load %arg2[%c0_18, %c0_19] : memref<8x576xf32, #tpu.memory_space<vmem>>, vector<8x576xf32>
    tpu.vector_store %arg2[%c0_18, %c0_19], %25 {strides = array<i32>} : memref<8x576xf32, #tpu.memory_space<vmem>>, vector<8x576xf32>,
    return
  }
  func.func @transform_0(%arg0: i32) -> (i32, i32, i32) {
    %c0_i32 = arith.constant 0 : i32
    %c0_i32_0 = arith.constant 0 : i32
    %c0_i32_1 = arith.constant 0 : i32
    return %c0_i32, %arg0, %c0_i32_0 : i32, i32, i32
  }
  func.func @transform_1(%arg0: i32) -> (i32, i32) {
    %c0_i32 = arith.constant 0 : i32
    %c0_i32_0 = arith.constant 0 : i32
    return %arg0, %c0_i32 : i32, i32
  }
}

module attributes {stable_mosaic.version = 11 : i64} {
  func.func @_matmul_bias_relu_kernel(%arg0: i32, %arg1: i32, %arg2: i32, %arg3: memref<24x256xf32, #tpu.memory_space<vmem>>, %arg4: memref<256x128xf32, #tpu.memory_space<vmem>>, %arg5: memref<1x128xf32, #tpu.memory_space<vmem>>, %arg6: memref<24x128xf32, #tpu.memory_space<vmem>>, %arg7: memref<24x128xf32, #tpu.memory_space<vmem>>) attributes {dimension_semantics = [#tpu.dimension_semantics<parallel>, #tpu.dimension_semantics<parallel>, #tpu.dimension_semantics<arbitrary>], iteration_bounds = array<i64: 1, 3, 7>, scalar_prefetch = 0 : i64, scratch_operands = 1 : i64, tpu.core_type = #tpu.core_type<tc>, window_params = [{transform_indices = @transform_0, window_bounds = array<i64: 24, 256>}, {transform_indices = @transform_1, window_bounds = array<i64: 256, 128>}, {transform_indices = @transform_2, window_bounds = array<i64: 1, 128>}, {transform_indices = @transform_3, window_bounds = array<i64: 24, 128>}]} {
    %c0_i32 = arith.constant 0 : i32
    %0 = arith.cmpi eq, %arg2, %c0_i32 : i32
    %1 = arith.extui %0 : i1 to i32
    %c0_i32_0 = arith.constant 0 : i32
    %2 = arith.cmpi ne, %1, %c0_i32_0 : i32
    scf.if %2 {
      %cst_9 = arith.constant 0.000000e+00 : f32
      %12 = vector.broadcast %cst_9 : f32 to vector<24x128xf32>
      %c0_10 = arith.constant 0 : index
      %c0_11 = arith.constant 0 : index
      %13 = vector.load %arg7[%c0_10, %c0_11] : memref<24x128xf32, #tpu.memory_space<vmem>>, vector<24x128xf32>
      tpu.vector_store %arg7[%c0_10, %c0_11], %12 {strides = array<i32>} : memref<24x128xf32, #tpu.memory_space<vmem>>, vector<24x128xf32>,
    } else {
    }
    %c0 = arith.constant 0 : index
    %c0_1 = arith.constant 0 : index
    %3 = vector.load %arg7[%c0, %c0_1] : memref<24x128xf32, #tpu.memory_space<vmem>>, vector<24x128xf32>
    %c0_2 = arith.constant 0 : index
    %c0_3 = arith.constant 0 : index
    %4 = vector.load %arg3[%c0_2, %c0_3] : memref<24x256xf32, #tpu.memory_space<vmem>>, vector<24x256xf32>
    %c0_4 = arith.constant 0 : index
    %c0_5 = arith.constant 0 : index
    %5 = vector.load %arg4[%c0_4, %c0_5] : memref<256x128xf32, #tpu.memory_space<vmem>>, vector<256x128xf32>
    %cst = arith.constant dense<0.000000e+00> : vector<24x128xf32>
    %6 = tpu.matmul %4, %5, %cst {dimension_numbers = #tpu.dot_dimension_numbers<[1], [0], [0], [1], [0, 0, 1, 1], [], []>} : vector<24x256xf32>, vector<256x128xf32>, vector<24x128xf32> -> vector<24x128xf32>
    %7 = arith.addf %3, %6 : vector<24x128xf32>
    %c0_6 = arith.constant 0 : index
    %c0_7 = arith.constant 0 : index
    %8 = vector.load %arg7[%c0_6, %c0_7] : memref<24x128xf32, #tpu.memory_space<vmem>>, vector<24x128xf32>
    tpu.vector_store %arg7[%c0_6, %c0_7], %7 {strides = array<i32>} : memref<24x128xf32, #tpu.memory_space<vmem>>, vector<24x128xf32>,
    %c6_i32 = arith.constant 6 : i32
    %9 = arith.cmpi eq, %arg2, %c6_i32 : i32
    %10 = arith.extui %9 : i1 to i32
    %c0_i32_8 = arith.constant 0 : i32
    %11 = arith.cmpi ne, %10, %c0_i32_8 : i32
    scf.if %11 {
      %c0_9 = arith.constant 0 : index
      %c0_10 = arith.constant 0 : index
      %12 = vector.load %arg7[%c0_9, %c0_10] : memref<24x128xf32, #tpu.memory_space<vmem>>, vector<24x128xf32>
      %c0_11 = arith.constant 0 : index
      %c0_12 = arith.constant 0 : index
      %13 = vector.load %arg5[%c0_11, %c0_12] : memref<1x128xf32, #tpu.memory_space<vmem>>, vector<1x128xf32>
      %14 = vector.broadcast %13 : vector<1x128xf32> to vector<24x128xf32>
      %15 = arith.addf %12, %14 : vector<24x128xf32>
      %cst_13 = arith.constant 0.000000e+00 : f32
      %16 = vector.broadcast %cst_13 : f32 to vector<24x128xf32>
      %17 = arith.maximumf %15, %16 : vector<24x128xf32>
      %c0_14 = arith.constant 0 : index
      %c0_15 = arith.constant 0 : index
      %18 = vector.load %arg6[%c0_14, %c0_15] : memref<24x128xf32, #tpu.memory_space<vmem>>, vector<24x128xf32>
      tpu.vector_store %arg6[%c0_14, %c0_15], %17 {strides = array<i32>} : memref<24x128xf32, #tpu.memory_space<vmem>>, vector<24x128xf32>,
    } else {
    }
    return
  }
  func.func @transform_0(%arg0: i32, %arg1: i32, %arg2: i32) -> (i32, i32) {
    %c0_i32 = arith.constant 0 : i32
    return %arg0, %arg2 : i32, i32
  }
  func.func @transform_1(%arg0: i32, %arg1: i32, %arg2: i32) -> (i32, i32) {
    %c0_i32 = arith.constant 0 : i32
    return %arg2, %arg1 : i32, i32
  }
  func.func @transform_2(%arg0: i32, %arg1: i32, %arg2: i32) -> (i32, i32) {
    %c0_i32 = arith.constant 0 : i32
    %c0_i32_0 = arith.constant 0 : i32
    return %c0_i32, %arg1 : i32, i32
  }
  func.func @transform_3(%arg0: i32, %arg1: i32, %arg2: i32) -> (i32, i32) {
    %c0_i32 = arith.constant 0 : i32
    return %arg0, %arg1 : i32, i32
  }
}

module attributes {stable_mosaic.version = 11 : i64} {
  func.func @_matmul_bias_relu_kernel(%arg0: i32, %arg1: i32, %arg2: i32, %arg3: memref<24x256xf32, #tpu.memory_space<vmem>>, %arg4: memref<256x128xf32, #tpu.memory_space<vmem>>, %arg5: memref<1x128xf32, #tpu.memory_space<vmem>>, %arg6: memref<24x128xf32, #tpu.memory_space<vmem>>, %arg7: memref<24x128xf32, #tpu.memory_space<vmem>>) attributes {dimension_semantics = [#tpu.dimension_semantics<parallel>, #tpu.dimension_semantics<parallel>, #tpu.dimension_semantics<arbitrary>], iteration_bounds = array<i64: 1, 2, 14>, scalar_prefetch = 0 : i64, scratch_operands = 1 : i64, tpu.core_type = #tpu.core_type<tc>, window_params = [{transform_indices = @transform_0, window_bounds = array<i64: 24, 256>}, {transform_indices = @transform_1, window_bounds = array<i64: 256, 128>}, {transform_indices = @transform_2, window_bounds = array<i64: 1, 128>}, {transform_indices = @transform_3, window_bounds = array<i64: 24, 128>}]} {
    %c0_i32 = arith.constant 0 : i32
    %0 = arith.cmpi eq, %arg2, %c0_i32 : i32
    %1 = arith.extui %0 : i1 to i32
    %c0_i32_0 = arith.constant 0 : i32
    %2 = arith.cmpi ne, %1, %c0_i32_0 : i32
    scf.if %2 {
      %cst_9 = arith.constant 0.000000e+00 : f32
      %12 = vector.broadcast %cst_9 : f32 to vector<24x128xf32>
      %c0_10 = arith.constant 0 : index
      %c0_11 = arith.constant 0 : index
      %13 = vector.load %arg7[%c0_10, %c0_11] : memref<24x128xf32, #tpu.memory_space<vmem>>, vector<24x128xf32>
      tpu.vector_store %arg7[%c0_10, %c0_11], %12 {strides = array<i32>} : memref<24x128xf32, #tpu.memory_space<vmem>>, vector<24x128xf32>,
    } else {
    }
    %c0 = arith.constant 0 : index
    %c0_1 = arith.constant 0 : index
    %3 = vector.load %arg7[%c0, %c0_1] : memref<24x128xf32, #tpu.memory_space<vmem>>, vector<24x128xf32>
    %c0_2 = arith.constant 0 : index
    %c0_3 = arith.constant 0 : index
    %4 = vector.load %arg3[%c0_2, %c0_3] : memref<24x256xf32, #tpu.memory_space<vmem>>, vector<24x256xf32>
    %c0_4 = arith.constant 0 : index
    %c0_5 = arith.constant 0 : index
    %5 = vector.load %arg4[%c0_4, %c0_5] : memref<256x128xf32, #tpu.memory_space<vmem>>, vector<256x128xf32>
    %cst = arith.constant dense<0.000000e+00> : vector<24x128xf32>
    %6 = tpu.matmul %4, %5, %cst {dimension_numbers = #tpu.dot_dimension_numbers<[1], [0], [0], [1], [0, 0, 1, 1], [], []>} : vector<24x256xf32>, vector<256x128xf32>, vector<24x128xf32> -> vector<24x128xf32>
    %7 = arith.addf %3, %6 : vector<24x128xf32>
    %c0_6 = arith.constant 0 : index
    %c0_7 = arith.constant 0 : index
    %8 = vector.load %arg7[%c0_6, %c0_7] : memref<24x128xf32, #tpu.memory_space<vmem>>, vector<24x128xf32>
    tpu.vector_store %arg7[%c0_6, %c0_7], %7 {strides = array<i32>} : memref<24x128xf32, #tpu.memory_space<vmem>>, vector<24x128xf32>,
    %c13_i32 = arith.constant 13 : i32
    %9 = arith.cmpi eq, %arg2, %c13_i32 : i32
    %10 = arith.extui %9 : i1 to i32
    %c0_i32_8 = arith.constant 0 : i32
    %11 = arith.cmpi ne, %10, %c0_i32_8 : i32
    scf.if %11 {
      %c0_9 = arith.constant 0 : index
      %c0_10 = arith.constant 0 : index
      %12 = vector.load %arg7[%c0_9, %c0_10] : memref<24x128xf32, #tpu.memory_space<vmem>>, vector<24x128xf32>
      %c0_11 = arith.constant 0 : index
      %c0_12 = arith.constant 0 : index
      %13 = vector.load %arg5[%c0_11, %c0_12] : memref<1x128xf32, #tpu.memory_space<vmem>>, vector<1x128xf32>
      %14 = vector.broadcast %13 : vector<1x128xf32> to vector<24x128xf32>
      %15 = arith.addf %12, %14 : vector<24x128xf32>
      %cst_13 = arith.constant 0.000000e+00 : f32
      %16 = vector.broadcast %cst_13 : f32 to vector<24x128xf32>
      %17 = arith.maximumf %15, %16 : vector<24x128xf32>
      %c0_14 = arith.constant 0 : index
      %c0_15 = arith.constant 0 : index
      %18 = vector.load %arg6[%c0_14, %c0_15] : memref<24x128xf32, #tpu.memory_space<vmem>>, vector<24x128xf32>
      tpu.vector_store %arg6[%c0_14, %c0_15], %17 {strides = array<i32>} : memref<24x128xf32, #tpu.memory_space<vmem>>, vector<24x128xf32>,
    } else {
    }
    return
  }
  func.func @transform_0(%arg0: i32, %arg1: i32, %arg2: i32) -> (i32, i32) {
    %c0_i32 = arith.constant 0 : i32
    return %arg0, %arg2 : i32, i32
  }
  func.func @transform_1(%arg0: i32, %arg1: i32, %arg2: i32) -> (i32, i32) {
    %c0_i32 = arith.constant 0 : i32
    return %arg2, %arg1 : i32, i32
  }
  func.func @transform_2(%arg0: i32, %arg1: i32, %arg2: i32) -> (i32, i32) {
    %c0_i32 = arith.constant 0 : i32
    %c0_i32_0 = arith.constant 0 : i32
    return %c0_i32, %arg1 : i32, i32
  }
  func.func @transform_3(%arg0: i32, %arg1: i32, %arg2: i32) -> (i32, i32) {
    %c0_i32 = arith.constant 0 : i32
    return %arg0, %arg1 : i32, i32
  }
}

module attributes {stable_mosaic.version = 11 : i64} {
  func.func @_matmul_bias_relu_kernel(%arg0: i32, %arg1: i32, %arg2: i32, %arg3: memref<24x256xf32, #tpu.memory_space<vmem>>, %arg4: memref<256x128xf32, #tpu.memory_space<vmem>>, %arg5: memref<1x128xf32, #tpu.memory_space<vmem>>, %arg6: memref<24x128xf32, #tpu.memory_space<vmem>>, %arg7: memref<24x128xf32, #tpu.memory_space<vmem>>) attributes {dimension_semantics = [#tpu.dimension_semantics<parallel>, #tpu.dimension_semantics<parallel>, #tpu.dimension_semantics<arbitrary>], iteration_bounds = array<i64: 1, 2, 9>, scalar_prefetch = 0 : i64, scratch_operands = 1 : i64, tpu.core_type = #tpu.core_type<tc>, window_params = [{transform_indices = @transform_0, window_bounds = array<i64: 24, 256>}, {transform_indices = @transform_1, window_bounds = array<i64: 256, 128>}, {transform_indices = @transform_2, window_bounds = array<i64: 1, 128>}, {transform_indices = @transform_3, window_bounds = array<i64: 24, 128>}]} {
    %c0_i32 = arith.constant 0 : i32
    %0 = arith.cmpi eq, %arg2, %c0_i32 : i32
    %1 = arith.extui %0 : i1 to i32
    %c0_i32_0 = arith.constant 0 : i32
    %2 = arith.cmpi ne, %1, %c0_i32_0 : i32
    scf.if %2 {
      %cst_9 = arith.constant 0.000000e+00 : f32
      %12 = vector.broadcast %cst_9 : f32 to vector<24x128xf32>
      %c0_10 = arith.constant 0 : index
      %c0_11 = arith.constant 0 : index
      %13 = vector.load %arg7[%c0_10, %c0_11] : memref<24x128xf32, #tpu.memory_space<vmem>>, vector<24x128xf32>
      tpu.vector_store %arg7[%c0_10, %c0_11], %12 {strides = array<i32>} : memref<24x128xf32, #tpu.memory_space<vmem>>, vector<24x128xf32>,
    } else {
    }
    %c0 = arith.constant 0 : index
    %c0_1 = arith.constant 0 : index
    %3 = vector.load %arg7[%c0, %c0_1] : memref<24x128xf32, #tpu.memory_space<vmem>>, vector<24x128xf32>
    %c0_2 = arith.constant 0 : index
    %c0_3 = arith.constant 0 : index
    %4 = vector.load %arg3[%c0_2, %c0_3] : memref<24x256xf32, #tpu.memory_space<vmem>>, vector<24x256xf32>
    %c0_4 = arith.constant 0 : index
    %c0_5 = arith.constant 0 : index
    %5 = vector.load %arg4[%c0_4, %c0_5] : memref<256x128xf32, #tpu.memory_space<vmem>>, vector<256x128xf32>
    %cst = arith.constant dense<0.000000e+00> : vector<24x128xf32>
    %6 = tpu.matmul %4, %5, %cst {dimension_numbers = #tpu.dot_dimension_numbers<[1], [0], [0], [1], [0, 0, 1, 1], [], []>} : vector<24x256xf32>, vector<256x128xf32>, vector<24x128xf32> -> vector<24x128xf32>
    %7 = arith.addf %3, %6 : vector<24x128xf32>
    %c0_6 = arith.constant 0 : index
    %c0_7 = arith.constant 0 : index
    %8 = vector.load %arg7[%c0_6, %c0_7] : memref<24x128xf32, #tpu.memory_space<vmem>>, vector<24x128xf32>
    tpu.vector_store %arg7[%c0_6, %c0_7], %7 {strides = array<i32>} : memref<24x128xf32, #tpu.memory_space<vmem>>, vector<24x128xf32>,
    %c8_i32 = arith.constant 8 : i32
    %9 = arith.cmpi eq, %arg2, %c8_i32 : i32
    %10 = arith.extui %9 : i1 to i32
    %c0_i32_8 = arith.constant 0 : i32
    %11 = arith.cmpi ne, %10, %c0_i32_8 : i32
    scf.if %11 {
      %c0_9 = arith.constant 0 : index
      %c0_10 = arith.constant 0 : index
      %12 = vector.load %arg7[%c0_9, %c0_10] : memref<24x128xf32, #tpu.memory_space<vmem>>, vector<24x128xf32>
      %c0_11 = arith.constant 0 : index
      %c0_12 = arith.constant 0 : index
      %13 = vector.load %arg5[%c0_11, %c0_12] : memref<1x128xf32, #tpu.memory_space<vmem>>, vector<1x128xf32>
      %14 = vector.broadcast %13 : vector<1x128xf32> to vector<24x128xf32>
      %15 = arith.addf %12, %14 : vector<24x128xf32>
      %cst_13 = arith.constant 0.000000e+00 : f32
      %16 = vector.broadcast %cst_13 : f32 to vector<24x128xf32>
      %17 = arith.maximumf %15, %16 : vector<24x128xf32>
      %c0_14 = arith.constant 0 : index
      %c0_15 = arith.constant 0 : index
      %18 = vector.load %arg6[%c0_14, %c0_15] : memref<24x128xf32, #tpu.memory_space<vmem>>, vector<24x128xf32>
      tpu.vector_store %arg6[%c0_14, %c0_15], %17 {strides = array<i32>} : memref<24x128xf32, #tpu.memory_space<vmem>>, vector<24x128xf32>,
    } else {
    }
    return
  }
  func.func @transform_0(%arg0: i32, %arg1: i32, %arg2: i32) -> (i32, i32) {
    %c0_i32 = arith.constant 0 : i32
    return %arg0, %arg2 : i32, i32
  }
  func.func @transform_1(%arg0: i32, %arg1: i32, %arg2: i32) -> (i32, i32) {
    %c0_i32 = arith.constant 0 : i32
    return %arg2, %arg1 : i32, i32
  }
  func.func @transform_2(%arg0: i32, %arg1: i32, %arg2: i32) -> (i32, i32) {
    %c0_i32 = arith.constant 0 : i32
    %c0_i32_0 = arith.constant 0 : i32
    return %c0_i32, %arg1 : i32, i32
  }
  func.func @transform_3(%arg0: i32, %arg1: i32, %arg2: i32) -> (i32, i32) {
    %c0_i32 = arith.constant 0 : i32
    return %arg0, %arg1 : i32, i32
  }
}

</mosaic_0001>

<bundles_post_ra>
// kernel: alexnet_forward.7
= control target key start
LH: loop header
LB: loop body
LE: loop exit
PB: predicated region body
PF: predicated region fallthrough
CT: control target
= control target key end

     0   :  { %s1346_s12 = smov 0   ;;  %s1348_s13 = smov 0   ;;  %s1775_s0 = inlined_call_operand.vmem [shape: f32[512,512], index: 0, kind: input, shape index: {}]   ;;  %s1776_s1 = inlined_call_operand.vmem [shape: f32[512,128], index: 1, kind: input, shape index: {}]   ;;  %s1777_s2 = inlined_call_operand.vmem [shape: f32[1,128], index: 2, kind: input, shape index: {}]   ;;  %s1778_s3 = inlined_call_operand.vmem [shape: f32[512,128], index: 3, kind: output, shape index: {}]  }
   0x1   :  { %s1350_s14 = smov 0   ;;  %s1352_s15 = smov 0  }
   0x2   :  { %s1354_s16 = smov 0   ;;  %s1356_s17 = smov 0  }
   0x3   :  { %s1358_s18 = smov 0  }
   0x4 LB: > { %s25_s19 = sadd.s32 1, %s1314_s16  ;;  %s32_s20 = sadd.s32 1, %s1318_s17  ;;  %s1322_s18 = sphi %s1358_s18, %s13_s18   ;;  %s1318_s17 = sphi %s1356_s17, %s1784_s17   ;;  %s1314_s16 = sphi %s1354_s16, %s1783_s16   ;;  %s1310_s15 = sphi %s1352_s15, %s1782_s15   ;;  %s1306_s14 = sphi %s1350_s14, %s1781_s14   ;;  %s1302_s13 = sphi %s1348_s13, %s1780_s13   ;;  %s1298_s12 = sphi %s1346_s12, %s1779_s12  }
   0x5   : > { %p26_p0 = scmp.ge.s32.totalorder %s25_s19, 2  ;;  %p48_p1 = scmp.ne.s32.totalorder %s1302_s13, %s1298_s12 }
   0x6   : > { %p49_p2 = scmp.eq.s32.totalorder %s1322_s18, 0  ;;  %s41_s24 = sadd.s32 1, %s1302_s13 }
   0x7   : > { %s1786_s19 = smov (%p26_p0, %s25_s19), 0  ;;  %s1788_s20 = smov (!%p26_p0, %s32_s20), %s1318_s17 }
   0x8   : > { %p50_p3 = por %p49_p2, %p48_p1  ;;  %p34_p4 = scmp.ge.s32.totalorder %s1788_s20, 2 }
   0x9   : > { %s37_s21 = ssub.s32 %s1314_s16, %s1786_s19  ;;  %p1112_p6 = scmp.ge.s32.totalorder %s1322_s18, 4 }
   0xa   : > { %s1790_s20 = smov (%p34_p4, %s1788_s20), 0 }
   0xb   : > { %s36_s22 = ssub.s32 %s1318_s17, %s1790_s20  ;;  %162 = sbr.rel (%p1112_p6) target bundleno = 57 (0x39), region = 20 }
   0xc   : > { %s38_s23 = sor.u32 %s37_s21, %s36_s22 }
   0xd   : > { %p39_p5 = scmp.eq.s32.totalorder %s38_s23, 0 }
   0xf   : > { %s1397_s25 = scalar_select %p39_p5, %s1302_s13, %s41_s24  }
  0x12   : > { %165 = sbr.rel (!%p50_p3) target bundleno = 57 (0x39), region = 24  ;;  %s167_s26 = sand.u32 (%p50_p3), 1, %s1302_s13  }
  0x13   : > { %s1115_s27 = sshll.u32 (%p50_p3), %s1314_s16, 1  ;;  %s1113_s28 = sshll.u32 (%p50_p3), %s167_s26, 9 }
  0x14   : > { %s1129_s29 = sshll.u32 (%p50_p3), %s1318_s17, 7  ;;  %s1411_s8 = scalar_lea.vmem (%p50_p3), [#allocation3], %s1113_s28 }
  0x15   : > { %s173_s30 = sadd.s32 (%p50_p3), %s1129_s29, %s1115_s27 }
  0x16   : > { %s1117_s4 = sshll.u32 (%p50_p3), %s173_s30, 3 }
  0x17   : > { %s1406_s7 = scalar_lea.vmem (%p50_p3), %s1775_s0, %s1117_s4 }
  0x18   : > { %v188_v0 = vld [vmem:[%s1406_s7] sm:$0xff] (%p50_p3)  ;;  %v190_v1 = vld [vmem:[%s1406_s7 + $0x8] sm:$0xff] (%p50_p3) }
  0x19   : > { %v192_v2 = vld [vmem:[%s1406_s7 + $0x20] sm:$0xff]  ;;  %189 = vst [vmem:[%s1411_s8] sm:$0xff] %v188_v0  ;;  %191 = vst [vmem:[%s1411_s8 + $0x8] sm:$0xff] %v190_v1  ;;  %v194_v3 = vld [vmem:[%s1406_s7 + $0x28] sm:$0xff] }
  0x1a   : > { %193 = vst [vmem:[%s1411_s8 + $0x10] sm:$0xff] %v192_v2  ;;  %v196_v4 = vld [vmem:[%s1406_s7 + $0x40] sm:$0xff]  ;;  %v198_v5 = vld [vmem:[%s1406_s7 + $0x48] sm:$0xff]  ;;  %195 = vst [vmem:[%s1411_s8 + $0x18] sm:$0xff] %v194_v3 }
  0x1b   : > { %197 = vst [vmem:[%s1411_s8 + $0x20] sm:$0xff] %v196_v4  ;;  %199 = vst [vmem:[%s1411_s8 + $0x28] sm:$0xff] %v198_v5  ;;  %v200_v6 = vld [vmem:[%s1406_s7 + $0x60] sm:$0xff]  ;;  %v202_v7 = vld [vmem:[%s1406_s7 + $0x68] sm:$0xff] }
  0x1c   : > { %v204_v8 = vld [vmem:[%s1406_s7 + $0x80] sm:$0xff]  ;;  %201 = vst [vmem:[%s1411_s8 + $0x30] sm:$0xff] %v200_v6  ;;  %203 = vst [vmem:[%s1411_s8 + $0x38] sm:$0xff] %v202_v7  ;;  %v206_v9 = vld [vmem:[%s1406_s7 + $0x88] sm:$0xff] }
  0x1d   : > { %205 = vst [vmem:[%s1411_s8 + $0x40] sm:$0xff] %v204_v8  ;;  %v208_v10 = vld [vmem:[%s1406_s7 + $0xa0] sm:$0xff]  ;;  %v210_v11 = vld [vmem:[%s1406_s7 + $0xa8] sm:$0xff]  ;;  %207 = vst [vmem:[%s1411_s8 + $0x48] sm:$0xff] %v206_v9 }
  0x1e   : > { %209 = vst [vmem:[%s1411_s8 + $0x50] sm:$0xff] %v208_v10  ;;  %211 = vst [vmem:[%s1411_s8 + $0x58] sm:$0xff] %v210_v11  ;;  %v212_v12 = vld [vmem:[%s1406_s7 + $0xc0] sm:$0xff]  ;;  %v214_v13 = vld [vmem:[%s1406_s7 + $0xc8] sm:$0xff] }
  0x1f   : > { %v216_v14 = vld [vmem:[%s1406_s7 + $0xe0] sm:$0xff]  ;;  %213 = vst [vmem:[%s1411_s8 + $0x60] sm:$0xff] %v212_v12  ;;  %215 = vst [vmem:[%s1411_s8 + $0x68] sm:$0xff] %v214_v13  ;;  %v218_v15 = vld [vmem:[%s1406_s7 + $0xe8] sm:$0xff] }
  0x20   : > { %217 = vst [vmem:[%s1411_s8 + $0x70] sm:$0xff] %v216_v14  ;;  %v220_v16 = vld [vmem:[%s1406_s7 + $0x100] sm:$0xff]  ;;  %v222_v17 = vld [vmem:[%s1406_s7 + $0x108] sm:$0xff]  ;;  %219 = vst [vmem:[%s1411_s8 + $0x78] sm:$0xff] %v218_v15 }
  0x21   : > { %221 = vst [vmem:[%s1411_s8 + $0x80] sm:$0xff] %v220_v16  ;;  %223 = vst [vmem:[%s1411_s8 + $0x88] sm:$0xff] %v222_v17  ;;  %v224_v18 = vld [vmem:[%s1406_s7 + $0x120] sm:$0xff]  ;;  %v226_v19 = vld [vmem:[%s1406_s7 + $0x128] sm:$0xff] }
  0x22   : > { %v228_v20 = vld [vmem:[%s1406_s7 + $0x140] sm:$0xff]  ;;  %225 = vst [vmem:[%s1411_s8 + $0x90] sm:$0xff] %v224_v18  ;;  %227 = vst [vmem:[%s1411_s8 + $0x98] sm:$0xff] %v226_v19  ;;  %v230_v21 = vld [vmem:[%s1406_s7 + $0x148] sm:$0xff] }
  0x23   : > { %229 = vst [vmem:[%s1411_s8 + $0xa0] sm:$0xff] %v228_v20  ;;  %v232_v22 = vld [vmem:[%s1406_s7 + $0x160] sm:$0xff]  ;;  %v234_v23 = vld [vmem:[%s1406_s7 + $0x168] sm:$0xff]  ;;  %231 = vst [vmem:[%s1411_s8 + $0xa8] sm:$0xff] %v230_v21 }
  0x24   : > { %233 = vst [vmem:[%s1411_s8 + $0xb0] sm:$0xff] %v232_v22  ;;  %235 = vst [vmem:[%s1411_s8 + $0xb8] sm:$0xff] %v234_v23  ;;  %v236_v24 = vld [vmem:[%s1406_s7 + $0x180] sm:$0xff]  ;;  %v238_v25 = vld [vmem:[%s1406_s7 + $0x188] sm:$0xff] }
  0x25   : > { %v240_v26 = vld [vmem:[%s1406_s7 + $0x1a0] sm:$0xff]  ;;  %237 = vst [vmem:[%s1411_s8 + $0xc0] sm:$0xff] %v236_v24  ;;  %239 = vst [vmem:[%s1411_s8 + $0xc8] sm:$0xff] %v238_v25  ;;  %v242_v27 = vld [vmem:[%s1406_s7 + $0x1a8] sm:$0xff] }
  0x26   : > { %241 = vst [vmem:[%s1411_s8 + $0xd0] sm:$0xff] %v240_v26  ;;  %v244_v28 = vld [vmem:[%s1406_s7 + $0x1c0] sm:$0xff]  ;;  %v246_v29 = vld [vmem:[%s1406_s7 + $0x1c8] sm:$0xff]  ;;  %243 = vst [vmem:[%s1411_s8 + $0xd8] sm:$0xff] %v242_v27 }
  0x27   : > { %245 = vst [vmem:[%s1411_s8 + $0xe0] sm:$0xff] %v244_v28  ;;  %247 = vst [vmem:[%s1411_s8 + $0xe8] sm:$0xff] %v246_v29  ;;  %v248_v30 = vld [vmem:[%s1406_s7 + $0x1e0] sm:$0xff]  ;;  %v250_v31 = vld [vmem:[%s1406_s7 + $0x1e8] sm:$0xff] }
  0x28   : > { %v252_v32 = vld [vmem:[%s1406_s7 + $0x200] sm:$0xff]  ;;  %249 = vst [vmem:[%s1411_s8 + $0xf0] sm:$0xff] %v248_v30  ;;  %251 = vst [vmem:[%s1411_s8 + $0xf8] sm:$0xff] %v250_v31  ;;  %v254_v33 = vld [vmem:[%s1406_s7 + $0x208] sm:$0xff] }
  0x29   : > { %253 = vst [vmem:[%s1411_s8 + $0x100] sm:$0xff] %v252_v32  ;;  %v256_v34 = vld [vmem:[%s1406_s7 + $0x220] sm:$0xff]  ;;  %v258_v35 = vld [vmem:[%s1406_s7 + $0x228] sm:$0xff]  ;;  %255 = vst [vmem:[%s1411_s8 + $0x108] sm:$0xff] %v254_v33 }
  0x2a   : > { %257 = vst [vmem:[%s1411_s8 + $0x110] sm:$0xff] %v256_v34  ;;  %259 = vst [vmem:[%s1411_s8 + $0x118] sm:$0xff] %v258_v35  ;;  %v260_v36 = vld [vmem:[%s1406_s7 + $0x240] sm:$0xff]  ;;  %v262_v37 = vld [vmem:[%s1406_s7 + $0x248] sm:$0xff] }
  0x2b   : > { %v264_v38 = vld [vmem:[%s1406_s7 + $0x260] sm:$0xff]  ;;  %261 = vst [vmem:[%s1411_s8 + $0x120] sm:$0xff] %v260_v36  ;;  %263 = vst [vmem:[%s1411_s8 + $0x128] sm:$0xff] %v262_v37  ;;  %v266_v39 = vld [vmem:[%s1406_s7 + $0x268] sm:$0xff] }
  0x2c   : > { %265 = vst [vmem:[%s1411_s8 + $0x130] sm:$0xff] %v264_v38  ;;  %v268_v40 = vld [vmem:[%s1406_s7 + $0x280] sm:$0xff]  ;;  %v270_v41 = vld [vmem:[%s1406_s7 + $0x288] sm:$0xff]  ;;  %267 = vst [vmem:[%s1411_s8 + $0x138] sm:$0xff] %v266_v39 }
  0x2d   : > { %269 = vst [vmem:[%s1411_s8 + $0x140] sm:$0xff] %v268_v40  ;;  %271 = vst [vmem:[%s1411_s8 + $0x148] sm:$0xff] %v270_v41  ;;  %v272_v42 = vld [vmem:[%s1406_s7 + $0x2a0] sm:$0xff]  ;;  %v274_v43 = vld [vmem:[%s1406_s7 + $0x2a8] sm:$0xff] }
  0x2e   : > { %v276_v44 = vld [vmem:[%s1406_s7 + $0x2c0] sm:$0xff]  ;;  %273 = vst [vmem:[%s1411_s8 + $0x150] sm:$0xff] %v272_v42  ;;  %275 = vst [vmem:[%s1411_s8 + $0x158] sm:$0xff] %v274_v43  ;;  %v278_v45 = vld [vmem:[%s1406_s7 + $0x2c8] sm:$0xff] }
  0x2f   : > { %277 = vst [vmem:[%s1411_s8 + $0x160] sm:$0xff] %v276_v44  ;;  %v280_v46 = vld [vmem:[%s1406_s7 + $0x2e0] sm:$0xff]  ;;  %v282_v47 = vld [vmem:[%s1406_s7 + $0x2e8] sm:$0xff]  ;;  %279 = vst [vmem:[%s1411_s8 + $0x168] sm:$0xff] %v278_v45 }
  0x30   : > { %281 = vst [vmem:[%s1411_s8 + $0x170] sm:$0xff] %v280_v46  ;;  %283 = vst [vmem:[%s1411_s8 + $0x178] sm:$0xff] %v282_v47  ;;  %v284_v48 = vld [vmem:[%s1406_s7 + $0x300] sm:$0xff]  ;;  %v286_v49 = vld [vmem:[%s1406_s7 + $0x308] sm:$0xff] }
  0x31   : > { %v288_v50 = vld [vmem:[%s1406_s7 + $0x320] sm:$0xff]  ;;  %285 = vst [vmem:[%s1411_s8 + $0x180] sm:$0xff] %v284_v48  ;;  %287 = vst [vmem:[%s1411_s8 + $0x188] sm:$0xff] %v286_v49  ;;  %v290_v51 = vld [vmem:[%s1406_s7 + $0x328] sm:$0xff] }
  0x32   : > { %289 = vst [vmem:[%s1411_s8 + $0x190] sm:$0xff] %v288_v50  ;;  %v292_v52 = vld [vmem:[%s1406_s7 + $0x340] sm:$0xff]  ;;  %v294_v53 = vld [vmem:[%s1406_s7 + $0x348] sm:$0xff]  ;;  %291 = vst [vmem:[%s1411_s8 + $0x198] sm:$0xff] %v290_v51 }
  0x33   : > { %293 = vst [vmem:[%s1411_s8 + $0x1a0] sm:$0xff] %v292_v52  ;;  %295 = vst [vmem:[%s1411_s8 + $0x1a8] sm:$0xff] %v294_v53  ;;  %v296_v54 = vld [vmem:[%s1406_s7 + $0x360] sm:$0xff]  ;;  %v298_v55 = vld [vmem:[%s1406_s7 + $0x368] sm:$0xff] }
  0x34   : > { %v300_v56 = vld [vmem:[%s1406_s7 + $0x380] sm:$0xff]  ;;  %297 = vst [vmem:[%s1411_s8 + $0x1b0] sm:$0xff] %v296_v54  ;;  %299 = vst [vmem:[%s1411_s8 + $0x1b8] sm:$0xff] %v298_v55  ;;  %v302_v57 = vld [vmem:[%s1406_s7 + $0x388] sm:$0xff] }
  0x35   : > { %301 = vst [vmem:[%s1411_s8 + $0x1c0] sm:$0xff] %v300_v56  ;;  %v304_v58 = vld [vmem:[%s1406_s7 + $0x3a0] sm:$0xff]  ;;  %v306_v59 = vld [vmem:[%s1406_s7 + $0x3a8] sm:$0xff]  ;;  %303 = vst [vmem:[%s1411_s8 + $0x1c8] sm:$0xff] %v302_v57 }
  0x36   : > { %305 = vst [vmem:[%s1411_s8 + $0x1d0] sm:$0xff] %v304_v58  ;;  %307 = vst [vmem:[%s1411_s8 + $0x1d8] sm:$0xff] %v306_v59  ;;  %v308_v60 = vld [vmem:[%s1406_s7 + $0x3c0] sm:$0xff]  ;;  %v310_v61 = vld [vmem:[%s1406_s7 + $0x3c8] sm:$0xff] }
  0x37   : > { %v312_v62 = vld [vmem:[%s1406_s7 + $0x3e0] sm:$0xff]  ;;  %309 = vst [vmem:[%s1411_s8 + $0x1e0] sm:$0xff] %v308_v60  ;;  %311 = vst [vmem:[%s1411_s8 + $0x1e8] sm:$0xff] %v310_v61  ;;  %v314_v63 = vld [vmem:[%s1406_s7 + $0x3e8] sm:$0xff] }
  0x38   : > { %313 = vst [vmem:[%s1411_s8 + $0x1f0] sm:$0xff] %v312_v62  ;;  %315 = vst [vmem:[%s1411_s8 + $0x1f8] sm:$0xff] %v314_v63 }
  0x39 PF: > { %p1118_p7 = scmp.ge.s32.totalorder %s1322_s18, 1  ;;  %p332_p8 = scmp.lt.s32.totalorder %s1322_s18, 5 }
  0x3b   : > { %p333_p9 = pnand %p1118_p7, %p332_p8 }
  0x3c   : > { %s339_s9 = sand.u32 (!%p333_p9), 1, %s1298_s12   ;;  %s1120_s10 = sshll.u32 (!%p333_p9), %s1306_s14, 5 }
  0x3d   : > { %336 = sbr.rel (%p333_p9) target bundleno = 440 (0x1b8), region = 51  ;;  %s1119_s11 = sshll.u32 (!%p333_p9), %s339_s9, 9 }
  0x3e   : > { %p379_p10 = scmp.lt.s32.totalorder (!%p333_p9), %s1120_s10, 63  ;;  %s1122_s21 = sshll.u32 (!%p333_p9), %s1310_s15, 5 }
  0x3f   : > { %p391_p11 = scmp.lt.s32.totalorder (!%p333_p9), %s1122_s21, 63  ;;  %s1553_s12 = scalar_lea.vmem (!%p333_p9), [#allocation3], %s1119_s11 }
  0x40   : > { %p1124_p12 = scmp.ne.s32.totalorder (!%p333_p9), %s1306_s14, 0 }
  0x44   : > { %s1792_s10 = smov (!%p379_p10, %s1120_s10), 63  ;;  %s1794_s21 = smov (!%p391_p11, %s1122_s21), 63 }
  0x45   : > { %s1121_s22 = sshll.u32 %s1792_s10, 3  ;;  %s1123_s27 = sshll.u32 %s1794_s21, 3  ;;  %v1324_v0 = vmov (!%p1124_p12), 0.0  }
  0x46   : > { %s1546_s26 = scalar_lea.vmem %s1776_s1, %s1121_s22  ;;  %s1551_s30 = scalar_lea.vmem %s1778_s3, %s1123_s27  ;;  %403 = vst [vmem:[#allocation2] sm:$0xff] (!%p1124_p12), %v1324_v0  ;;  %404 = vst [vmem:[#allocation2 + $0x8] sm:$0xff] (!%p1124_p12), %v1324_v0 }
  0x47   : > { %402 = sbr.rel (%p1124_p12) target bundleno = 86 (0x56), region = 59  ;;  %405 = vst [vmem:[#allocation2 + $0x10] sm:$0xff] (!%p1124_p12), %v1324_v0  ;;  %406 = vst [vmem:[#allocation2 + $0x18] sm:$0xff] (!%p1124_p12), %v1324_v0 }
  0x48   : > { %407 = vst [vmem:[#allocation2 + $0x20] sm:$0xff] (!%p1124_p12), %v1324_v0  ;;  %408 = vst [vmem:[#allocation2 + $0x28] sm:$0xff] (!%p1124_p12), %v1324_v0 }
  0x49   : > { %409 = vst [vmem:[#allocation2 + $0x30] sm:$0xff] (!%p1124_p12), %v1324_v0  ;;  %410 = vst [vmem:[#allocation2 + $0x38] sm:$0xff] (!%p1124_p12), %v1324_v0 }
  0x4a   : > { %411 = vst [vmem:[#allocation2 + $0x40] sm:$0xff] (!%p1124_p12), %v1324_v0  ;;  %412 = vst [vmem:[#allocation2 + $0x48] sm:$0xff] (!%p1124_p12), %v1324_v0 }
  0x4b   : > { %413 = vst [vmem:[#allocation2 + $0x50] sm:$0xff] (!%p1124_p12), %v1324_v0  ;;  %414 = vst [vmem:[#allocation2 + $0x58] sm:$0xff] (!%p1124_p12), %v1324_v0 }
  0x4c   : > { %415 = vst [vmem:[#allocation2 + $0x60] sm:$0xff] (!%p1124_p12), %v1324_v0  ;;  %416 = vst [vmem:[#allocation2 + $0x68] sm:$0xff] (!%p1124_p12), %v1324_v0 }
  0x4d   : > { %417 = vst [vmem:[#allocation2 + $0x70] sm:$0xff] (!%p1124_p12), %v1324_v0  ;;  %418 = vst [vmem:[#allocation2 + $0x78] sm:$0xff] (!%p1124_p12), %v1324_v0 }
  0x4e   : > { %419 = vst [vmem:[#allocation2 + $0x80] sm:$0xff] %v1324_v0  ;;  %420 = vst [vmem:[#allocation2 + $0x88] sm:$0xff] %v1324_v0 }
  0x4f   : > { %421 = vst [vmem:[#allocation2 + $0x90] sm:$0xff] %v1324_v0  ;;  %422 = vst [vmem:[#allocation2 + $0x98] sm:$0xff] %v1324_v0 }
  0x50   : > { %423 = vst [vmem:[#allocation2 + $0xa0] sm:$0xff] %v1324_v0  ;;  %424 = vst [vmem:[#allocation2 + $0xa8] sm:$0xff] %v1324_v0 }
  0x51   : > { %425 = vst [vmem:[#allocation2 + $0xb0] sm:$0xff] %v1324_v0  ;;  %426 = vst [vmem:[#allocation2 + $0xb8] sm:$0xff] %v1324_v0 }
  0x52   : > { %427 = vst [vmem:[#allocation2 + $0xc0] sm:$0xff] %v1324_v0  ;;  %428 = vst [vmem:[#allocation2 + $0xc8] sm:$0xff] %v1324_v0 }
  0x53   : > { %429 = vst [vmem:[#allocation2 + $0xd0] sm:$0xff] %v1324_v0  ;;  %430 = vst [vmem:[#allocation2 + $0xd8] sm:$0xff] %v1324_v0 }
  0x54   : > { %431 = vst [vmem:[#allocation2 + $0xe0] sm:$0xff] %v1324_v0  ;;  %432 = vst [vmem:[#allocation2 + $0xe8] sm:$0xff] %v1324_v0 }
  0x55   : > { %433 = vst [vmem:[#allocation2 + $0xf0] sm:$0xff] %v1324_v0  ;;  %434 = vst [vmem:[#allocation2 + $0xf8] sm:$0xff] %v1324_v0 }
  0x56 PF: > { %v531_v1 = vld [vmem:[%s1546_s26] sm:$0xff]  ;;  %v532_v2 = vld [vmem:[%s1546_s26 + $0x8] sm:$0xff]  ;;  %v533_v3 = vld [vmem:[%s1546_s26 + $0x10] sm:$0xff]  ;;  %v1325_v4 = vmov 0.0|0.0   ;;  %p1125_p13 = scmp.ne.s32.totalorder %s1306_s14, 1 }
  0x57   : > { %1130 = vmatprep.subr.bf16.mxu0 %v1325_v4  ;;  %1178 = vmatprep.subr.bf16.mxu1 %v1325_v4  ;;  %v1131_v5 = vpack.c.bf16 %v532_v2, %v531_v1  ;;  %v534_v6 = vld [vmem:[%s1546_s26 + $0x18] sm:$0xff]  ;;  %v535_v8 = vld [vmem:[%s1546_s26 + $0x20] sm:$0xff]  ;;  %v536_v9 = vld [vmem:[%s1546_s26 + $0x28] sm:$0xff] }
  0x58   : > { %v1134_v7 = vpack.c.bf16 %v534_v6, %v533_v3  ;;  %v1137_v10 = vpack.c.bf16 %v536_v9, %v535_v8  ;;  %v537_v11 = vld [vmem:[%s1546_s26 + $0x30] sm:$0xff]  ;;  %v538_v12 = vld [vmem:[%s1546_s26 + $0x38] sm:$0xff]  ;;  %v468_v13 = vld [vmem:[%s1553_s12 + $0x8] sm:$0xff] }
  0x59   : > { %1132 = vmatpush1.bf16.msra.mxu0 %v1131_v5  ;;  %1194 = vmatpush1.bf16.msra.mxu1 %v1131_v5  ;;  %v1140_v14 = vpack.c.bf16 %v538_v12, %v537_v11  ;;  %v500_v15 = vld [vmem:[%s1553_s12 + $0x108] sm:$0xff]  ;;  %v539_v16 = vld [vmem:[%s1546_s26 + $0x40] sm:$0xff]  ;;  %v541_v19 = vld [vmem:[%s1546_s26 + $0x50] sm:$0xff] }
  0x5a   : > { %1133 = vmatprep.subr.bf16.mxu0 %v1325_v4  ;;  %1179 = vmatprep.subr.bf16.mxu1 %v1325_v4  ;;  %v540_v17 = vld [vmem:[%s1546_s26 + $0x48] sm:$0xff]  ;;  %v542_v20 = vld [vmem:[%s1546_s26 + $0x58] sm:$0xff]  ;;  %v543_v22 = vld [vmem:[%s1546_s26 + $0x60] sm:$0xff] }
  0x5b   : > { %627 = vmatprep.mubr.f32.mxu0 %v468_v13  ;;  %707 = vmatprep.mubr.f32.mxu1 %v500_v15  ;;  %v1143_v18 = vpack.c.bf16 %v540_v17, %v539_v16  ;;  %v1146_v21 = vpack.c.bf16 %v542_v20, %v541_v19  ;;  %v544_v23 = vld [vmem:[%s1546_s26 + $0x68] sm:$0xff]  ;;  %v545_v25 = vld [vmem:[%s1546_s26 + $0x70] sm:$0xff]  ;;  %v546_v26 = vld [vmem:[%s1546_s26 + $0x78] sm:$0xff] }
  0x5c   : > { %v1149_v24 = vpack.c.bf16 %v544_v23, %v543_v22  ;;  %v1152_v27 = vpack.c.bf16 %v546_v26, %v545_v25  ;;  %v547_v28 = vld [vmem:[%s1546_s26 + $0x80] sm:$0xff]  ;;  %v548_v29 = vld [vmem:[%s1546_s26 + $0x88] sm:$0xff]  ;;  %v549_v31 = vld [vmem:[%s1546_s26 + $0x90] sm:$0xff] }
  0x5d   : > { %1135 = vmatpush1.bf16.msra.mxu0 %v1134_v7  ;;  %1195 = vmatpush1.bf16.msra.mxu1 %v1134_v7  ;;  %v1155_v30 = vpack.c.bf16 %v548_v29, %v547_v28  ;;  %v550_v32 = vld [vmem:[%s1546_s26 + $0x98] sm:$0xff]  ;;  %v551_v34 = vld [vmem:[%s1546_s26 + $0xa0] sm:$0xff]  ;;  %v552_v35 = vld [vmem:[%s1546_s26 + $0xa8] sm:$0xff] }
  0x5e   : > { %1136 = vmatprep.subr.bf16.mxu0 %v1325_v4  ;;  %1180 = vmatprep.subr.bf16.mxu1 %v1325_v4  ;;  %v1158_v33 = vpack.c.bf16 %v550_v32, %v549_v31  ;;  %v1161_v36 = vpack.c.bf16 %v552_v35, %v551_v34  ;;  %v553_v37 = vld [vmem:[%s1546_s26 + $0xb0] sm:$0xff]  ;;  %v554_v38 = vld [vmem:[%s1546_s26 + $0xb8] sm:$0xff]  ;;  %v555_v40 = vld [vmem:[%s1546_s26 + $0xc0] sm:$0xff] }
  0x5f   : > { %v1164_v39 = vpack.c.bf16 %v554_v38, %v553_v37  ;;  %v556_v41 = vld [vmem:[%s1546_s26 + $0xc8] sm:$0xff]  ;;  %v557_v43 = vld [vmem:[%s1546_s26 + $0xd0] sm:$0xff]  ;;  %v558_v44 = vld [vmem:[%s1546_s26 + $0xd8] sm:$0xff] }
  0x60   : > { %v1167_v42 = vpack.c.bf16 %v556_v41, %v555_v40  ;;  %v1170_v45 = vpack.c.bf16 %v558_v44, %v557_v43  ;;  %v559_v46 = vld [vmem:[%s1546_s26 + $0xe0] sm:$0xff]  ;;  %v560_v47 = vld [vmem:[%s1546_s26 + $0xe8] sm:$0xff]  ;;  %v561_v49 = vld [vmem:[%s1546_s26 + $0xf0] sm:$0xff] }
  0x61   : > { %1138 = vmatpush1.bf16.msra.mxu0 %v1137_v10  ;;  %1196 = vmatpush1.bf16.msra.mxu1 %v1137_v10  ;;  %v1173_v48 = vpack.c.bf16 %v560_v47, %v559_v46  ;;  %v562_v50 = vld [vmem:[%s1546_s26 + $0xf8] sm:$0xff]  ;;  %v467_v52 = vld [vmem:[%s1553_s12] sm:$0xff]  ;;  %v469_v56 = vld [vmem:[%s1553_s12 + $0x10] sm:$0xff] }
  0x62   : > { %1139 = vmatprep.subr.bf16.mxu0 %v1325_v4  ;;  %1181 = vmatprep.subr.bf16.mxu1 %v1325_v4  ;;  %v1176_v51 = vpack.c.bf16 %v562_v50, %v561_v49  ;;  %v499_v53 = vld [vmem:[%s1553_s12 + $0x100] sm:$0xff]  ;;  %v470_v54 = vld [vmem:[%s1553_s12 + $0x18] sm:$0xff]  ;;  %v501_v57 = vld [vmem:[%s1553_s12 + $0x110] sm:$0xff] }
  0x63   : > { %v502_v55 = vld [vmem:[%s1553_s12 + $0x118] sm:$0xff]  ;;  %v472_v58 = vld [vmem:[%s1553_s12 + $0x28] sm:$0xff]  ;;  %v471_v60 = vld [vmem:[%s1553_s12 + $0x20] sm:$0xff] }
  0x64   : > { %v504_v59 = vld [vmem:[%s1553_s12 + $0x128] sm:$0xff]  ;;  %v503_v61 = vld [vmem:[%s1553_s12 + $0x120] sm:$0xff]  ;;  %v474_v62 = vld [vmem:[%s1553_s12 + $0x38] sm:$0xff] }
  0x65   : > { %1141 = vmatpush1.bf16.msra.mxu0 %v1140_v14  ;;  %1197 = vmatpush1.bf16.msra.mxu1 %v1140_v14  ;;  %v506_v63 = vld [vmem:[%s1553_s12 + $0x138] sm:$0xff]  ;;  %v473_v0 = vld [vmem:[%s1553_s12 + $0x30] sm:$0xff]  ;;  %v476_v2 = vld [vmem:[%s1553_s12 + $0x48] sm:$0xff] }
  0x66   : > { %1142 = vmatprep.subr.bf16.mxu0 %v1325_v4  ;;  %1182 = vmatprep.subr.bf16.mxu1 %v1325_v4  ;;  %v505_v1 = vld [vmem:[%s1553_s12 + $0x130] sm:$0xff]  ;;  %v508_v3 = vld [vmem:[%s1553_s12 + $0x148] sm:$0xff]  ;;  %v507_v5 = vld [vmem:[%s1553_s12 + $0x140] sm:$0xff] }
  0x67   : > { %v478_v6 = vld [vmem:[%s1553_s12 + $0x58] sm:$0xff]  ;;  %v477_v8 = vld [vmem:[%s1553_s12 + $0x50] sm:$0xff]  ;;  %v480_v10 = vld [vmem:[%s1553_s12 + $0x68] sm:$0xff] }
  0x68   : > { %v510_v7 = vld [vmem:[%s1553_s12 + $0x158] sm:$0xff]  ;;  %v509_v9 = vld [vmem:[%s1553_s12 + $0x150] sm:$0xff]  ;;  %v512_v11 = vld [vmem:[%s1553_s12 + $0x168] sm:$0xff] }
  0x69   : > { %1144 = vmatpush1.bf16.msra.mxu0 %v1143_v18  ;;  %1198 = vmatpush1.bf16.msra.mxu1 %v1143_v18  ;;  %v479_v12 = vld [vmem:[%s1553_s12 + $0x60] sm:$0xff]  ;;  %v482_v14 = vld [vmem:[%s1553_s12 + $0x78] sm:$0xff]  ;;  %v481_v16 = vld [vmem:[%s1553_s12 + $0x70] sm:$0xff] }
  0x6a   : > { %1145 = vmatprep.subr.bf16.mxu0 %v1325_v4  ;;  %1183 = vmatprep.subr.bf16.mxu1 %v1325_v4  ;;  %v511_v13 = vld [vmem:[%s1553_s12 + $0x160] sm:$0xff]  ;;  %v514_v15 = vld [vmem:[%s1553_s12 + $0x178] sm:$0xff]  ;;  %v513_v17 = vld [vmem:[%s1553_s12 + $0x170] sm:$0xff] }
  0x6b   : > { %v484_v18 = vld [vmem:[%s1553_s12 + $0x88] sm:$0xff]  ;;  %v483_v20 = vld [vmem:[%s1553_s12 + $0x80] sm:$0xff]  ;;  %v486_v22 = vld [vmem:[%s1553_s12 + $0x98] sm:$0xff] }
  0x6c   : > { %v516_v19 = vld [vmem:[%s1553_s12 + $0x188] sm:$0xff]  ;;  %v518_v23 = vld [vmem:[%s1553_s12 + $0x198] sm:$0xff]  ;;  %v517_v25 = vld [vmem:[%s1553_s12 + $0x190] sm:$0xff] }
  0x6d   : > { %1147 = vmatpush1.bf16.msra.mxu0 %v1146_v21  ;;  %1199 = vmatpush1.bf16.msra.mxu1 %v1146_v21  ;;  %v515_v21 = vld [vmem:[%s1553_s12 + $0x180] sm:$0xff]  ;;  %v488_v26 = vld [vmem:[%s1553_s12 + $0xa8] sm:$0xff]  ;;  %v522_v31 = vld [vmem:[%s1553_s12 + $0x1b8] sm:$0xff] }
  0x6e   : > { %1148 = vmatprep.subr.bf16.mxu0 %v1325_v4  ;;  %1184 = vmatprep.subr.bf16.mxu1 %v1325_v4  ;;  %v487_v28 = vld [vmem:[%s1553_s12 + $0xa0] sm:$0xff]  ;;  %v489_v32 = vld [vmem:[%s1553_s12 + $0xb0] sm:$0xff]  ;;  %v492_v34 = vld [vmem:[%s1553_s12 + $0xc8] sm:$0xff] }
  0x6f   : > { %v519_v29 = vld [vmem:[%s1553_s12 + $0x1a0] sm:$0xff]  ;;  %v524_v35 = vld [vmem:[%s1553_s12 + $0x1c8] sm:$0xff]  ;;  %v494_v38 = vld [vmem:[%s1553_s12 + $0xd8] sm:$0xff] }
  0x70   : > { %v523_v37 = vld [vmem:[%s1553_s12 + $0x1c0] sm:$0xff]  ;;  %v493_v40 = vld [vmem:[%s1553_s12 + $0xd0] sm:$0xff]  ;;  %v528_v43 = vld [vmem:[%s1553_s12 + $0x1e8] sm:$0xff] }
  0x71   : > { %1150 = vmatpush1.bf16.msra.mxu0 %v1149_v24  ;;  %1200 = vmatpush1.bf16.msra.mxu1 %v1149_v24  ;;  %v485_v24 = vld [vmem:[%s1553_s12 + $0x90] sm:$0xff]  ;;  %v495_v44 = vld [vmem:[%s1553_s12 + $0xe0] sm:$0xff]  ;;  %v498_v46 = vld [vmem:[%s1553_s12 + $0xf8] sm:$0xff] }
  0x72   : > { %1151 = vmatprep.subr.bf16.mxu0 %v1325_v4  ;;  %1185 = vmatprep.subr.bf16.mxu1 %v1325_v4  ;;  %v525_v41 = vld [vmem:[%s1553_s12 + $0x1d0] sm:$0xff]  ;;  %v530_v47 = vld [vmem:[%s1553_s12 + $0x1f8] sm:$0xff]  ;;  %v435_v50 = vld [vmem:[#allocation2] sm:$0xff] }
  0x73   : > { %v529_v49 = vld [vmem:[%s1553_s12 + $0x1f0] sm:$0xff] }
  0x75   : > { %1153 = vmatpush1.bf16.msra.mxu0 %v1152_v27  ;;  %1201 = vmatpush1.bf16.msra.mxu1 %v1152_v27  ;;  %v520_v27 = vld [vmem:[%s1553_s12 + $0x1a8] sm:$0xff] }
  0x76   : > { %1154 = vmatprep.subr.bf16.mxu0 %v1325_v4  ;;  %1186 = vmatprep.subr.bf16.mxu1 %v1325_v4 }
  0x79   : > { %1156 = vmatpush1.bf16.msra.mxu0 %v1155_v30  ;;  %1202 = vmatpush1.bf16.msra.mxu1 %v1155_v30  ;;  %v490_v30 = vld [vmem:[%s1553_s12 + $0xb8] sm:$0xff] }
  0x7a   : > { %1157 = vmatprep.subr.bf16.mxu0 %v1325_v4  ;;  %1187 = vmatprep.subr.bf16.mxu1 %v1325_v4 }
  0x7d   : > { %1159 = vmatpush1.bf16.msra.mxu0 %v1158_v33  ;;  %1203 = vmatpush1.bf16.msra.mxu1 %v1158_v33  ;;  %v521_v33 = vld [vmem:[%s1553_s12 + $0x1b0] sm:$0xff] }
  0x7e   : > { %1160 = vmatprep.subr.bf16.mxu0 %v1325_v4  ;;  %1188 = vmatprep.subr.bf16.mxu1 %v1325_v4 }
  0x81   : > { %1162 = vmatpush1.bf16.msra.mxu0 %v1161_v36  ;;  %1204 = vmatpush1.bf16.msra.mxu1 %v1161_v36  ;;  %v491_v36 = vld [vmem:[%s1553_s12 + $0xc0] sm:$0xff] }
  0x82   : > { %1163 = vmatprep.subr.bf16.mxu0 %v1325_v4  ;;  %1189 = vmatprep.subr.bf16.mxu1 %v1325_v4 }
  0x85   : > { %1165 = vmatpush1.bf16.msra.mxu0 %v1164_v39  ;;  %1205 = vmatpush1.bf16.msra.mxu1 %v1164_v39  ;;  %v526_v39 = vld [vmem:[%s1553_s12 + $0x1d8] sm:$0xff] }
  0x86   : > { %1166 = vmatprep.subr.bf16.mxu0 %v1325_v4  ;;  %1190 = vmatprep.subr.bf16.mxu1 %v1325_v4 }
  0x89   : > { %1168 = vmatpush1.bf16.msra.mxu0 %v1167_v42  ;;  %1206 = vmatpush1.bf16.msra.mxu1 %v1167_v42  ;;  %v496_v42 = vld [vmem:[%s1553_s12 + $0xe8] sm:$0xff] }
  0x8a   : > { %1169 = vmatprep.subr.bf16.mxu0 %v1325_v4  ;;  %1191 = vmatprep.subr.bf16.mxu1 %v1325_v4 }
  0x8d   : > { %1171 = vmatpush1.bf16.msra.mxu0 %v1170_v45  ;;  %1207 = vmatpush1.bf16.msra.mxu1 %v1170_v45  ;;  %v527_v45 = vld [vmem:[%s1553_s12 + $0x1e0] sm:$0xff] }
  0x8e   : > { %1172 = vmatprep.subr.bf16.mxu0 %v1325_v4  ;;  %1192 = vmatprep.subr.bf16.mxu1 %v1325_v4 }
  0x91   : > { %1174 = vmatpush1.bf16.msra.mxu0 %v1173_v48  ;;  %1208 = vmatpush1.bf16.msra.mxu1 %v1173_v48  ;;  %v497_v48 = vld [vmem:[%s1553_s12 + $0xf0] sm:$0xff] }
  0x92   : > { %1175 = vmatprep.subr.bf16.mxu0 %v1325_v4  ;;  %1193 = vmatprep.subr.bf16.mxu1 %v1325_v4  ;;  %v475_v4 = vld [vmem:[%s1553_s12 + $0x40] sm:$0xff] }
  0x95   : > { %1177 = vmatpush1.bf16.msra.mxu0 %v1176_v51  ;;  %1209 = vmatpush1.bf16.msra.mxu1 %v1176_v51  ;;  %v451_v51 = vld [vmem:[#allocation2 + $0x80] sm:$0xff] }
  0x98   : > { %628 = vmatmul.mubr.f32.vlgmr.msra.gmra.mrb[0].mxu0 %v467_v52  ;;  %708 = vmatmul.mubr.f32.vlgmr.msra.gmra.mrb[0].mxu1 %v499_v53 }
  0x99   : > { %632 = vmatprep.mubr.f32.mxu0 %v470_v54  ;;  %712 = vmatprep.mubr.f32.mxu1 %v502_v55 }
  0x9c   : > { %633 = vmatmul.mubr.f32.gmra.mrb[2].mxu0 %v469_v56  ;;  %713 = vmatmul.mubr.f32.gmra.mrb[2].mxu1 %v501_v57 }
  0x9d   : > { %637 = vmatprep.mubr.f32.mxu0 %v472_v58  ;;  %717 = vmatprep.mubr.f32.mxu1 %v504_v59  ;;  %v436_v58 = vld [vmem:[#allocation2 + $0x8] sm:$0xff] }
  0x9e   : > { %v452_v59 = vld [vmem:[#allocation2 + $0x88] sm:$0xff] }
  0xa0   : > { %638 = vmatmul.mubr.f32.gmra.mrb[4].mxu0 %v471_v60  ;;  %718 = vmatmul.mubr.f32.gmra.mrb[4].mxu1 %v503_v61 }
  0xa1   : > { %642 = vmatprep.mubr.f32.mxu0 %v474_v62  ;;  %722 = vmatprep.mubr.f32.mxu1 %v506_v63 }
  0xa4   : > { %643 = vmatmul.mubr.f32.gmra.mrb[6].mxu0 %v473_v0  ;;  %723 = vmatmul.mubr.f32.gmra.mrb[6].mxu1 %v505_v1 }
  0xa5   : > { %647 = vmatprep.mubr.f32.mxu0 %v476_v2  ;;  %727 = vmatprep.mubr.f32.mxu1 %v508_v3  ;;  %v437_v2 = vld [vmem:[#allocation2 + $0x10] sm:$0xff] }
  0xa6   : > { %v453_v3 = vld [vmem:[#allocation2 + $0x90] sm:$0xff] }
  0xa8   : > { %648 = vmatmul.mubr.f32.gmra.mrb[8].mxu0 %v475_v4  ;;  %728 = vmatmul.mubr.f32.gmra.mrb[8].mxu1 %v507_v5 }
  0xa9   : > { %652 = vmatprep.mubr.f32.mxu0 %v478_v6  ;;  %732 = vmatprep.mubr.f32.mxu1 %v510_v7 }
  0xac   : > { %653 = vmatmul.mubr.f32.gmra.mrb[10].mxu0 %v477_v8  ;;  %733 = vmatmul.mubr.f32.gmra.mrb[10].mxu1 %v509_v9 }
  0xad   : > { %657 = vmatprep.mubr.f32.mxu0 %v480_v10  ;;  %737 = vmatprep.mubr.f32.mxu1 %v512_v11  ;;  %v438_v10 = vld [vmem:[#allocation2 + $0x18] sm:$0xff] }
  0xae   : > { %v454_v11 = vld [vmem:[#allocation2 + $0x98] sm:$0xff] }
  0xb0   : > { %658 = vmatmul.mubr.f32.gmra.mrb[12].mxu0 %v479_v12  ;;  %738 = vmatmul.mubr.f32.gmra.mrb[12].mxu1 %v511_v13 }
  0xb1   : > { %662 = vmatprep.mubr.f32.mxu0 %v482_v14  ;;  %742 = vmatprep.mubr.f32.mxu1 %v514_v15 }
  0xb4   : > { %663 = vmatmul.mubr.f32.gmra.mrb[14].mxu0 %v481_v16  ;;  %743 = vmatmul.mubr.f32.gmra.mrb[14].mxu1 %v513_v17 }
  0xb5   : > { %667 = vmatprep.mubr.f32.mxu0 %v484_v18  ;;  %747 = vmatprep.mubr.f32.mxu1 %v516_v19  ;;  %v439_v18 = vld [vmem:[#allocation2 + $0x20] sm:$0xff] }
  0xb6   : > { %v455_v19 = vld [vmem:[#allocation2 + $0xa0] sm:$0xff] }
  0xb8   : > { %668 = vmatmul.mubr.f32.gmra.mrb[16].mxu0 %v483_v20  ;;  %748 = vmatmul.mubr.f32.gmra.mrb[16].mxu1 %v515_v21 }
  0xb9   : > { %672 = vmatprep.mubr.f32.mxu0 %v486_v22  ;;  %752 = vmatprep.mubr.f32.mxu1 %v518_v23 }
  0xbc   : > { %673 = vmatmul.mubr.f32.gmra.mrb[18].mxu0 %v485_v24  ;;  %753 = vmatmul.mubr.f32.gmra.mrb[18].mxu1 %v517_v25 }
  0xbd   : > { %677 = vmatprep.mubr.f32.mxu0 %v488_v26  ;;  %757 = vmatprep.mubr.f32.mxu1 %v520_v27  ;;  %v440_v26 = vld [vmem:[#allocation2 + $0x28] sm:$0xff] }
  0xbe   : > { %v456_v27 = vld [vmem:[#allocation2 + $0xa8] sm:$0xff] }
  0xc0   : > { %678 = vmatmul.mubr.f32.gmra.mrb[20].mxu0 %v487_v28  ;;  %758 = vmatmul.mubr.f32.gmra.mrb[20].mxu1 %v519_v29 }
  0xc1   : > { %682 = vmatprep.mubr.f32.mxu0 %v490_v30  ;;  %762 = vmatprep.mubr.f32.mxu1 %v522_v31 }
  0xc4   : > { %683 = vmatmul.mubr.f32.gmra.mrb[22].mxu0 %v489_v32  ;;  %763 = vmatmul.mubr.f32.gmra.mrb[22].mxu1 %v521_v33 }
  0xc5   : > { %687 = vmatprep.mubr.f32.mxu0 %v492_v34  ;;  %767 = vmatprep.mubr.f32.mxu1 %v524_v35  ;;  %v441_v34 = vld [vmem:[#allocation2 + $0x30] sm:$0xff] }
  0xc6   : > { %v457_v35 = vld [vmem:[#allocation2 + $0xb0] sm:$0xff] }
  0xc8   : > { %688 = vmatmul.mubr.f32.gmra.mrb[24].mxu0 %v491_v36  ;;  %768 = vmatmul.mubr.f32.gmra.mrb[24].mxu1 %v523_v37 }
  0xc9   : > { %692 = vmatprep.mubr.f32.mxu0 %v494_v38  ;;  %772 = vmatprep.mubr.f32.mxu1 %v526_v39 }
  0xcc   : > { %693 = vmatmul.mubr.f32.gmra.mrb[26].mxu0 %v493_v40  ;;  %773 = vmatmul.mubr.f32.gmra.mrb[26].mxu1 %v525_v41 }
  0xcd   : > { %697 = vmatprep.mubr.f32.mxu0 %v496_v42  ;;  %777 = vmatprep.mubr.f32.mxu1 %v528_v43  ;;  %v442_v42 = vld [vmem:[#allocation2 + $0x38] sm:$0xff] }
  0xce   : > { %v458_v43 = vld [vmem:[#allocation2 + $0xb8] sm:$0xff] }
  0xd0   : > { %698 = vmatmul.mubr.f32.gmra.mrb[28].mxu0 %v495_v44  ;;  %778 = vmatmul.mubr.f32.gmra.mrb[28].mxu1 %v527_v45 }
  0xd1   : > { %702 = vmatprep.mubr.f32.mxu0 %v498_v46  ;;  %782 = vmatprep.mubr.f32.mxu1 %v530_v47 }
  0xd4   : > { %703 = vmatmul.mubr.f32.gmra.mrb[30].mxu0 %v497_v48  ;;  %783 = vmatmul.mubr.f32.gmra.mrb[30].mxu1 %v529_v49 }
 0x16b   : > { %v629_v52 = vpop.f32.mrb[0].mxu0  ;;  %v709_v53 = vpop.f32.mrb[0].mxu1 }
 0x16c   : > { %v788_v54 = vadd.f32 %v629_v52, %v435_v50  ;;  %v804_v55 = vadd.f32 %v709_v53, %v451_v51  ;;  %v631_v56 = vpop.f32.mrb[1].mxu0  ;;  %v711_v57 = vpop.f32.mrb[1].mxu1  ;;  %v443_v50 = vld [vmem:[#allocation2 + $0x40] sm:$0xff] }
 0x16d   : > { %v459_v51 = vld [vmem:[#allocation2 + $0xc0] sm:$0xff] }
 0x16e   : > { %820 = vst [vmem:[#allocation2] sm:$0xff] %v788_v54  ;;  %836 = vst [vmem:[#allocation2 + $0x80] sm:$0xff] %v804_v55 }
 0x16f   : > { %v634_v60 = vpop.f32.mrb[2].mxu0  ;;  %v714_v61 = vpop.f32.mrb[2].mxu1 }
 0x170   : > { %v789_v62 = vadd.f32 %v634_v60, %v436_v58  ;;  %v805_v63 = vadd.f32 %v714_v61, %v452_v59  ;;  %v636_v0 = vpop.f32.mrb[3].mxu0  ;;  %v716_v1 = vpop.f32.mrb[3].mxu1  ;;  %v444_v58 = vld [vmem:[#allocation2 + $0x48] sm:$0xff] }
 0x171   : > { %v460_v59 = vld [vmem:[#allocation2 + $0xc8] sm:$0xff] }
 0x172   : > { %821 = vst [vmem:[#allocation2 + $0x8] sm:$0xff] %v789_v62  ;;  %837 = vst [vmem:[#allocation2 + $0x88] sm:$0xff] %v805_v63 }
 0x173   : > { %v639_v4 = vpop.f32.mrb[4].mxu0  ;;  %v719_v5 = vpop.f32.mrb[4].mxu1 }
 0x174   : > { %v790_v6 = vadd.f32 %v639_v4, %v437_v2  ;;  %v806_v7 = vadd.f32 %v719_v5, %v453_v3  ;;  %v641_v8 = vpop.f32.mrb[5].mxu0  ;;  %v721_v9 = vpop.f32.mrb[5].mxu1  ;;  %v445_v2 = vld [vmem:[#allocation2 + $0x50] sm:$0xff] }
 0x175   : > { %v461_v3 = vld [vmem:[#allocation2 + $0xd0] sm:$0xff] }
 0x176   : > { %822 = vst [vmem:[#allocation2 + $0x10] sm:$0xff] %v790_v6  ;;  %838 = vst [vmem:[#allocation2 + $0x90] sm:$0xff] %v806_v7 }
 0x177   : > { %v644_v12 = vpop.f32.mrb[6].mxu0  ;;  %v724_v13 = vpop.f32.mrb[6].mxu1 }
 0x178   : > { %v791_v14 = vadd.f32 %v644_v12, %v438_v10  ;;  %v807_v15 = vadd.f32 %v724_v13, %v454_v11  ;;  %v646_v16 = vpop.f32.mrb[7].mxu0  ;;  %v726_v17 = vpop.f32.mrb[7].mxu1  ;;  %v446_v10 = vld [vmem:[#allocation2 + $0x58] sm:$0xff] }
 0x179   : > { %v462_v11 = vld [vmem:[#allocation2 + $0xd8] sm:$0xff] }
 0x17a   : > { %823 = vst [vmem:[#allocation2 + $0x18] sm:$0xff] %v791_v14  ;;  %839 = vst [vmem:[#allocation2 + $0x98] sm:$0xff] %v807_v15 }
 0x17b   : > { %v649_v20 = vpop.f32.mrb[8].mxu0  ;;  %v729_v21 = vpop.f32.mrb[8].mxu1 }
 0x17c   : > { %v792_v22 = vadd.f32 %v649_v20, %v439_v18  ;;  %v808_v23 = vadd.f32 %v729_v21, %v455_v19  ;;  %v651_v24 = vpop.f32.mrb[9].mxu0  ;;  %v731_v25 = vpop.f32.mrb[9].mxu1  ;;  %v447_v18 = vld [vmem:[#allocation2 + $0x60] sm:$0xff] }
 0x17d   : > { %v463_v19 = vld [vmem:[#allocation2 + $0xe0] sm:$0xff] }
 0x17e   : > { %824 = vst [vmem:[#allocation2 + $0x20] sm:$0xff] %v792_v22  ;;  %840 = vst [vmem:[#allocation2 + $0xa0] sm:$0xff] %v808_v23 }
 0x17f   : > { %v654_v28 = vpop.f32.mrb[10].mxu0  ;;  %v734_v29 = vpop.f32.mrb[10].mxu1 }
 0x180   : > { %v793_v30 = vadd.f32 %v654_v28, %v440_v26  ;;  %v809_v31 = vadd.f32 %v734_v29, %v456_v27  ;;  %v656_v32 = vpop.f32.mrb[11].mxu0  ;;  %v736_v33 = vpop.f32.mrb[11].mxu1  ;;  %v448_v26 = vld [vmem:[#allocation2 + $0x68] sm:$0xff] }
 0x181   : > { %v464_v27 = vld [vmem:[#allocation2 + $0xe8] sm:$0xff] }
 0x182   : > { %825 = vst [vmem:[#allocation2 + $0x28] sm:$0xff] %v793_v30  ;;  %841 = vst [vmem:[#allocation2 + $0xa8] sm:$0xff] %v809_v31 }
 0x183   : > { %v659_v36 = vpop.f32.mrb[12].mxu0  ;;  %v739_v37 = vpop.f32.mrb[12].mxu1 }
 0x184   : > { %v794_v38 = vadd.f32 %v659_v36, %v441_v34  ;;  %v810_v39 = vadd.f32 %v739_v37, %v457_v35  ;;  %v661_v40 = vpop.f32.mrb[13].mxu0  ;;  %v741_v41 = vpop.f32.mrb[13].mxu1  ;;  %v449_v34 = vld [vmem:[#allocation2 + $0x70] sm:$0xff] }
 0x185   : > { %v465_v35 = vld [vmem:[#allocation2 + $0xf0] sm:$0xff] }
 0x186   : > { %826 = vst [vmem:[#allocation2 + $0x30] sm:$0xff] %v794_v38  ;;  %842 = vst [vmem:[#allocation2 + $0xb0] sm:$0xff] %v810_v39 }
 0x187   : > { %v664_v44 = vpop.f32.mrb[14].mxu0  ;;  %v744_v45 = vpop.f32.mrb[14].mxu1 }
 0x188   : > { %v795_v46 = vadd.f32 %v664_v44, %v442_v42  ;;  %v811_v47 = vadd.f32 %v744_v45, %v458_v43  ;;  %v666_v48 = vpop.f32.mrb[15].mxu0  ;;  %v746_v49 = vpop.f32.mrb[15].mxu1  ;;  %v450_v42 = vld [vmem:[#allocation2 + $0x78] sm:$0xff] }
 0x189   : > { %v466_v43 = vld [vmem:[#allocation2 + $0xf8] sm:$0xff] }
 0x18a   : > { %827 = vst [vmem:[#allocation2 + $0x38] sm:$0xff] %v795_v46  ;;  %843 = vst [vmem:[#allocation2 + $0xb8] sm:$0xff] %v811_v47 }
 0x18b   : > { %v669_v52 = vpop.f32.mrb[16].mxu0  ;;  %v749_v53 = vpop.f32.mrb[16].mxu1 }
 0x18c   : > { %v796_v54 = vadd.f32 %v669_v52, %v443_v50  ;;  %v812_v55 = vadd.f32 %v749_v53, %v459_v51  ;;  %v671_v56 = vpop.f32.mrb[17].mxu0  ;;  %v751_v57 = vpop.f32.mrb[17].mxu1  ;;  %v856_v50 = vld [vmem:[#allocation2] sm:$0xff] (!%p1125_p13)  ;;  %v857_v52 = vld [vmem:[#allocation2 + $0x8] sm:$0xff] (!%p1125_p13) }
 0x18d   : > { %v1688_v51 = vld [vmem:[%s1777_s2] ss:$0 sm:$0xff] (!%p1125_p13)  ;;  %v859_v56 = vld [vmem:[#allocation2 + $0x18] sm:$0xff] (!%p1125_p13) }
 0x18e   : > { %828 = vst [vmem:[#allocation2 + $0x40] sm:$0xff] %v796_v54  ;;  %844 = vst [vmem:[#allocation2 + $0xc0] sm:$0xff] %v812_v55  ;;  %v895_v53 = vadd.f32 (!%p1125_p13), %v1688_v51, %v856_v50  ;;  %v896_v54 = vadd.f32 (!%p1125_p13), %v1688_v51, %v857_v52  ;;  %v858_v55 = vld [vmem:[#allocation2 + $0x10] sm:$0xff] (!%p1125_p13)  ;;  %v860_v57 = vld [vmem:[#allocation2 + $0x20] sm:$0xff] (!%p1125_p13) }
 0x18f   : > { %v674_v60 = vpop.f32.mrb[18].mxu0  ;;  %v754_v61 = vpop.f32.mrb[18].mxu1 }
 0x190   : > { %v797_v62 = vadd.f32 %v674_v60, %v444_v58  ;;  %v813_v63 = vadd.f32 %v754_v61, %v460_v59  ;;  %v676_v0 = vpop.f32.mrb[19].mxu0  ;;  %v756_v1 = vpop.f32.mrb[19].mxu1  ;;  %v897_v58 = vadd.f32 (!%p1125_p13), %v1688_v51, %v858_v55  ;;  %v898_v59 = vadd.f32 (!%p1125_p13), %v1688_v51, %v859_v56  ;;  %v861_v61 = vld [vmem:[#allocation2 + $0x28] sm:$0xff] (!%p1125_p13) }
 0x191   : > { %v899_v60 = vadd.f32 (!%p1125_p13), %v1688_v51, %v860_v57  ;;  %v927_v0 = vmax.f32 (!%p1125_p13), %v895_v53, 0.0  ;;  %v928_v1 = vmax.f32 (!%p1125_p13), %v896_v54, 0.0 }
 0x192   : > { %829 = vst [vmem:[#allocation2 + $0x48] sm:$0xff] %v797_v62  ;;  %845 = vst [vmem:[#allocation2 + $0xc8] sm:$0xff] %v813_v63  ;;  %v862_v62 = vld [vmem:[#allocation2 + $0x30] sm:$0xff] (!%p1125_p13)  ;;  %v863_v63 = vld [vmem:[#allocation2 + $0x38] sm:$0xff] (!%p1125_p13) }
 0x193   : > { %v679_v4 = vpop.f32.mrb[20].mxu0  ;;  %v759_v5 = vpop.f32.mrb[20].mxu1  ;;  %959 = vst [vmem:[%s1551_s30] sm:$0xff] (!%p1125_p13), %v927_v0  ;;  %960 = vst [vmem:[%s1551_s30 + $0x8] sm:$0xff] (!%p1125_p13), %v928_v1 }
 0x194   : > { %v798_v6 = vadd.f32 %v679_v4, %v445_v2  ;;  %v814_v7 = vadd.f32 %v759_v5, %v461_v3  ;;  %v681_v8 = vpop.f32.mrb[21].mxu0  ;;  %v761_v9 = vpop.f32.mrb[21].mxu1  ;;  %v900_v2 = vadd.f32 (!%p1125_p13), %v1688_v51, %v861_v61  ;;  %v901_v3 = vadd.f32 (!%p1125_p13), %v1688_v51, %v862_v62 }
 0x195   : > { %v864_v4 = vld [vmem:[#allocation2 + $0x40] sm:$0xff] (!%p1125_p13)  ;;  %v930_v8 = vmax.f32 (!%p1125_p13), %v898_v59, 0.0  ;;  %v931_v9 = vmax.f32 (!%p1125_p13), %v899_v60, 0.0 }
 0x196   : > { %830 = vst [vmem:[#allocation2 + $0x50] sm:$0xff] %v798_v6  ;;  %846 = vst [vmem:[#allocation2 + $0xd0] sm:$0xff] %v814_v7  ;;  %v929_v7 = vmax.f32 (!%p1125_p13), %v897_v58, 0.0 }
 0x197   : > { %v684_v12 = vpop.f32.mrb[22].mxu0  ;;  %v764_v13 = vpop.f32.mrb[22].mxu1  ;;  %962 = vst [vmem:[%s1551_s30 + $0x18] sm:$0xff] (!%p1125_p13), %v930_v8  ;;  %963 = vst [vmem:[%s1551_s30 + $0x20] sm:$0xff] (!%p1125_p13), %v931_v9 }
 0x198   : > { %v799_v14 = vadd.f32 %v684_v12, %v446_v10  ;;  %v815_v15 = vadd.f32 %v764_v13, %v462_v11  ;;  %v686_v16 = vpop.f32.mrb[23].mxu0  ;;  %v766_v17 = vpop.f32.mrb[23].mxu1  ;;  %v902_v10 = vadd.f32 (!%p1125_p13), %v1688_v51, %v863_v63  ;;  %961 = vst [vmem:[%s1551_s30 + $0x10] sm:$0xff] (!%p1125_p13), %v929_v7 }
 0x199   : > { %v865_v5 = vld [vmem:[#allocation2 + $0x48] sm:$0xff] (!%p1125_p13)  ;;  %v903_v16 = vadd.f32 (!%p1125_p13), %v1688_v51, %v864_v4 }
 0x19a   : > { %831 = vst [vmem:[#allocation2 + $0x58] sm:$0xff] %v799_v14  ;;  %847 = vst [vmem:[#allocation2 + $0xd8] sm:$0xff] %v815_v15  ;;  %v932_v14 = vmax.f32 (!%p1125_p13), %v900_v2, 0.0  ;;  %v933_v15 = vmax.f32 (!%p1125_p13), %v901_v3, 0.0  ;;  %v904_v17 = vadd.f32 (!%p1125_p13), %v1688_v51, %v865_v5 }
 0x19b   : > { %v689_v20 = vpop.f32.mrb[24].mxu0  ;;  %v769_v21 = vpop.f32.mrb[24].mxu1 }
 0x19c   : > { %v800_v22 = vadd.f32 %v689_v20, %v447_v18  ;;  %v816_v23 = vadd.f32 %v769_v21, %v463_v19  ;;  %v691_v24 = vpop.f32.mrb[25].mxu0  ;;  %v771_v25 = vpop.f32.mrb[25].mxu1  ;;  %v934_v20 = vmax.f32 (!%p1125_p13), %v902_v10, 0.0  ;;  %964 = vst [vmem:[%s1551_s30 + $0x28] sm:$0xff] (!%p1125_p13), %v932_v14  ;;  %965 = vst [vmem:[%s1551_s30 + $0x30] sm:$0xff] (!%p1125_p13), %v933_v15 }
 0x19d   : > { %v866_v6 = vld [vmem:[#allocation2 + $0x50] sm:$0xff] (!%p1125_p13)  ;;  %v872_v24 = vld [vmem:[#allocation2 + $0x80] sm:$0xff] (!%p1125_p13)  ;;  %v873_v25 = vld [vmem:[#allocation2 + $0x88] sm:$0xff] (!%p1125_p13) }
 0x19e   : > { %832 = vst [vmem:[#allocation2 + $0x60] sm:$0xff] %v800_v22  ;;  %848 = vst [vmem:[#allocation2 + $0xe0] sm:$0xff] %v816_v23  ;;  %v905_v21 = vadd.f32 (!%p1125_p13), %v1688_v51, %v866_v6  ;;  %v882_v55 = vld [vmem:[#allocation2 + $0xd0] sm:$0xff] (!%p1125_p13) }
 0x19f   : > { %v694_v28 = vpop.f32.mrb[26].mxu0  ;;  %v774_v29 = vpop.f32.mrb[26].mxu1  ;;  %966 = vst [vmem:[%s1551_s30 + $0x38] sm:$0xff] (!%p1125_p13), %v934_v20  ;;  %v921_v6 = vadd.f32 (!%p1125_p13), %v1688_v51, %v882_v55 }
 0x1a0   : > { %v801_v30 = vadd.f32 %v694_v28, %v448_v26  ;;  %v817_v31 = vadd.f32 %v774_v29, %v464_v27  ;;  %v696_v32 = vpop.f32.mrb[27].mxu0  ;;  %v776_v33 = vpop.f32.mrb[27].mxu1  ;;  %v935_v26 = vmax.f32 (!%p1125_p13), %v903_v16, 0.0  ;;  %v936_v27 = vmax.f32 (!%p1125_p13), %v904_v17, 0.0 }
 0x1a1   : > { %v867_v11 = vld [vmem:[#allocation2 + $0x58] sm:$0xff] (!%p1125_p13)  ;;  %v876_v32 = vld [vmem:[#allocation2 + $0xa0] sm:$0xff] (!%p1125_p13)  ;;  %v937_v33 = vmax.f32 (!%p1125_p13), %v905_v21, 0.0 }
 0x1a2   : > { %833 = vst [vmem:[#allocation2 + $0x68] sm:$0xff] %v801_v30  ;;  %849 = vst [vmem:[#allocation2 + $0xe8] sm:$0xff] %v817_v31  ;;  %v906_v22 = vadd.f32 (!%p1125_p13), %v1688_v51, %v867_v11  ;;  %v874_v30 = vld [vmem:[#allocation2 + $0x90] sm:$0xff] (!%p1125_p13)  ;;  %v875_v31 = vld [vmem:[#allocation2 + $0x98] sm:$0xff] (!%p1125_p13) }
 0x1a3   : > { %v699_v36 = vpop.f32.mrb[28].mxu0  ;;  %v779_v37 = vpop.f32.mrb[28].mxu1  ;;  %967 = vst [vmem:[%s1551_s30 + $0x40] sm:$0xff] (!%p1125_p13), %v935_v26  ;;  %968 = vst [vmem:[%s1551_s30 + $0x48] sm:$0xff] (!%p1125_p13), %v936_v27  ;;  %v883_v56 = vld [vmem:[#allocation2 + $0xd8] sm:$0xff] (!%p1125_p13) }
 0x1a4   : > { %v802_v38 = vadd.f32 %v699_v36, %v449_v34  ;;  %v818_v39 = vadd.f32 %v779_v37, %v465_v35  ;;  %v701_v40 = vpop.f32.mrb[29].mxu0  ;;  %v781_v41 = vpop.f32.mrb[29].mxu1  ;;  %855 = sbr.rel (%p1125_p13) target bundleno = 440 (0x1b8), region = 63  ;;  %v938_v34 = vmax.f32 (!%p1125_p13), %v906_v22, 0.0  ;;  %v877_v37 = vld [vmem:[#allocation2 + $0xa8] sm:$0xff] (!%p1125_p13)  ;;  %969 = vst [vmem:[%s1551_s30 + $0x50] sm:$0xff] (!%p1125_p13), %v937_v33  ;;  %v922_v7 = vadd.f32 (!%p1125_p13), %v1688_v51, %v883_v56 }
 0x1a5   : > { %v868_v12 = vld [vmem:[#allocation2 + $0x60] sm:$0xff] (!%p1125_p13)  ;;  %v911_v41 = vadd.f32 (!%p1125_p13), %v1688_v51, %v872_v24  ;;  %v916_v53 = vadd.f32 (!%p1125_p13), %v1688_v51, %v877_v37 }
 0x1a6   : > { %834 = vst [vmem:[#allocation2 + $0x70] sm:$0xff] %v802_v38  ;;  %850 = vst [vmem:[#allocation2 + $0xf0] sm:$0xff] %v818_v39  ;;  %v907_v23 = vadd.f32 (!%p1125_p13), %v1688_v51, %v868_v12  ;;  %v878_v38 = vld [vmem:[#allocation2 + $0xb0] sm:$0xff] (!%p1125_p13)  ;;  %v884_v57 = vld [vmem:[#allocation2 + $0xe0] sm:$0xff] (!%p1125_p13)  ;;  %v954_v14 = vmax.f32 (!%p1125_p13), %v922_v7, 0.0 }
 0x1a7   : > { %v704_v44 = vpop.f32.mrb[30].mxu0  ;;  %v784_v45 = vpop.f32.mrb[30].mxu1  ;;  %970 = vst [vmem:[%s1551_s30 + $0x58] sm:$0xff] (!%p1125_p13), %v938_v34  ;;  %v943_v50 = vmax.f32 (!%p1125_p13), %v911_v41, 0.0  ;;  %v917_v54 = vadd.f32 (!%p1125_p13), %v1688_v51, %v878_v38  ;;  %v948_v0 = vmax.f32 (!%p1125_p13), %v916_v53, 0.0  ;;  %v923_v8 = vadd.f32 (!%p1125_p13), %v1688_v51, %v884_v57 }
 0x1a8   : > { %v803_v46 = vadd.f32 %v704_v44, %v450_v42  ;;  %v819_v47 = vadd.f32 %v784_v45, %v466_v43  ;;  %v706_v48 = vpop.f32.mrb[31].mxu0  ;;  %v786_v49 = vpop.f32.mrb[31].mxu1  ;;  %v939_v35 = vmax.f32 (!%p1125_p13), %v907_v23, 0.0  ;;  %v912_v42 = vadd.f32 (!%p1125_p13), %v1688_v51, %v873_v25  ;;  %v879_v43 = vld [vmem:[#allocation2 + $0xb8] sm:$0xff] (!%p1125_p13)  ;;  %986 = vst [vmem:[%s1551_s30 + $0xd8] sm:$0xff] (!%p1125_p13), %v954_v14 }
 0x1a9   : > { %v869_v13 = vld [vmem:[#allocation2 + $0x68] sm:$0xff] (!%p1125_p13)  ;;  %v913_v45 = vadd.f32 (!%p1125_p13), %v1688_v51, %v874_v30  ;;  %v880_v48 = vld [vmem:[#allocation2 + $0xc0] sm:$0xff] (!%p1125_p13)  ;;  %v918_v61 = vadd.f32 (!%p1125_p13), %v1688_v51, %v879_v43  ;;  %975 = vst [vmem:[%s1551_s30 + $0x80] sm:$0xff] (!%p1125_p13), %v943_v50  ;;  %v949_v1 = vmax.f32 (!%p1125_p13), %v917_v54, 0.0  ;;  %980 = vst [vmem:[%s1551_s30 + $0xa8] sm:$0xff] (!%p1125_p13), %v948_v0  ;;  %v955_v15 = vmax.f32 (!%p1125_p13), %v923_v8, 0.0 }
 0x1aa   : > { %835 = vst [vmem:[#allocation2 + $0x78] sm:$0xff] %v803_v46  ;;  %851 = vst [vmem:[#allocation2 + $0xf8] sm:$0xff] %v819_v47  ;;  %v908_v28 = vadd.f32 (!%p1125_p13), %v1688_v51, %v869_v13  ;;  %v914_v46 = vadd.f32 (!%p1125_p13), %v1688_v51, %v875_v31  ;;  %v915_v47 = vadd.f32 (!%p1125_p13), %v1688_v51, %v876_v32  ;;  %v881_v49 = vld [vmem:[#allocation2 + $0xc8] sm:$0xff] (!%p1125_p13)  ;;  %v944_v52 = vmax.f32 (!%p1125_p13), %v912_v42, 0.0 }
 0x1ab   : > { %971 = vst [vmem:[%s1551_s30 + $0x60] sm:$0xff] %v939_v35  ;;  %v945_v58 = vmax.f32 %v913_v45, 0.0  ;;  %v885_v62 = vld [vmem:[#allocation2 + $0xe8] sm:$0xff]  ;;  %v919_v2 = vadd.f32 %v1688_v51, %v880_v48  ;;  %v920_v3 = vadd.f32 %v1688_v51, %v881_v49  ;;  %v950_v5 = vmax.f32 %v918_v61, 0.0  ;;  %981 = vst [vmem:[%s1551_s30 + $0xb0] sm:$0xff] %v949_v1 }
 0x1ac   : > { %v940_v39 = vmax.f32 %v908_v28, 0.0  ;;  %v946_v59 = vmax.f32 %v914_v46, 0.0  ;;  %v947_v60 = vmax.f32 %v915_v47, 0.0  ;;  %976 = vst [vmem:[%s1551_s30 + $0x88] sm:$0xff] %v944_v52  ;;  %v924_v11 = vadd.f32 %v1688_v51, %v885_v62  ;;  %987 = vst [vmem:[%s1551_s30 + $0xe0] sm:$0xff] %v955_v15 }
 0x1ad   : > { %v870_v18 = vld [vmem:[#allocation2 + $0x70] sm:$0xff]  ;;  %977 = vst [vmem:[%s1551_s30 + $0x90] sm:$0xff] %v945_v58  ;;  %v951_v9 = vmax.f32 %v919_v2, 0.0  ;;  %v952_v10 = vmax.f32 %v920_v3, 0.0  ;;  %982 = vst [vmem:[%s1551_s30 + $0xb8] sm:$0xff] %v950_v5  ;;  %v953_v13 = vmax.f32 %v921_v6, 0.0 }
 0x1ae   : > { %v909_v29 = vadd.f32 %v1688_v51, %v870_v18  ;;  %972 = vst [vmem:[%s1551_s30 + $0x68] sm:$0xff] %v940_v39  ;;  %v886_v63 = vld [vmem:[#allocation2 + $0xf0] sm:$0xff]  ;;  %978 = vst [vmem:[%s1551_s30 + $0x98] sm:$0xff] %v946_v59  ;;  %v956_v17 = vmax.f32 %v924_v11, 0.0 }
 0x1af   : > { %979 = vst [vmem:[%s1551_s30 + $0xa0] sm:$0xff] %v947_v60  ;;  %v925_v12 = vadd.f32 %v1688_v51, %v886_v63  ;;  %983 = vst [vmem:[%s1551_s30 + $0xc0] sm:$0xff] %v951_v9 }
 0x1b0   : > { %v941_v40 = vmax.f32 %v909_v29, 0.0  ;;  %984 = vst [vmem:[%s1551_s30 + $0xc8] sm:$0xff] %v952_v10  ;;  %985 = vst [vmem:[%s1551_s30 + $0xd0] sm:$0xff] %v953_v13 }
 0x1b1   : > { %v871_v19 = vld [vmem:[#allocation2 + $0x78] sm:$0xff]  ;;  %v957_v18 = vmax.f32 %v925_v12, 0.0  ;;  %988 = vst [vmem:[%s1551_s30 + $0xe8] sm:$0xff] %v956_v17 }
 0x1b2   : > { %v910_v36 = vadd.f32 %v1688_v51, %v871_v19  ;;  %973 = vst [vmem:[%s1551_s30 + $0x70] sm:$0xff] %v941_v40  ;;  %v887_v4 = vld [vmem:[#allocation2 + $0xf8] sm:$0xff] }
 0x1b3   : > { %v926_v16 = vadd.f32 %v1688_v51, %v887_v4  ;;  %989 = vst [vmem:[%s1551_s30 + $0xf0] sm:$0xff] %v957_v18 }
 0x1b4   : > { %v942_v44 = vmax.f32 %v910_v36, 0.0 }
 0x1b5   : > { %v958_v19 = vmax.f32 %v926_v16, 0.0 }
 0x1b6   : > { %974 = vst [vmem:[%s1551_s30 + $0x78] sm:$0xff] %v942_v44 }
 0x1b7   : > { %990 = vst [vmem:[%s1551_s30 + $0xf8] sm:$0xff] %v958_v19 }
 0x1b8 PF: > { %s13_s18 = sadd.s32 1, %s1322_s18   ;;  %s1779_s12 = smov %s1302_s13 }
 0x1b9   : > { %p10_p0 = scmp.ge.s32.totalorder %s13_s18, 6   ;;  %s1780_s13 = smov %s1397_s25 }
 0x1ba   : > { %s1781_s14 = smov %s1314_s16  ;;  %s1782_s15 = smov %s1318_s17 }
 0x1bb   : > { %s1783_s16 = smov %s1786_s19  ;;  %s1784_s17 = smov %s1790_s20 }
 0x1bc   :  { %12 = sbr.rel (!%p10_p0) target bundleno = 4 (0x4), region = 104 }

// kernel: alexnet_forward.8
= control target key start
LH: loop header
LB: loop body
LE: loop exit
PB: predicated region body
PF: predicated region fallthrough
CT: control target
= control target key end

     0   :  { %vm155_vm0 = vcmask 523264   ;;  %s481_s0 = inlined_call_operand.vmem [shape: f32[9,16,448], index: 0, kind: input, shape index: {}]   ;;  %s482_s1 = inlined_call_operand.vmem [shape: f32[16,448], index: 1, kind: output, shape index: {}]  }
   0x1   :  { %v8_v0 = vld [vmem:[%s481_s0] sm:$0xff]  ;;  %v9_v6 = vld [vmem:[%s481_s0 + $0x8] sm:$0xff]  ;;  %v10_v15 = vld [vmem:[%s481_s0 + $0x10] sm:$0xff] }
   0x2   :  { %v165_v1 = vld [vmem:[%s481_s0 + $0x40] sm:$0xff]  ;;  %v166_v7 = vld [vmem:[%s481_s0 + $0x48] sm:$0xff]  ;;  %v167_v16 = vld [vmem:[%s481_s0 + $0x50] sm:$0xff] }
   0x3   :  { %v173_v2 = vld [vmem:[%s481_s0 + $0x80] sm:$0xff]  ;;  %v25_v3 = vmax.f32 %v8_v0, %v165_v1  ;;  %v174_v8 = vld [vmem:[%s481_s0 + $0x88] sm:$0xff]  ;;  %v26_v10 = vmax.f32 %v9_v6, %v166_v7  ;;  %v175_v17 = vld [vmem:[%s481_s0 + $0x90] sm:$0xff]  ;;  %v27_v20 = vmax.f32 %v10_v15, %v167_v16 }
   0x4   :  { %v181_v4 = vld [vmem:[%s481_s0 + $0xc0] sm:$0xff]  ;;  %v182_v13 = vld [vmem:[%s481_s0 + $0xc8] sm:$0xff]  ;;  %v183_v24 = vld [vmem:[%s481_s0 + $0xd0] sm:$0xff] }
   0x5   :  { %v42_v5 = vmax.f32 %v25_v3, %v173_v2  ;;  %v189_v9 = vld [vmem:[%s481_s0 + $0x100] sm:$0xff]  ;;  %v43_v14 = vmax.f32 %v26_v10, %v174_v8  ;;  %v190_v19 = vld [vmem:[%s481_s0 + $0x108] sm:$0xff]  ;;  %v44_v26 = vmax.f32 %v27_v20, %v175_v17  ;;  %v11_v27 = vld [vmem:[%s481_s0 + $0x18] sm:$0xff] }
   0x6   :  { %v197_v12 = vld [vmem:[%s481_s0 + $0x140] sm:$0xff]  ;;  %v198_v23 = vld [vmem:[%s481_s0 + $0x148] sm:$0xff]  ;;  %v168_v28 = vld [vmem:[%s481_s0 + $0x58] sm:$0xff] }
   0x7   :  { %v59_v11 = vmax.f32 %v42_v5, %v181_v4  ;;  %v205_v21 = vld [vmem:[%s481_s0 + $0x180] sm:$0xff]  ;;  %v60_v22 = vmax.f32 %v43_v14, %v182_v13  ;;  %v176_v29 = vld [vmem:[%s481_s0 + $0x98] sm:$0xff]  ;;  %v191_v33 = vld [vmem:[%s481_s0 + $0x110] sm:$0xff]  ;;  %v28_v34 = vmax.f32 %v11_v27, %v168_v28  ;;  %v61_v37 = vmax.f32 %v44_v26, %v183_v24 }
   0x8   :  { %v213_v30 = vld [vmem:[%s481_s0 + $0x1c0] sm:$0xff]  ;;  %v206_v36 = vld [vmem:[%s481_s0 + $0x188] sm:$0xff]  ;;  %v199_v38 = vld [vmem:[%s481_s0 + $0x150] sm:$0xff] }
   0x9   :  { %v76_v18 = vmax.f32 %v59_v11, %v189_v9  ;;  %v221_v31 = vld [vmem:[%s481_s0 + $0x200] sm:$0xff]  ;;  %v77_v32 = vmax.f32 %v60_v22, %v190_v19  ;;  %v184_v39 = vld [vmem:[%s481_s0 + $0xd8] sm:$0xff]  ;;  %v45_v41 = vmax.f32 %v28_v34, %v176_v29  ;;  %v214_v46 = vld [vmem:[%s481_s0 + $0x1c8] sm:$0xff]  ;;  %v78_v48 = vmax.f32 %v61_v37, %v191_v33 }
   0xa   :  { %v12_v42 = vld [vmem:[%s481_s0 + $0x20] sm:$0xff]  ;;  %v222_v47 = vld [vmem:[%s481_s0 + $0x208] sm:$0xff]  ;;  %v192_v49 = vld [vmem:[%s481_s0 + $0x118] sm:$0xff] }
   0xb   :  { %v93_v25 = vmax.f32 %v76_v18, %v197_v12  ;;  %v94_v40 = vmax.f32 %v77_v32, %v198_v23  ;;  %v169_v43 = vld [vmem:[%s481_s0 + $0x60] sm:$0xff]  ;;  %v207_v52 = vld [vmem:[%s481_s0 + $0x190] sm:$0xff]  ;;  %v62_v53 = vmax.f32 %v45_v41, %v184_v39  ;;  %v200_v54 = vld [vmem:[%s481_s0 + $0x158] sm:$0xff]  ;;  %v95_v57 = vmax.f32 %v78_v48, %v199_v38 }
   0xc   :  { %v177_v44 = vld [vmem:[%s481_s0 + $0xa0] sm:$0xff]  ;;  %v29_v50 = vmax.f32 %v12_v42, %v169_v43  ;;  %v13_v59 = vld [vmem:[%s481_s0 + $0x28] sm:$0xff]  ;;  %v215_v63 = vld [vmem:[%s481_s0 + $0x1d0] sm:$0xff] }
   0xd   :  { %v110_v35 = vmax.f32 %v93_v25, %v205_v21  ;;  %v111_v51 = vmax.f32 %v94_v40, %v206_v36  ;;  %v185_v55 = vld [vmem:[%s481_s0 + $0xe0] sm:$0xff]  ;;  %v170_v60 = vld [vmem:[%s481_s0 + $0x68] sm:$0xff]  ;;  %v223_v0 = vld [vmem:[%s481_s0 + $0x210] sm:$0xff]  ;;  %v79_v1 = vmax.f32 %v62_v53, %v192_v49  ;;  %v112_v4 = vmax.f32 %v95_v57, %v207_v52 }
   0xe   :  { %v46_v58 = vmax.f32 %v29_v50, %v177_v44  ;;  %v178_v61 = vld [vmem:[%s481_s0 + $0xa8] sm:$0xff]  ;;  %v193_v2 = vld [vmem:[%s481_s0 + $0x120] sm:$0xff]  ;;  %v30_v3 = vmax.f32 %v13_v59, %v170_v60  ;;  %v208_v5 = vld [vmem:[%s481_s0 + $0x198] sm:$0xff] }
   0xf   :  { %v127_v45 = vmax.f32 %v110_v35, %v213_v30  ;;  %v128_v62 = vmax.f32 %v111_v51, %v214_v46  ;;  %v201_v7 = vld [vmem:[%s481_s0 + $0x160] sm:$0xff]  ;;  %v186_v8 = vld [vmem:[%s481_s0 + $0xe8] sm:$0xff]  ;;  %v96_v10 = vmax.f32 %v79_v1, %v200_v54  ;;  %v14_v12 = vld [vmem:[%s481_s0 + $0x30] sm:$0xff]  ;;  %v129_v15 = vmax.f32 %v112_v4, %v215_v63 }
  0x10   :  { %v63_v6 = vmax.f32 %v46_v58, %v185_v55  ;;  %v47_v11 = vmax.f32 %v30_v3, %v178_v61  ;;  %v171_v13 = vld [vmem:[%s481_s0 + $0x70] sm:$0xff]  ;;  %v216_v16 = vld [vmem:[%s481_s0 + $0x1d8] sm:$0xff]  ;;  %v194_v19 = vld [vmem:[%s481_s0 + $0x128] sm:$0xff] }
  0x11   :  { %v144_v56 = vmax.f32 %v127_v45, %v221_v31  ;;  %v145_v9 = vmax.f32 %v128_v62, %v222_v47  ;;  %v179_v14 = vld [vmem:[%s481_s0 + $0xb0] sm:$0xff]  ;;  %v224_v17 = vld [vmem:[%s481_s0 + $0x218] sm:$0xff]  ;;  %v31_v20 = vmax.f32 %v14_v12, %v171_v13  ;;  %v113_v21 = vmax.f32 %v96_v10, %v208_v5  ;;  %v209_v22 = vld [vmem:[%s481_s0 + $0x1a0] sm:$0xff] }
  0x12   :  { %v80_v18 = vmax.f32 %v63_v6, %v193_v2  ;;  %v64_v23 = vmax.f32 %v47_v11, %v186_v8  ;;  %v202_v24 = vld [vmem:[%s481_s0 + $0x168] sm:$0xff]  ;;  %v187_v25 = vld [vmem:[%s481_s0 + $0xf0] sm:$0xff]  ;;  %v146_v26 = vmax.f32 %v129_v15, %v223_v0  ;;  %v15_v29 = vld [vmem:[%s481_s0 + $0x38] sm:$0xff] }
  0x13   :  { %152 = vst [vmem:[%s482_s1] sm:$0xff] %v144_v56  ;;  %153 = vst [vmem:[%s482_s1 + $0x8] sm:$0xff] %v145_v9  ;;  %v48_v28 = vmax.f32 %v31_v20, %v179_v14  ;;  %v172_v30 = vld [vmem:[%s481_s0 + $0x78] sm:$0xff]  ;;  %v130_v32 = vmax.f32 %v113_v21, %v216_v16  ;;  %v217_v33 = vld [vmem:[%s481_s0 + $0x1e0] sm:$0xff] }
  0x14   :  { %v97_v27 = vmax.f32 %v80_v18, %v201_v7  ;;  %v180_v31 = vld [vmem:[%s481_s0 + $0xb8] sm:$0xff]  ;;  %v81_v34 = vmax.f32 %v64_v23, %v194_v19  ;;  %v195_v35 = vld [vmem:[%s481_s0 + $0x130] sm:$0xff]  ;;  %v32_v36 = vmax.f32 %v15_v29, %v172_v30  ;;  %154 = vst [vmem:[%s482_s1 + $0x10] sm:$0xff] %v146_v26  ;;  %v210_v38 = vld [vmem:[%s481_s0 + $0x1a8] sm:$0xff] }
  0x15   :  { %v65_v39 = vmax.f32 %v48_v28, %v187_v25  ;;  %v188_v40 = vld [vmem:[%s481_s0 + $0xf8] sm:$0xff]  ;;  %v147_v41 = vmax.f32 %v130_v32, %v224_v17  ;;  %v225_v42 = vld [vmem:[%s481_s0 + $0x220] sm:$0xff]  ;;  %v203_v44 = vld [vmem:[%s481_s0 + $0x170] sm:$0xff] }
  0x16   :  { %v114_v37 = vmax.f32 %v97_v27, %v209_v22  ;;  %v98_v43 = vmax.f32 %v81_v34, %v202_v24  ;;  %v49_v45 = vmax.f32 %v32_v36, %v180_v31  ;;  %v218_v47 = vld [vmem:[%s481_s0 + $0x1e8] sm:$0xff]  ;;  %v196_v49 = vld [vmem:[%s481_s0 + $0x138] sm:$0xff]  ;;  %v211_v51 = vld [vmem:[%s481_s0 + $0x1b0] sm:$0xff] }
  0x17   :  { %v82_v48 = vmax.f32 %v65_v39, %v195_v35  ;;  %156 = vst.msk [vmem:[%s482_s1 + $0x18] sm:$0xff] %vm155_vm0, %v147_v41  ;;  %v226_v54 = vld [vmem:[%s481_s0 + $0x228] sm:$0xff]  ;;  %v204_v56 = vld [vmem:[%s481_s0 + $0x178] sm:$0xff]  ;;  %v219_v58 = vld [vmem:[%s481_s0 + $0x1f0] sm:$0xff] }
  0x18   :  { %v131_v46 = vmax.f32 %v114_v37, %v217_v33  ;;  %v115_v50 = vmax.f32 %v98_v43, %v210_v38  ;;  %v66_v52 = vmax.f32 %v49_v45, %v188_v40  ;;  %v212_v61 = vld [vmem:[%s481_s0 + $0x1b8] sm:$0xff]  ;;  %v227_v63 = vld [vmem:[%s481_s0 + $0x230] sm:$0xff] }
  0x19   :  { %v99_v55 = vmax.f32 %v82_v48, %v203_v44  ;;  %v220_v2 = vld [vmem:[%s481_s0 + $0x1f8] sm:$0xff] }
  0x1a   :  { %v148_v53 = vmax.f32 %v131_v46, %v225_v42  ;;  %v132_v57 = vmax.f32 %v115_v50, %v218_v47  ;;  %v83_v59 = vmax.f32 %v66_v52, %v196_v49  ;;  %v228_v5 = vld [vmem:[%s481_s0 + $0x238] sm:$0xff] }
  0x1b   :  { %v116_v60 = vmax.f32 %v99_v55, %v211_v51 }
  0x1c   :  { %157 = vst [vmem:[%s482_s1 + $0x20] sm:$0xff] %v148_v53  ;;  %v149_v62 = vmax.f32 %v132_v57, %v226_v54  ;;  %v100_v0 = vmax.f32 %v83_v59, %v204_v56 }
  0x1d   :  { %v133_v1 = vmax.f32 %v116_v60, %v219_v58 }
  0x1e   :  { %158 = vst [vmem:[%s482_s1 + $0x28] sm:$0xff] %v149_v62  ;;  %v117_v3 = vmax.f32 %v100_v0, %v212_v61 }
  0x1f   :  { %v150_v4 = vmax.f32 %v133_v1, %v227_v63 }
  0x20   :  { %v134_v6 = vmax.f32 %v117_v3, %v220_v2 }
  0x21   :  { %159 = vst [vmem:[%s482_s1 + $0x30] sm:$0xff] %v150_v4 }
  0x22   :  { %v151_v7 = vmax.f32 %v134_v6, %v228_v5 }
  0x24   :  { %160 = vst.msk [vmem:[%s482_s1 + $0x38] sm:$0xff] %vm155_vm0, %v151_v7 }

// kernel: alexnet_forward.9
= control target key start
LH: loop header
LB: loop body
LE: loop exit
PB: predicated region body
PF: predicated region fallthrough
CT: control target
= control target key end

     0   :  { %s1693_s0 = inlined_call_operand.vmem [shape: f32[104,1792], index: 0, kind: input, shape index: {}]   ;;  %s1694_s1 = inlined_call_operand.vmem [shape: f32[1792,256], index: 1, kind: input, shape index: {}]   ;;  %s1695_s2 = inlined_call_operand.vmem [shape: f32[1,256], index: 2, kind: input, shape index: {}]   ;;  %s1696_s3 = inlined_call_operand.vmem [shape: f32[104,256], index: 3, kind: output, shape index: {}]  }
   0x1   :  { %1698 = sst [smem:[#allocation7_spill]] %s1693_s0 }
   0x2   :  { %1699 = sst [smem:[#allocation8_spill]] %s1694_s1 }
   0x3   :  { %s1306_s12 = smov 0   ;;  %s1308_s13 = smov 0  }
   0x4   :  { %s1310_s14 = smov 0   ;;  %s1312_s15 = smov 0  }
   0x5   :  { %s1314_s16 = smov 0   ;;  %s1316_s17 = smov 0  }
   0x6   :  { %s1318_s18 = smov 0   ;;  %s1320_s19 = smov 0  }
   0x7   :  { %s1322_s20 = smov 0   ;;  %s1324_s21 = smov 0  }
   0x8   :  { %s1326_s22 = smov 0  }
   0x9 LB: > { %s966_s23 = sadd.s32 4294967295, %s1283_s22   ;;  %s25_s24 = sadd.s32 1, %s1275_s20  ;;  %s1283_s22 = sphi %s1326_s22, %s13_s22   ;;  %s1279_s21 = sphi %s1324_s21, %s1716_s21   ;;  %s1275_s20 = sphi %s1322_s20, %s1715_s20   ;;  %s1271_s19 = sphi %s1320_s19, %s1714_s19   ;;  %s1267_s18 = sphi %s1318_s18, %s1713_s18   ;;  %s1263_s17 = sphi %s1316_s17, %s1712_s17   ;;  %s1259_s16 = sphi %s1314_s16, %s1711_s16   ;;  %s1255_s15 = sphi %s1312_s15, %s1710_s15   ;;  %s1251_s14 = sphi %s1310_s14, %s1709_s14   ;;  %s1247_s13 = sphi %s1308_s13, %s1708_s13   ;;  %s1243_s12 = sphi %s1306_s12, %s1707_s12  }
   0xa   : > { %p26_p0 = scmp.ge.s32.totalorder %s25_s24, 7  ;;  %s28_s25 = sadd.s32 1, %s1279_s21 }
   0xb   : > { %s41_s26 = sadd.s32 1, %s1263_s17  ;;  %p48_p1 = scmp.ne.s32.totalorder %s1263_s17, %s1259_s16 }
   0xc   : > { %s1718_s24 = smov (%p26_p0, %s25_s24), 0  ;;  %s1720_s25 = smov (!%p26_p0, %s28_s25), %s1279_s21 }
   0xd   : > { %s37_s27 = ssub.s32 %s1275_s20, %s1718_s24  ;;  %p49_p2 = scmp.eq.s32.totalorder %s1283_s22, 0 }
   0xe   : > { %p30_p3 = scmp.ge.s32.totalorder %s1720_s25, 2  ;;  %p39_p4 = scmp.eq.s32.totalorder %s37_s27, 0 }
   0xf   : > { %p1373_p5 = por %p49_p2, %p48_p1  ;;  %s69_s29 = sadd.s32 1, %s1255_s15 }
  0x10   : > { %s1722_s25 = smov (%p30_p3, %s1720_s25), 0  ;;  %p76_p6 = scmp.ne.s32.totalorder %s1255_s15, %s1251_s14 }
  0x11   : > { %1701 = sst [smem:[#allocation6_spill]] %s1722_s25  ;;  %s65_s4 = ssub.s32 %s1279_s21, %s1722_s25 }
  0x12   : > { %s1381_s30 = scalar_select %p39_p4, %s1263_s17, %s41_s26  }
  0x13   : > { %s66_s5 = sor.u32 %s65_s4, %s37_s27  ;;  %p121_p7 = scmp.eq.s32.totalorder %s65_s4, 0 }
  0x14   : > { %p67_p8 = scmp.eq.s32.totalorder %s66_s5, 0  ;;  %p1387_p9 = por %p76_p6, %p49_p2 }
  0x15   : > { %s123_s7 = sadd.s32 1, %s1247_s13  ;;  %p133_p10 = scmp.ne.s32.totalorder %s1247_s13, %s1243_s12 }
  0x16   : > { %s1395_s8 = scalar_select %p67_p8, %s1255_s15, %s69_s29  }
  0x17   : > { %s1398_s9 = scalar_select %p121_p7, %s1247_s13, %s123_s7  }
  0x18   : > { %p134_p11 = scmp.eq.s32.totalorder %s966_s23, 13  ;;  %p969_p13 = scmp.ge.s32.totalorder %s1283_s22, 14 }
  0x1a   : > { %p1400_p12 = por %p134_p11, %p133_p10  ;;  %156 = sbr.rel (%p969_p13) target bundleno = 83 (0x53), region = 16 }
  0x21   : > { %159 = sbr.rel (!%p1373_p5) target bundleno = 57 (0x39), region = 20  ;;  %s161_s11 = sand.u32 (%p1373_p5), 1, %s1263_s17  }
  0x22   : > { %s984_s26 = sshll.u32 (%p1373_p5), %s1275_s20, 4  ;;  %s1105_s27 = smul.u32 (%p1373_p5), 208, %s161_s11 }
  0x23   : > { %s1704_s0 = sld [smem:[#allocation7_spill]] (%p1373_p5) }
  0x24   : > { %s1420_s23 = scalar_lea.vmem (%p1373_p5), [#allocation3], %s1105_s27 }
  0x29   : > { %s1412_s5 = scalar_lea.vmem %s1704_s0, %s984_s26 }
  0x2a   : > { %v182_v0 = vld [vmem:[%s1412_s5] sm:$0xff]  ;;  %v184_v1 = vld [vmem:[%s1412_s5 + $0x8] sm:$0xff]  ;;  %v186_v2 = vld [vmem:[%s1412_s5 + $0x70] sm:$0xff] }
  0x2b   : > { %v188_v3 = vld [vmem:[%s1412_s5 + $0x78] sm:$0xff]  ;;  %v190_v4 = vld [vmem:[%s1412_s5 + $0xe0] sm:$0xff]  ;;  %v192_v5 = vld [vmem:[%s1412_s5 + $0xe8] sm:$0xff]  ;;  %183 = vst [vmem:[%s1420_s23] sm:$0xff] %v182_v0 }
  0x2c   : > { %185 = vst [vmem:[%s1420_s23 + $0x8] sm:$0xff] %v184_v1  ;;  %187 = vst [vmem:[%s1420_s23 + $0x10] sm:$0xff] %v186_v2  ;;  %v194_v6 = vld [vmem:[%s1412_s5 + $0x150] sm:$0xff]  ;;  %v196_v7 = vld [vmem:[%s1412_s5 + $0x158] sm:$0xff] }
  0x2d   : > { %189 = vst [vmem:[%s1420_s23 + $0x18] sm:$0xff] %v188_v3  ;;  %191 = vst [vmem:[%s1420_s23 + $0x20] sm:$0xff] %v190_v4  ;;  %v198_v8 = vld [vmem:[%s1412_s5 + $0x1c0] sm:$0xff]  ;;  %v200_v9 = vld [vmem:[%s1412_s5 + $0x1c8] sm:$0xff] }
  0x2e   : > { %193 = vst [vmem:[%s1420_s23 + $0x28] sm:$0xff] %v192_v5  ;;  %195 = vst [vmem:[%s1420_s23 + $0x30] sm:$0xff] %v194_v6  ;;  %v202_v10 = vld [vmem:[%s1412_s5 + $0x230] sm:$0xff]  ;;  %v204_v11 = vld [vmem:[%s1412_s5 + $0x238] sm:$0xff] }
  0x2f   : > { %197 = vst [vmem:[%s1420_s23 + $0x38] sm:$0xff] %v196_v7  ;;  %199 = vst [vmem:[%s1420_s23 + $0x40] sm:$0xff] %v198_v8  ;;  %v206_v12 = vld [vmem:[%s1412_s5 + $0x2a0] sm:$0xff]  ;;  %v208_v13 = vld [vmem:[%s1412_s5 + $0x2a8] sm:$0xff] }
  0x30   : > { %201 = vst [vmem:[%s1420_s23 + $0x48] sm:$0xff] %v200_v9  ;;  %203 = vst [vmem:[%s1420_s23 + $0x50] sm:$0xff] %v202_v10  ;;  %v210_v14 = vld [vmem:[%s1412_s5 + $0x310] sm:$0xff]  ;;  %v212_v15 = vld [vmem:[%s1412_s5 + $0x318] sm:$0xff] }
  0x31   : > { %205 = vst [vmem:[%s1420_s23 + $0x58] sm:$0xff] %v204_v11  ;;  %207 = vst [vmem:[%s1420_s23 + $0x60] sm:$0xff] %v206_v12  ;;  %v214_v16 = vld [vmem:[%s1412_s5 + $0x380] sm:$0xff]  ;;  %v216_v17 = vld [vmem:[%s1412_s5 + $0x388] sm:$0xff] }
  0x32   : > { %209 = vst [vmem:[%s1420_s23 + $0x68] sm:$0xff] %v208_v13  ;;  %211 = vst [vmem:[%s1420_s23 + $0x70] sm:$0xff] %v210_v14  ;;  %v218_v18 = vld [vmem:[%s1412_s5 + $0x3f0] sm:$0xff]  ;;  %v220_v19 = vld [vmem:[%s1412_s5 + $0x3f8] sm:$0xff] }
  0x33   : > { %213 = vst [vmem:[%s1420_s23 + $0x78] sm:$0xff] %v212_v15  ;;  %215 = vst [vmem:[%s1420_s23 + $0x80] sm:$0xff] %v214_v16  ;;  %v222_v20 = vld [vmem:[%s1412_s5 + $0x460] sm:$0xff]  ;;  %v224_v21 = vld [vmem:[%s1412_s5 + $0x468] sm:$0xff] }
  0x34   : > { %217 = vst [vmem:[%s1420_s23 + $0x88] sm:$0xff] %v216_v17  ;;  %219 = vst [vmem:[%s1420_s23 + $0x90] sm:$0xff] %v218_v18  ;;  %v226_v22 = vld [vmem:[%s1412_s5 + $0x4d0] sm:$0xff]  ;;  %v228_v23 = vld [vmem:[%s1412_s5 + $0x4d8] sm:$0xff] }
  0x35   : > { %221 = vst [vmem:[%s1420_s23 + $0x98] sm:$0xff] %v220_v19  ;;  %223 = vst [vmem:[%s1420_s23 + $0xa0] sm:$0xff] %v222_v20  ;;  %v230_v24 = vld [vmem:[%s1412_s5 + $0x540] sm:$0xff]  ;;  %v232_v25 = vld [vmem:[%s1412_s5 + $0x548] sm:$0xff] }
  0x36   : > { %225 = vst [vmem:[%s1420_s23 + $0xa8] sm:$0xff] %v224_v21  ;;  %227 = vst [vmem:[%s1420_s23 + $0xb0] sm:$0xff] %v226_v22 }
  0x37   : > { %229 = vst [vmem:[%s1420_s23 + $0xb8] sm:$0xff] %v228_v23  ;;  %231 = vst [vmem:[%s1420_s23 + $0xc0] sm:$0xff] %v230_v24 }
  0x38   : > { %233 = vst [vmem:[%s1420_s23 + $0xc8] sm:$0xff] %v232_v25 }
  0x39 PF: > { %239 = sbr.rel (!%p1387_p9) target bundleno = 83 (0x53), region = 43  ;;  %s241_s28 = sand.u32 (%p1387_p9), 1, %s1255_s15  }
  0x3a   : > { %s985_s7 = sshll.u32 (%p1387_p9), %s1275_s20, 6  ;;  %s972_s11 = sshll.u32 (%p1387_p9), %s241_s28, 8 }
  0x3b   : > { %s246_s26 = sadd.s32 (%p1387_p9), %s1279_s21, %s985_s7  ;;  %s1705_s1 = sld [smem:[#allocation8_spill]] (%p1387_p9) }
  0x3c   : > { %s975_s27 = sshll.u32 (%p1387_p9), %s246_s26, 3  ;;  %s1481_s6 = scalar_lea.vmem (%p1387_p9), [#allocation4], %s972_s11 }
  0x41   : > { %s1476_s0 = scalar_lea.vmem %s1705_s1, %s975_s27 }
  0x42   : > { %v338_v26 = vld [vmem:[%s1476_s0] sm:$0xff]  ;;  %v340_v27 = vld [vmem:[%s1476_s0 + $0x10] sm:$0xff] }
  0x43   : > { %v342_v28 = vld [vmem:[%s1476_s0 + $0x20] sm:$0xff]  ;;  %339 = vst [vmem:[%s1481_s6] sm:$0xff] %v338_v26  ;;  %341 = vst [vmem:[%s1481_s6 + $0x8] sm:$0xff] %v340_v27  ;;  %v344_v29 = vld [vmem:[%s1476_s0 + $0x30] sm:$0xff] }
  0x44   : > { %343 = vst [vmem:[%s1481_s6 + $0x10] sm:$0xff] %v342_v28  ;;  %v346_v30 = vld [vmem:[%s1476_s0 + $0x40] sm:$0xff]  ;;  %v348_v31 = vld [vmem:[%s1476_s0 + $0x50] sm:$0xff]  ;;  %345 = vst [vmem:[%s1481_s6 + $0x18] sm:$0xff] %v344_v29 }
  0x45   : > { %347 = vst [vmem:[%s1481_s6 + $0x20] sm:$0xff] %v346_v30  ;;  %349 = vst [vmem:[%s1481_s6 + $0x28] sm:$0xff] %v348_v31  ;;  %v350_v32 = vld [vmem:[%s1476_s0 + $0x60] sm:$0xff]  ;;  %v352_v33 = vld [vmem:[%s1476_s0 + $0x70] sm:$0xff] }
  0x46   : > { %v354_v34 = vld [vmem:[%s1476_s0 + $0x80] sm:$0xff]  ;;  %351 = vst [vmem:[%s1481_s6 + $0x30] sm:$0xff] %v350_v32  ;;  %353 = vst [vmem:[%s1481_s6 + $0x38] sm:$0xff] %v352_v33  ;;  %v356_v35 = vld [vmem:[%s1476_s0 + $0x90] sm:$0xff] }
  0x47   : > { %355 = vst [vmem:[%s1481_s6 + $0x40] sm:$0xff] %v354_v34  ;;  %v358_v36 = vld [vmem:[%s1476_s0 + $0xa0] sm:$0xff]  ;;  %v360_v37 = vld [vmem:[%s1476_s0 + $0xb0] sm:$0xff]  ;;  %357 = vst [vmem:[%s1481_s6 + $0x48] sm:$0xff] %v356_v35 }
  0x48   : > { %359 = vst [vmem:[%s1481_s6 + $0x50] sm:$0xff] %v358_v36  ;;  %361 = vst [vmem:[%s1481_s6 + $0x58] sm:$0xff] %v360_v37  ;;  %v362_v38 = vld [vmem:[%s1476_s0 + $0xc0] sm:$0xff]  ;;  %v364_v39 = vld [vmem:[%s1476_s0 + $0xd0] sm:$0xff] }
  0x49   : > { %v366_v40 = vld [vmem:[%s1476_s0 + $0xe0] sm:$0xff]  ;;  %363 = vst [vmem:[%s1481_s6 + $0x60] sm:$0xff] %v362_v38  ;;  %365 = vst [vmem:[%s1481_s6 + $0x68] sm:$0xff] %v364_v39  ;;  %v368_v41 = vld [vmem:[%s1476_s0 + $0xf0] sm:$0xff] }
  0x4a   : > { %367 = vst [vmem:[%s1481_s6 + $0x70] sm:$0xff] %v366_v40  ;;  %v370_v42 = vld [vmem:[%s1476_s0 + $0x100] sm:$0xff]  ;;  %v372_v43 = vld [vmem:[%s1476_s0 + $0x110] sm:$0xff]  ;;  %369 = vst [vmem:[%s1481_s6 + $0x78] sm:$0xff] %v368_v41 }
  0x4b   : > { %371 = vst [vmem:[%s1481_s6 + $0x80] sm:$0xff] %v370_v42  ;;  %373 = vst [vmem:[%s1481_s6 + $0x88] sm:$0xff] %v372_v43  ;;  %v374_v44 = vld [vmem:[%s1476_s0 + $0x120] sm:$0xff]  ;;  %v376_v45 = vld [vmem:[%s1476_s0 + $0x130] sm:$0xff] }
  0x4c   : > { %v378_v46 = vld [vmem:[%s1476_s0 + $0x140] sm:$0xff]  ;;  %375 = vst [vmem:[%s1481_s6 + $0x90] sm:$0xff] %v374_v44  ;;  %377 = vst [vmem:[%s1481_s6 + $0x98] sm:$0xff] %v376_v45  ;;  %v380_v47 = vld [vmem:[%s1476_s0 + $0x150] sm:$0xff] }
  0x4d   : > { %379 = vst [vmem:[%s1481_s6 + $0xa0] sm:$0xff] %v378_v46  ;;  %v382_v48 = vld [vmem:[%s1476_s0 + $0x160] sm:$0xff]  ;;  %v384_v49 = vld [vmem:[%s1476_s0 + $0x170] sm:$0xff]  ;;  %381 = vst [vmem:[%s1481_s6 + $0xa8] sm:$0xff] %v380_v47 }
  0x4e   : > { %383 = vst [vmem:[%s1481_s6 + $0xb0] sm:$0xff] %v382_v48  ;;  %385 = vst [vmem:[%s1481_s6 + $0xb8] sm:$0xff] %v384_v49  ;;  %v386_v50 = vld [vmem:[%s1476_s0 + $0x180] sm:$0xff]  ;;  %v388_v51 = vld [vmem:[%s1476_s0 + $0x190] sm:$0xff] }
  0x4f   : > { %v390_v52 = vld [vmem:[%s1476_s0 + $0x1a0] sm:$0xff]  ;;  %387 = vst [vmem:[%s1481_s6 + $0xc0] sm:$0xff] %v386_v50  ;;  %389 = vst [vmem:[%s1481_s6 + $0xc8] sm:$0xff] %v388_v51  ;;  %v392_v53 = vld [vmem:[%s1476_s0 + $0x1b0] sm:$0xff] }
  0x50   : > { %391 = vst [vmem:[%s1481_s6 + $0xd0] sm:$0xff] %v390_v52  ;;  %v394_v54 = vld [vmem:[%s1476_s0 + $0x1c0] sm:$0xff]  ;;  %v396_v55 = vld [vmem:[%s1476_s0 + $0x1d0] sm:$0xff]  ;;  %393 = vst [vmem:[%s1481_s6 + $0xd8] sm:$0xff] %v392_v53 }
  0x51   : > { %395 = vst [vmem:[%s1481_s6 + $0xe0] sm:$0xff] %v394_v54  ;;  %397 = vst [vmem:[%s1481_s6 + $0xe8] sm:$0xff] %v396_v55  ;;  %v398_v56 = vld [vmem:[%s1476_s0 + $0x1e0] sm:$0xff]  ;;  %v400_v57 = vld [vmem:[%s1476_s0 + $0x1f0] sm:$0xff] }
  0x52   : > { %399 = vst [vmem:[%s1481_s6 + $0xf0] sm:$0xff] %v398_v56  ;;  %401 = vst [vmem:[%s1481_s6 + $0xf8] sm:$0xff] %v400_v57 }
  0x53 PF: > { %p976_p0 = scmp.ge.s32.totalorder %s1283_s22, 1  ;;  %p412_p1 = scmp.lt.s32.totalorder %s1283_s22, 15 }
  0x55   : > { %p413_p2 = pnand %p976_p0, %p412_p1 }
  0x56   : > { %s419_s5 = sand.u32 (!%p413_p2), 1, %s1259_s16   ;;  %s426_s23 = sand.u32 (!%p413_p2), 1, %s1251_s14  }
  0x57   : > { %416 = sbr.rel (%p413_p2) target bundleno = 401 (0x191), region = 85  ;;  %s977_s7 = sshll.u32 (!%p413_p2), %s426_s23, 8 }
  0x58   : > { %s1106_s28 = smul.u32 (!%p413_p2), 208, %s419_s5  ;;  %s452_s0 = sand.u32 (!%p413_p2), 1, %s1243_s12  }
  0x59   : > { %s1107_s11 = smul.u32 (!%p413_p2), 104, %s452_s0  ;;  %p458_p3 = scmp.lt.s32.totalorder (!%p413_p2), %s1271_s19, 1 }
  0x5a   : > { %s1557_s6 = scalar_lea.vmem (!%p413_p2), [#allocation3], %s1106_s28  ;;  %s1559_s1 = scalar_lea.vmem (!%p413_p2), [#allocation4], %s977_s7 }
  0x5b   : > { %s1561_s25 = scalar_lea.vmem (!%p413_p2), [#allocation5], %s1107_s11  ;;  %p978_p4 = scmp.ne.s32.totalorder (!%p413_p2), %s1267_s18, 0 }
  0x5e   : > { %s1551_s26 = scalar_select %p458_p3, %s1271_s19, 1 }
  0x5f   : > { %465 = sbr.rel (%p978_p4) target bundleno = 103 (0x67), region = 97  ;;  %v1285_v58 = vmov (!%p978_p4), 0.0  }
  0x60   : > { %s460_s4 = scalar_lea.vmem %s1695_s2, %s1551_s26  ;;  %466 = vst [vmem:[#allocation2] sm:$0xff] (!%p978_p4), %v1285_v58  ;;  %467 = vst [vmem:[#allocation2 + $0x8] sm:$0xff] (!%p978_p4), %v1285_v58 }
  0x61   : > { %468 = vst [vmem:[#allocation2 + $0x10] sm:$0xff] (!%p978_p4), %v1285_v58  ;;  %469 = vst [vmem:[#allocation2 + $0x18] sm:$0xff] (!%p978_p4), %v1285_v58 }
  0x62   : > { %470 = vst [vmem:[#allocation2 + $0x20] sm:$0xff] (!%p978_p4), %v1285_v58  ;;  %471 = vst [vmem:[#allocation2 + $0x28] sm:$0xff] (!%p978_p4), %v1285_v58 }
  0x63   : > { %472 = vst [vmem:[#allocation2 + $0x30] sm:$0xff] (!%p978_p4), %v1285_v58  ;;  %473 = vst [vmem:[#allocation2 + $0x38] sm:$0xff] (!%p978_p4), %v1285_v58 }
  0x64   : > { %474 = vst [vmem:[#allocation2 + $0x40] sm:$0xff] (!%p978_p4), %v1285_v58  ;;  %475 = vst [vmem:[#allocation2 + $0x48] sm:$0xff] (!%p978_p4), %v1285_v58 }
  0x65   : > { %476 = vst [vmem:[#allocation2 + $0x50] sm:$0xff] (!%p978_p4), %v1285_v58  ;;  %477 = vst [vmem:[#allocation2 + $0x58] sm:$0xff] (!%p978_p4), %v1285_v58 }
  0x66   : > { %478 = vst [vmem:[#allocation2 + $0x60] sm:$0xff] %v1285_v58 }
  0x67 PF: > { %v534_v59 = vld [vmem:[%s1559_s1 + $0x80] sm:$0xff]  ;;  %v535_v60 = vld [vmem:[%s1559_s1 + $0x88] sm:$0xff]  ;;  %v536_v0 = vld [vmem:[%s1559_s1 + $0x90] sm:$0xff]  ;;  %p979_p5 = scmp.ne.s32.totalorder %s1267_s18, 6 }
  0x68   : > { %v518_v61 = vld [vmem:[%s1559_s1] sm:$0xff]  ;;  %v1057_v62 = vpack.c.bf16 %v535_v60, %v534_v59  ;;  %v519_v63 = vld [vmem:[%s1559_s1 + $0x8] sm:$0xff]  ;;  %v537_v1 = vld [vmem:[%s1559_s1 + $0x98] sm:$0xff] }
  0x69   : > { %v1059_v2 = vpack.c.bf16 %v519_v63, %v518_v61  ;;  %v1061_v3 = vpack.c.bf16 %v537_v1, %v536_v0  ;;  %v520_v4 = vld [vmem:[%s1559_s1 + $0x10] sm:$0xff]  ;;  %v521_v5 = vld [vmem:[%s1559_s1 + $0x18] sm:$0xff]  ;;  %v538_v6 = vld [vmem:[%s1559_s1 + $0xa0] sm:$0xff] }
  0x6a   : > { %1058 = vmatprep.subr.bf16.mxu0 %v1057_v62  ;;  %1089 = vmatprep.subr.bf16.mxu1 %v1057_v62  ;;  %v539_v7 = vld [vmem:[%s1559_s1 + $0xa8] sm:$0xff]  ;;  %v1063_v8 = vpack.c.bf16 %v521_v5, %v520_v4  ;;  %v522_v10 = vld [vmem:[%s1559_s1 + $0x20] sm:$0xff]  ;;  %v540_v12 = vld [vmem:[%s1559_s1 + $0xb0] sm:$0xff] }
  0x6b   : > { %1060 = vmatpush3.bf16.msra.mxu0 %v1059_v2  ;;  %1097 = vmatpush3.bf16.msra.mxu1 %v1059_v2  ;;  %v1065_v9 = vpack.c.bf16 %v539_v7, %v538_v6  ;;  %v523_v11 = vld [vmem:[%s1559_s1 + $0x28] sm:$0xff]  ;;  %v541_v13 = vld [vmem:[%s1559_s1 + $0xb8] sm:$0xff]  ;;  %v524_v16 = vld [vmem:[%s1559_s1 + $0x30] sm:$0xff] }
  0x6c   : > { %1062 = vmatprep.subr.bf16.mxu0 %v1061_v3  ;;  %1090 = vmatprep.subr.bf16.mxu1 %v1061_v3  ;;  %v1067_v14 = vpack.c.bf16 %v523_v11, %v522_v10  ;;  %v1069_v15 = vpack.c.bf16 %v541_v13, %v540_v12  ;;  %v525_v17 = vld [vmem:[%s1559_s1 + $0x38] sm:$0xff]  ;;  %v542_v18 = vld [vmem:[%s1559_s1 + $0xc0] sm:$0xff]  ;;  %v543_v19 = vld [vmem:[%s1559_s1 + $0xc8] sm:$0xff] }
  0x6d   : > { %v493_v20 = vld [vmem:[%s1557_s6 + $0x8] sm:$0xff]  ;;  %v507_v21 = vld [vmem:[%s1557_s6 + $0x78] sm:$0xff]  ;;  %v1071_v22 = vpack.c.bf16 %v525_v17, %v524_v16  ;;  %v1073_v23 = vpack.c.bf16 %v543_v19, %v542_v18  ;;  %v526_v24 = vld [vmem:[%s1559_s1 + $0x40] sm:$0xff] }
  0x6e   : > { %614 = vmatprep.mubr.f32.mxu0 %v493_v20  ;;  %v527_v25 = vld [vmem:[%s1559_s1 + $0x48] sm:$0xff]  ;;  %v544_v26 = vld [vmem:[%s1559_s1 + $0xd0] sm:$0xff]  ;;  %v545_v27 = vld [vmem:[%s1559_s1 + $0xd8] sm:$0xff]  ;;  %649 = vmatprep.mubr.f32.mxu1 %v507_v21 }
  0x6f   : > { %1064 = vmatpush3.bf16.msra.mxu0 %v1063_v8  ;;  %1098 = vmatpush3.bf16.msra.mxu1 %v1063_v8  ;;  %v1075_v28 = vpack.c.bf16 %v527_v25, %v526_v24  ;;  %v1077_v29 = vpack.c.bf16 %v545_v27, %v544_v26  ;;  %v528_v30 = vld [vmem:[%s1559_s1 + $0x50] sm:$0xff]  ;;  %v529_v31 = vld [vmem:[%s1559_s1 + $0x58] sm:$0xff]  ;;  %v546_v32 = vld [vmem:[%s1559_s1 + $0xe0] sm:$0xff] }
  0x70   : > { %1066 = vmatprep.subr.bf16.mxu0 %v1065_v9  ;;  %1091 = vmatprep.subr.bf16.mxu1 %v1065_v9  ;;  %v547_v33 = vld [vmem:[%s1559_s1 + $0xe8] sm:$0xff]  ;;  %v1079_v34 = vpack.c.bf16 %v529_v31, %v528_v30  ;;  %v530_v36 = vld [vmem:[%s1559_s1 + $0x60] sm:$0xff]  ;;  %v548_v38 = vld [vmem:[%s1559_s1 + $0xf0] sm:$0xff] }
  0x71   : > { %v1081_v35 = vpack.c.bf16 %v547_v33, %v546_v32  ;;  %v531_v37 = vld [vmem:[%s1559_s1 + $0x68] sm:$0xff]  ;;  %v549_v39 = vld [vmem:[%s1559_s1 + $0xf8] sm:$0xff]  ;;  %v532_v42 = vld [vmem:[%s1559_s1 + $0x70] sm:$0xff] }
  0x72   : > { %v1083_v40 = vpack.c.bf16 %v531_v37, %v530_v36  ;;  %v1085_v41 = vpack.c.bf16 %v549_v39, %v548_v38  ;;  %v533_v43 = vld [vmem:[%s1559_s1 + $0x78] sm:$0xff]  ;;  %v492_v45 = vld [vmem:[%s1557_s6] sm:$0xff]  ;;  %v506_v46 = vld [vmem:[%s1557_s6 + $0x70] sm:$0xff] }
  0x73   : > { %1068 = vmatpush3.bf16.msra.mxu0 %v1067_v14  ;;  %1099 = vmatpush3.bf16.msra.mxu1 %v1067_v14  ;;  %v1087_v44 = vpack.c.bf16 %v533_v43, %v532_v42  ;;  %v495_v47 = vld [vmem:[%s1557_s6 + $0x18] sm:$0xff]  ;;  %v509_v48 = vld [vmem:[%s1557_s6 + $0x88] sm:$0xff]  ;;  %v494_v49 = vld [vmem:[%s1557_s6 + $0x10] sm:$0xff] }
  0x74   : > { %1070 = vmatprep.subr.bf16.mxu0 %v1069_v15  ;;  %1092 = vmatprep.subr.bf16.mxu1 %v1069_v15  ;;  %v508_v50 = vld [vmem:[%s1557_s6 + $0x80] sm:$0xff]  ;;  %v497_v51 = vld [vmem:[%s1557_s6 + $0x28] sm:$0xff]  ;;  %v511_v52 = vld [vmem:[%s1557_s6 + $0x98] sm:$0xff] }
  0x75   : > { %v496_v53 = vld [vmem:[%s1557_s6 + $0x20] sm:$0xff]  ;;  %v510_v54 = vld [vmem:[%s1557_s6 + $0x90] sm:$0xff]  ;;  %v499_v55 = vld [vmem:[%s1557_s6 + $0x38] sm:$0xff] }
  0x76   : > { %v513_v56 = vld [vmem:[%s1557_s6 + $0xa8] sm:$0xff]  ;;  %v498_v57 = vld [vmem:[%s1557_s6 + $0x30] sm:$0xff]  ;;  %v512_v58 = vld [vmem:[%s1557_s6 + $0xa0] sm:$0xff] }
  0x77   : > { %1072 = vmatpush3.bf16.msra.mxu0 %v1071_v22  ;;  %1100 = vmatpush3.bf16.msra.mxu1 %v1071_v22  ;;  %v501_v59 = vld [vmem:[%s1557_s6 + $0x48] sm:$0xff]  ;;  %v515_v60 = vld [vmem:[%s1557_s6 + $0xb8] sm:$0xff]  ;;  %v500_v61 = vld [vmem:[%s1557_s6 + $0x40] sm:$0xff] }
  0x78   : > { %1074 = vmatprep.subr.bf16.mxu0 %v1073_v23  ;;  %1093 = vmatprep.subr.bf16.mxu1 %v1073_v23  ;;  %v514_v62 = vld [vmem:[%s1557_s6 + $0xb0] sm:$0xff]  ;;  %v503_v63 = vld [vmem:[%s1557_s6 + $0x58] sm:$0xff]  ;;  %v517_v0 = vld [vmem:[%s1557_s6 + $0xc8] sm:$0xff] }
  0x79   : > { %v502_v1 = vld [vmem:[%s1557_s6 + $0x50] sm:$0xff]  ;;  %v516_v2 = vld [vmem:[%s1557_s6 + $0xc0] sm:$0xff]  ;;  %v505_v3 = vld [vmem:[%s1557_s6 + $0x68] sm:$0xff] }
  0x7a   : > { %v504_v4 = vld [vmem:[%s1557_s6 + $0x60] sm:$0xff]  ;;  %v479_v7 = vld [vmem:[#allocation2] sm:$0xff]  ;;  %v481_v27 = vld [vmem:[#allocation2 + $0x10] sm:$0xff] }
  0x7b   : > { %1076 = vmatpush3.bf16.msra.mxu0 %v1075_v28  ;;  %1101 = vmatpush3.bf16.msra.mxu1 %v1075_v28  ;;  %v486_v9 = vld [vmem:[#allocation2 + $0x38] sm:$0xff]  ;;  %v480_v17 = vld [vmem:[#allocation2 + $0x8] sm:$0xff]  ;;  %v487_v19 = vld [vmem:[#allocation2 + $0x40] sm:$0xff] }
  0x7c   : > { %1078 = vmatprep.subr.bf16.mxu0 %v1077_v29  ;;  %1094 = vmatprep.subr.bf16.mxu1 %v1077_v29  ;;  %v488_v29 = vld [vmem:[#allocation2 + $0x48] sm:$0xff]  ;;  %v482_v37 = vld [vmem:[#allocation2 + $0x18] sm:$0xff]  ;;  %v489_v39 = vld [vmem:[#allocation2 + $0x50] sm:$0xff] }
  0x7f   : > { %1080 = vmatpush3.bf16.msra.mxu0 %v1079_v34  ;;  %1102 = vmatpush3.bf16.msra.mxu1 %v1079_v34 }
  0x80   : > { %1082 = vmatprep.subr.bf16.mxu0 %v1081_v35  ;;  %1095 = vmatprep.subr.bf16.mxu1 %v1081_v35 }
  0x83   : > { %1084 = vmatpush3.bf16.msra.mxu0 %v1083_v40  ;;  %1103 = vmatpush3.bf16.msra.mxu1 %v1083_v40 }
  0x84   : > { %1086 = vmatprep.subr.bf16.mxu0 %v1085_v41  ;;  %1096 = vmatprep.subr.bf16.mxu1 %v1085_v41 }
  0x87   : > { %1088 = vmatpush3.bf16.msra.mxu0 %v1087_v44  ;;  %1104 = vmatpush3.bf16.msra.mxu1 %v1087_v44 }
  0x8a   : > { %615 = vmatmul.mubr.f32.vlgmr.msra.gmra.mrb[0].mxu0 %v492_v45  ;;  %650 = vmatmul.mubr.f32.vlgmr.msra.gmra.mrb[0].mxu1 %v506_v46 }
  0x8b   : > { %619 = vmatprep.mubr.f32.mxu0 %v495_v47  ;;  %654 = vmatprep.mubr.f32.mxu1 %v509_v48  ;;  %v483_v47 = vld [vmem:[#allocation2 + $0x20] sm:$0xff] }
  0x8e   : > { %620 = vmatmul.mubr.f32.gmra.mrb[2].mxu0 %v494_v49  ;;  %655 = vmatmul.mubr.f32.gmra.mrb[2].mxu1 %v508_v50  ;;  %v490_v49 = vld [vmem:[#allocation2 + $0x58] sm:$0xff] }
  0x8f   : > { %624 = vmatprep.mubr.f32.mxu0 %v497_v51  ;;  %659 = vmatprep.mubr.f32.mxu1 %v511_v52 }
  0x92   : > { %625 = vmatmul.mubr.f32.gmra.mrb[4].mxu0 %v496_v53  ;;  %660 = vmatmul.mubr.f32.gmra.mrb[4].mxu1 %v510_v54 }
  0x93   : > { %629 = vmatprep.mubr.f32.mxu0 %v499_v55  ;;  %664 = vmatprep.mubr.f32.mxu1 %v513_v56 }
  0x96   : > { %630 = vmatmul.mubr.f32.gmra.mrb[6].mxu0 %v498_v57  ;;  %665 = vmatmul.mubr.f32.gmra.mrb[6].mxu1 %v512_v58  ;;  %v484_v57 = vld [vmem:[#allocation2 + $0x28] sm:$0xff] }
  0x97   : > { %634 = vmatprep.mubr.f32.mxu0 %v501_v59  ;;  %669 = vmatprep.mubr.f32.mxu1 %v515_v60  ;;  %v491_v59 = vld [vmem:[#allocation2 + $0x60] sm:$0xff] }
  0x9a   : > { %635 = vmatmul.mubr.f32.gmra.mrb[8].mxu0 %v500_v61  ;;  %670 = vmatmul.mubr.f32.gmra.mrb[8].mxu1 %v514_v62 }
  0x9b   : > { %639 = vmatprep.mubr.f32.mxu0 %v503_v63  ;;  %674 = vmatprep.mubr.f32.mxu1 %v517_v0 }
  0x9e   : > { %640 = vmatmul.mubr.f32.gmra.mrb[10].mxu0 %v502_v1  ;;  %675 = vmatmul.mubr.f32.gmra.mrb[10].mxu1 %v516_v2  ;;  %v485_v2 = vld [vmem:[#allocation2 + $0x30] sm:$0xff] }
  0x9f   : > { %644 = vmatprep.mubr.f32.mxu0 %v505_v3 }
  0xa2   : > { %645 = vmatmul.mubr.f32.gmra.mrb[12].mxu0 %v504_v4 }
 0x15d   : > { %v1018_v5 = vpop.f32.mrb[0].mxu0  ;;  %v1039_v6 = vpop.f32.mrb[0].mxu1 }
 0x15e   : > { %v1019_v8 = vpop.f32.mrb[1].mxu0  ;;  %v1040_v10 = vpop.f32.mrb[1].mxu1 }
 0x15f   : > { %v1020_v11 = vadd.f32 %v1019_v8, %v1018_v5  ;;  %v1041_v12 = vadd.f32 %v1040_v10, %v1039_v6 }
 0x161   : > { %v680_v13 = vadd.f32 %v1020_v11, %v479_v7  ;;  %v1021_v14 = vpop.f32.mrb[2].mxu0  ;;  %v687_v15 = vadd.f32 %v1041_v12, %v486_v9  ;;  %v1042_v16 = vpop.f32.mrb[2].mxu1  ;;  %v980_v7 = vld [vmem:[%s460_s4] ss:$0 sm:$0xff] (!%p979_p5) }
 0x162   : > { %v1022_v18 = vpop.f32.mrb[3].mxu0  ;;  %v1043_v20 = vpop.f32.mrb[3].mxu1 }
 0x163   : > { %693 = vst [vmem:[#allocation2] sm:$0xff] %v680_v13  ;;  %700 = vst [vmem:[#allocation2 + $0x38] sm:$0xff] %v687_v15  ;;  %v1023_v21 = vadd.f32 %v1022_v18, %v1021_v14  ;;  %v1044_v22 = vadd.f32 %v1043_v20, %v1042_v16 }
 0x165   : > { %v681_v23 = vadd.f32 %v1023_v21, %v480_v17  ;;  %v1024_v24 = vpop.f32.mrb[4].mxu0  ;;  %v688_v25 = vadd.f32 %v1044_v22, %v487_v19  ;;  %v1045_v26 = vpop.f32.mrb[4].mxu1 }
 0x166   : > { %v1025_v28 = vpop.f32.mrb[5].mxu0  ;;  %v1046_v30 = vpop.f32.mrb[5].mxu1 }
 0x167   : > { %694 = vst [vmem:[#allocation2 + $0x8] sm:$0xff] %v681_v23  ;;  %701 = vst [vmem:[#allocation2 + $0x40] sm:$0xff] %v688_v25  ;;  %v1026_v31 = vadd.f32 %v1025_v28, %v1024_v24  ;;  %v1047_v32 = vadd.f32 %v1046_v30, %v1045_v26 }
 0x169   : > { %v682_v33 = vadd.f32 %v1026_v31, %v481_v27  ;;  %v1027_v34 = vpop.f32.mrb[6].mxu0  ;;  %v689_v35 = vadd.f32 %v1047_v32, %v488_v29  ;;  %v1048_v36 = vpop.f32.mrb[6].mxu1 }
 0x16a   : > { %v1028_v38 = vpop.f32.mrb[7].mxu0  ;;  %v1049_v40 = vpop.f32.mrb[7].mxu1  ;;  %v710_v6 = vld [vmem:[#allocation2] sm:$0xff] (!%p979_p5)  ;;  %v717_v19 = vld [vmem:[#allocation2 + $0x38] sm:$0xff] (!%p979_p5) }
 0x16b   : > { %695 = vst [vmem:[#allocation2 + $0x10] sm:$0xff] %v682_v33  ;;  %702 = vst [vmem:[#allocation2 + $0x48] sm:$0xff] %v689_v35  ;;  %v1029_v41 = vadd.f32 %v1028_v38, %v1027_v34  ;;  %v1050_v42 = vadd.f32 %v1049_v40, %v1048_v36  ;;  %v730_v9 = vadd.f32 (!%p979_p5), %v980_v7, %v710_v6 }
 0x16c   : > { %v737_v30 = vadd.f32 (!%p979_p5), %v980_v7, %v717_v19 }
 0x16d   : > { %v683_v43 = vadd.f32 %v1029_v41, %v482_v37  ;;  %v1030_v44 = vpop.f32.mrb[8].mxu0  ;;  %v690_v45 = vadd.f32 %v1050_v42, %v489_v39  ;;  %v1051_v46 = vpop.f32.mrb[8].mxu1  ;;  %v743_v20 = vmax.f32 (!%p979_p5), %v730_v9, 0.0 }
 0x16e   : > { %v1031_v48 = vpop.f32.mrb[9].mxu0  ;;  %v1052_v50 = vpop.f32.mrb[9].mxu1  ;;  %v711_v8 = vld [vmem:[#allocation2 + $0x8] sm:$0xff] (!%p979_p5)  ;;  %v718_v24 = vld [vmem:[#allocation2 + $0x40] sm:$0xff] (!%p979_p5)  ;;  %v750_v37 = vmax.f32 (!%p979_p5), %v737_v30, 0.0 }
 0x16f   : > { %696 = vst [vmem:[#allocation2 + $0x18] sm:$0xff] %v683_v43  ;;  %703 = vst [vmem:[#allocation2 + $0x50] sm:$0xff] %v690_v45  ;;  %v1032_v51 = vadd.f32 %v1031_v48, %v1030_v44  ;;  %v1053_v52 = vadd.f32 %v1052_v50, %v1051_v46  ;;  %v731_v10 = vadd.f32 (!%p979_p5), %v980_v7, %v711_v8 }
 0x170   : > { %756 = vst [vmem:[%s1561_s25] sm:$0xff] (!%p979_p5), %v743_v20  ;;  %v738_v35 = vadd.f32 (!%p979_p5), %v980_v7, %v718_v24  ;;  %763 = vst [vmem:[%s1561_s25 + $0x38] sm:$0xff] (!%p979_p5), %v750_v37 }
 0x171   : > { %v684_v53 = vadd.f32 %v1032_v51, %v483_v47  ;;  %v1033_v54 = vpop.f32.mrb[10].mxu0  ;;  %v691_v55 = vadd.f32 %v1053_v52, %v490_v49  ;;  %v1054_v56 = vpop.f32.mrb[10].mxu1  ;;  %v744_v21 = vmax.f32 (!%p979_p5), %v731_v10, 0.0 }
 0x172   : > { %v1034_v58 = vpop.f32.mrb[11].mxu0  ;;  %v1055_v60 = vpop.f32.mrb[11].mxu1  ;;  %v712_v11 = vld [vmem:[#allocation2 + $0x10] sm:$0xff] (!%p979_p5)  ;;  %v719_v25 = vld [vmem:[#allocation2 + $0x48] sm:$0xff] (!%p979_p5)  ;;  %v751_v41 = vmax.f32 (!%p979_p5), %v738_v35, 0.0 }
 0x173   : > { %697 = vst [vmem:[#allocation2 + $0x20] sm:$0xff] %v684_v53  ;;  %704 = vst [vmem:[#allocation2 + $0x58] sm:$0xff] %v691_v55  ;;  %v1035_v61 = vadd.f32 %v1034_v58, %v1033_v54  ;;  %v1056_v62 = vadd.f32 %v1055_v60, %v1054_v56  ;;  %v732_v14 = vadd.f32 (!%p979_p5), %v980_v7, %v712_v11 }
 0x174   : > { %757 = vst [vmem:[%s1561_s25 + $0x8] sm:$0xff] (!%p979_p5), %v744_v21  ;;  %v739_v36 = vadd.f32 (!%p979_p5), %v980_v7, %v719_v25  ;;  %764 = vst [vmem:[%s1561_s25 + $0x40] sm:$0xff] (!%p979_p5), %v751_v41 }
 0x175   : > { %v685_v63 = vadd.f32 %v1035_v61, %v484_v57  ;;  %v1036_v0 = vpop.f32.mrb[12].mxu0  ;;  %v692_v1 = vadd.f32 %v1056_v62, %v491_v59  ;;  %709 = sbr.rel (%p979_p5) target bundleno = 392 (0x188), region = 101  ;;  %v745_v27 = vmax.f32 (!%p979_p5), %v732_v14, 0.0 }
 0x176   : > { %v1037_v3 = vpop.f32.mrb[13].mxu0  ;;  %v713_v12 = vld [vmem:[#allocation2 + $0x18] sm:$0xff] (!%p979_p5)  ;;  %v720_v26 = vld [vmem:[#allocation2 + $0x50] sm:$0xff] (!%p979_p5)  ;;  %v752_v42 = vmax.f32 (!%p979_p5), %v739_v36, 0.0 }
 0x177   : > { %698 = vst [vmem:[#allocation2 + $0x28] sm:$0xff] %v685_v63  ;;  %705 = vst [vmem:[#allocation2 + $0x60] sm:$0xff] %v692_v1  ;;  %v1038_v4 = vadd.f32 %v1037_v3, %v1036_v0  ;;  %v733_v15 = vadd.f32 (!%p979_p5), %v980_v7, %v713_v12  ;;  %v740_v38 = vadd.f32 (!%p979_p5), %v980_v7, %v720_v26 }
 0x178   : > { %758 = vst [vmem:[%s1561_s25 + $0x10] sm:$0xff] (!%p979_p5), %v745_v27  ;;  %765 = vst [vmem:[%s1561_s25 + $0x48] sm:$0xff] (!%p979_p5), %v752_v42 }
 0x179   : > { %v686_v5 = vadd.f32 %v1038_v4, %v485_v2  ;;  %v746_v28 = vmax.f32 (!%p979_p5), %v733_v15, 0.0  ;;  %v753_v43 = vmax.f32 (!%p979_p5), %v740_v38, 0.0 }
 0x17a   : > { %v714_v13 = vld [vmem:[#allocation2 + $0x20] sm:$0xff] (!%p979_p5)  ;;  %v721_v31 = vld [vmem:[#allocation2 + $0x58] sm:$0xff] (!%p979_p5) }
 0x17b   : > { %699 = vst [vmem:[#allocation2 + $0x30] sm:$0xff] %v686_v5  ;;  %v734_v16 = vadd.f32 (!%p979_p5), %v980_v7, %v714_v13  ;;  %759 = vst [vmem:[%s1561_s25 + $0x18] sm:$0xff] (!%p979_p5), %v746_v28  ;;  %v741_v39 = vadd.f32 (!%p979_p5), %v980_v7, %v721_v31 }
 0x17c   : > { %766 = vst [vmem:[%s1561_s25 + $0x50] sm:$0xff] %v753_v43 }
 0x17d   : > { %v747_v29 = vmax.f32 %v734_v16, 0.0  ;;  %v754_v44 = vmax.f32 %v741_v39, 0.0 }
 0x17e   : > { %v715_v17 = vld [vmem:[#allocation2 + $0x28] sm:$0xff]  ;;  %v722_v32 = vld [vmem:[#allocation2 + $0x60] sm:$0xff] }
 0x17f   : > { %v735_v22 = vadd.f32 %v980_v7, %v715_v17  ;;  %760 = vst [vmem:[%s1561_s25 + $0x20] sm:$0xff] %v747_v29  ;;  %v742_v40 = vadd.f32 %v980_v7, %v722_v32  ;;  %767 = vst [vmem:[%s1561_s25 + $0x58] sm:$0xff] %v754_v44 }
 0x181   : > { %v748_v33 = vmax.f32 %v735_v22, 0.0  ;;  %v755_v45 = vmax.f32 %v742_v40, 0.0 }
 0x182   : > { %v716_v18 = vld [vmem:[#allocation2 + $0x30] sm:$0xff] }
 0x183   : > { %v736_v23 = vadd.f32 %v980_v7, %v716_v18  ;;  %761 = vst [vmem:[%s1561_s25 + $0x28] sm:$0xff] %v748_v33  ;;  %768 = vst [vmem:[%s1561_s25 + $0x60] sm:$0xff] %v755_v45 }
 0x185   : > { %v749_v34 = vmax.f32 %v736_v23, 0.0 }
 0x187   : > { %762 = vst [vmem:[%s1561_s25 + $0x30] sm:$0xff] %v749_v34 }
 0x188 PF: > { %775 = sbr.rel (!%p1400_p12) target bundleno = 401 (0x191), region = 105  ;;  %s981_s14 = sshll.u32 (%p1400_p12), %s1271_s19, 3  ;;  %v832_v46 = vld [vmem:[%s1561_s25] sm:$0xff] (%p1400_p12)  ;;  %v834_v47 = vld [vmem:[%s1561_s25 + $0x8] sm:$0xff] (%p1400_p12)  ;;  %v846_v53 = vld [vmem:[%s1561_s25 + $0x38] sm:$0xff] (%p1400_p12) }
 0x189   : > { %s780_s5 = scalar_lea.vmem (%p1400_p12), %s1696_s3, %s981_s14  ;;  %v840_v50 = vld [vmem:[%s1561_s25 + $0x20] sm:$0xff] (%p1400_p12)  ;;  %v854_v57 = vld [vmem:[%s1561_s25 + $0x58] sm:$0xff] (%p1400_p12) }
 0x18a   : > { %v842_v51 = vld [vmem:[%s1561_s25 + $0x28] sm:$0xff] (%p1400_p12)  ;;  %833 = vst [vmem:[%s780_s5] sm:$0xff] (%p1400_p12), %v832_v46  ;;  %835 = vst [vmem:[%s780_s5 + $0x10] sm:$0xff] (%p1400_p12), %v834_v47  ;;  %v848_v54 = vld [vmem:[%s1561_s25 + $0x40] sm:$0xff] (%p1400_p12) }
 0x18b   : > { %v836_v48 = vld [vmem:[%s1561_s25 + $0x10] sm:$0xff] (%p1400_p12)  ;;  %841 = vst [vmem:[%s780_s5 + $0x40] sm:$0xff] (%p1400_p12), %v840_v50  ;;  %843 = vst [vmem:[%s780_s5 + $0x50] sm:$0xff] (%p1400_p12), %v842_v51  ;;  %v850_v55 = vld [vmem:[%s1561_s25 + $0x48] sm:$0xff] (%p1400_p12) }
 0x18c   : > { %837 = vst [vmem:[%s780_s5 + $0x20] sm:$0xff] (%p1400_p12), %v836_v48  ;;  %847 = vst [vmem:[%s780_s5 + $0x70] sm:$0xff] (%p1400_p12), %v846_v53  ;;  %v856_v58 = vld [vmem:[%s1561_s25 + $0x60] sm:$0xff] (%p1400_p12) }
 0x18d   : > { %849 = vst [vmem:[%s780_s5 + $0x80] sm:$0xff] (%p1400_p12), %v848_v54  ;;  %851 = vst [vmem:[%s780_s5 + $0x90] sm:$0xff] (%p1400_p12), %v850_v55 }
 0x18e   : > { %v838_v49 = vld [vmem:[%s1561_s25 + $0x18] sm:$0xff] (%p1400_p12)  ;;  %v844_v52 = vld [vmem:[%s1561_s25 + $0x30] sm:$0xff] (%p1400_p12)  ;;  %855 = vst [vmem:[%s780_s5 + $0xb0] sm:$0xff] (%p1400_p12), %v854_v57  ;;  %857 = vst [vmem:[%s780_s5 + $0xc0] sm:$0xff] (%p1400_p12), %v856_v58 }
 0x18f   : > { %839 = vst [vmem:[%s780_s5 + $0x30] sm:$0xff] %v838_v49  ;;  %845 = vst [vmem:[%s780_s5 + $0x60] sm:$0xff] %v844_v52  ;;  %v852_v56 = vld [vmem:[%s1561_s25 + $0x50] sm:$0xff] }
 0x190   : > { %853 = vst [vmem:[%s780_s5 + $0xa0] sm:$0xff] %v852_v56 }
 0x191 PF: > { %s13_s22 = sadd.s32 1, %s1283_s22   ;;  %s1706_s10 = sld [smem:[#allocation6_spill]] }
 0x192   : > { %p10_p6 = scmp.ge.s32.totalorder %s13_s22, 16   ;;  %s1707_s12 = smov %s1247_s13 }
 0x193   : > { %s1708_s13 = smov %s1398_s9  ;;  %s1709_s14 = smov %s1255_s15 }
 0x194   : > { %s1710_s15 = smov %s1395_s8  ;;  %s1711_s16 = smov %s1263_s17 }
 0x195   : > { %s1712_s17 = smov %s1381_s30  ;;  %s1713_s18 = smov %s1275_s20 }
 0x196   : > { %s1714_s19 = smov %s1279_s21  ;;  %s1715_s20 = smov %s1718_s24 }
 0x197   : > { %s1716_s21 = smov %s1706_s10  ;;  %12 = sbr.rel (!%p10_p6) target bundleno = 9 (0x9), region = 185 }

// kernel: alexnet_forward.10
= control target key start
LH: loop header
LB: loop body
LE: loop exit
PB: predicated region body
PF: predicated region fallthrough
CT: control target
= control target key end

     0   :  { %vm105_vm0 = vcmask 523264   ;;  %s311_s0 = inlined_call_operand.vmem [shape: f32[9,8,576], index: 0, kind: input, shape index: {}]   ;;  %s312_s1 = inlined_call_operand.vmem [shape: f32[8,576], index: 1, kind: output, shape index: {}]  }
   0x1   :  { %v8_v0 = vld [vmem:[%s311_s0] sm:$0xff]  ;;  %v111_v1 = vld [vmem:[%s311_s0 + $0x28] sm:$0xff]  ;;  %v116_v2 = vld [vmem:[%s311_s0 + $0x50] sm:$0xff] }
   0x2   :  { %v19_v3 = vmax.f32 %v8_v0, %v111_v1  ;;  %v121_v4 = vld [vmem:[%s311_s0 + $0x78] sm:$0xff]  ;;  %v9_v6 = vld [vmem:[%s311_s0 + $0x8] sm:$0xff]  ;;  %v112_v7 = vld [vmem:[%s311_s0 + $0x30] sm:$0xff] }
   0x3   :  { %v117_v8 = vld [vmem:[%s311_s0 + $0x58] sm:$0xff]  ;;  %v126_v9 = vld [vmem:[%s311_s0 + $0xa0] sm:$0xff]  ;;  %v20_v10 = vmax.f32 %v9_v6, %v112_v7  ;;  %v131_v12 = vld [vmem:[%s311_s0 + $0xc8] sm:$0xff] }
   0x4   :  { %v30_v5 = vmax.f32 %v19_v3, %v116_v2  ;;  %v122_v13 = vld [vmem:[%s311_s0 + $0x80] sm:$0xff]  ;;  %v10_v15 = vld [vmem:[%s311_s0 + $0x10] sm:$0xff]  ;;  %v113_v16 = vld [vmem:[%s311_s0 + $0x38] sm:$0xff] }
   0x5   :  { %v31_v14 = vmax.f32 %v20_v10, %v117_v8  ;;  %v118_v17 = vld [vmem:[%s311_s0 + $0x60] sm:$0xff]  ;;  %v127_v19 = vld [vmem:[%s311_s0 + $0xa8] sm:$0xff]  ;;  %v21_v20 = vmax.f32 %v10_v15, %v113_v16  ;;  %v136_v21 = vld [vmem:[%s311_s0 + $0xf0] sm:$0xff] }
   0x6   :  { %v41_v11 = vmax.f32 %v30_v5, %v121_v4  ;;  %v132_v23 = vld [vmem:[%s311_s0 + $0xd0] sm:$0xff]  ;;  %v123_v24 = vld [vmem:[%s311_s0 + $0x88] sm:$0xff]  ;;  %v11_v27 = vld [vmem:[%s311_s0 + $0x18] sm:$0xff] }
   0x7   :  { %v42_v22 = vmax.f32 %v31_v14, %v122_v13  ;;  %v32_v26 = vmax.f32 %v21_v20, %v118_v17  ;;  %v114_v28 = vld [vmem:[%s311_s0 + $0x40] sm:$0xff]  ;;  %v119_v29 = vld [vmem:[%s311_s0 + $0x68] sm:$0xff]  ;;  %v141_v30 = vld [vmem:[%s311_s0 + $0x118] sm:$0xff] }
   0x8   :  { %v52_v18 = vmax.f32 %v41_v11, %v126_v9  ;;  %v146_v31 = vld [vmem:[%s311_s0 + $0x140] sm:$0xff]  ;;  %v128_v33 = vld [vmem:[%s311_s0 + $0xb0] sm:$0xff]  ;;  %v22_v34 = vmax.f32 %v11_v27, %v114_v28  ;;  %v137_v36 = vld [vmem:[%s311_s0 + $0xf8] sm:$0xff] }
   0x9   :  { %v53_v32 = vmax.f32 %v42_v22, %v127_v19  ;;  %v43_v37 = vmax.f32 %v32_v26, %v123_v24  ;;  %v133_v38 = vld [vmem:[%s311_s0 + $0xd8] sm:$0xff]  ;;  %v124_v39 = vld [vmem:[%s311_s0 + $0x90] sm:$0xff]  ;;  %v12_v42 = vld [vmem:[%s311_s0 + $0x20] sm:$0xff] }
   0xa   :  { %v63_v25 = vmax.f32 %v52_v18, %v131_v12  ;;  %v33_v41 = vmax.f32 %v22_v34, %v119_v29  ;;  %v115_v43 = vld [vmem:[%s311_s0 + $0x48] sm:$0xff]  ;;  %v120_v44 = vld [vmem:[%s311_s0 + $0x70] sm:$0xff]  ;;  %v142_v46 = vld [vmem:[%s311_s0 + $0x120] sm:$0xff] }
   0xb   :  { %v64_v40 = vmax.f32 %v53_v32, %v132_v23  ;;  %v54_v47 = vmax.f32 %v43_v37, %v128_v33  ;;  %v129_v48 = vld [vmem:[%s311_s0 + $0xb8] sm:$0xff]  ;;  %v23_v49 = vmax.f32 %v12_v42, %v115_v43  ;;  %v138_v51 = vld [vmem:[%s311_s0 + $0x100] sm:$0xff]  ;;  %v147_v55 = vld [vmem:[%s311_s0 + $0x148] sm:$0xff] }
   0xc   :  { %v74_v35 = vmax.f32 %v63_v25, %v136_v21  ;;  %v44_v52 = vmax.f32 %v33_v41, %v124_v39  ;;  %v125_v53 = vld [vmem:[%s311_s0 + $0x98] sm:$0xff]  ;;  %v134_v57 = vld [vmem:[%s311_s0 + $0xe0] sm:$0xff]  ;;  %v143_v60 = vld [vmem:[%s311_s0 + $0x128] sm:$0xff] }
   0xd   :  { %v75_v50 = vmax.f32 %v64_v40, %v137_v36  ;;  %v65_v56 = vmax.f32 %v54_v47, %v133_v38  ;;  %v34_v58 = vmax.f32 %v23_v49, %v120_v44  ;;  %v130_v62 = vld [vmem:[%s311_s0 + $0xc0] sm:$0xff]  ;;  %v139_v0 = vld [vmem:[%s311_s0 + $0x108] sm:$0xff]  ;;  %v148_v3 = vld [vmem:[%s311_s0 + $0x150] sm:$0xff] }
   0xe   :  { %v85_v45 = vmax.f32 %v74_v35, %v141_v30  ;;  %v55_v61 = vmax.f32 %v44_v52, %v129_v48  ;;  %v135_v5 = vld [vmem:[%s311_s0 + $0xe8] sm:$0xff]  ;;  %v144_v7 = vld [vmem:[%s311_s0 + $0x130] sm:$0xff]  ;;  %v149_v12 = vld [vmem:[%s311_s0 + $0x158] sm:$0xff] }
   0xf   :  { %v86_v59 = vmax.f32 %v75_v50, %v142_v46  ;;  %v76_v63 = vmax.f32 %v65_v56, %v138_v51  ;;  %v45_v1 = vmax.f32 %v34_v58, %v125_v53  ;;  %v140_v10 = vld [vmem:[%s311_s0 + $0x110] sm:$0xff]  ;;  %v145_v15 = vld [vmem:[%s311_s0 + $0x138] sm:$0xff]  ;;  %v150_v18 = vld [vmem:[%s311_s0 + $0x160] sm:$0xff] }
  0x10   :  { %v96_v54 = vmax.f32 %v85_v45, %v146_v31  ;;  %v66_v4 = vmax.f32 %v55_v61, %v134_v57 }
  0x11   :  { %v97_v2 = vmax.f32 %v86_v59, %v147_v55  ;;  %v87_v6 = vmax.f32 %v76_v63, %v143_v60  ;;  %v56_v8 = vmax.f32 %v45_v1, %v130_v62 }
  0x12   :  { %101 = vst [vmem:[%s312_s1] sm:$0xff] %v96_v54  ;;  %v77_v9 = vmax.f32 %v66_v4, %v139_v0 }
  0x13   :  { %102 = vst [vmem:[%s312_s1 + $0x8] sm:$0xff] %v97_v2  ;;  %v98_v11 = vmax.f32 %v87_v6, %v148_v3  ;;  %v67_v13 = vmax.f32 %v56_v8, %v135_v5 }
  0x14   :  { %v88_v14 = vmax.f32 %v77_v9, %v144_v7 }
  0x15   :  { %103 = vst [vmem:[%s312_s1 + $0x10] sm:$0xff] %v98_v11  ;;  %v78_v16 = vmax.f32 %v67_v13, %v140_v10 }
  0x16   :  { %v99_v17 = vmax.f32 %v88_v14, %v149_v12 }
  0x17   :  { %v89_v19 = vmax.f32 %v78_v16, %v145_v15 }
  0x18   :  { %104 = vst [vmem:[%s312_s1 + $0x18] sm:$0xff] %v99_v17 }
  0x19   :  { %v100_v20 = vmax.f32 %v89_v19, %v150_v18 }
  0x1b   :  { %106 = vst.msk [vmem:[%s312_s1 + $0x20] sm:$0xff] %vm105_vm0, %v100_v20 }

// kernel: alexnet_forward.11
= control target key start
LH: loop header
LB: loop body
LE: loop exit
PB: predicated region body
PF: predicated region fallthrough
CT: control target
= control target key end

     0   :  { %s1337_s0 = inlined_call_operand.vmem [shape: f32[24,1792], index: 0, kind: input, shape index: {}]   ;;  %s1338_s1 = inlined_call_operand.vmem [shape: f32[1792,384], index: 1, kind: input, shape index: {}]   ;;  %s1339_s2 = inlined_call_operand.vmem [shape: f32[1,384], index: 2, kind: input, shape index: {}]   ;;  %s1340_s3 = inlined_call_operand.vmem [shape: f32[24,384], index: 3, kind: output, shape index: {}]  }
   0x1   :  { %1342 = sst [smem:[#allocation7_spill]] %s1337_s0 }
   0x2   :  { %1343 = sst [smem:[#allocation8_spill]] %s1338_s1 }
   0x3   :  { %s1046_s12 = smov 0   ;;  %s1048_s13 = smov 0  }
   0x4   :  { %s1050_s14 = smov 0   ;;  %s1052_s15 = smov 0  }
   0x5   :  { %s1054_s16 = smov 0   ;;  %s1056_s17 = smov 0  }
   0x6   :  { %s1058_s18 = smov 0   ;;  %s1060_s19 = smov 0  }
   0x7   :  { %s1062_s20 = smov 0   ;;  %s1064_s21 = smov 0  }
   0x8   :  { %s1066_s22 = smov 0  }
   0x9 LB: > { %s736_s23 = sadd.s32 4294967295, %s1023_s22   ;;  %s25_s24 = sadd.s32 1, %s1015_s20  ;;  %s1023_s22 = sphi %s1066_s22, %s13_s22   ;;  %s1019_s21 = sphi %s1064_s21, %s1360_s21   ;;  %s1015_s20 = sphi %s1062_s20, %s1359_s20   ;;  %s1011_s19 = sphi %s1060_s19, %s1358_s19   ;;  %s1007_s18 = sphi %s1058_s18, %s1357_s18   ;;  %s1003_s17 = sphi %s1056_s17, %s1356_s17   ;;  %s999_s16 = sphi %s1054_s16, %s1355_s16   ;;  %s995_s15 = sphi %s1052_s15, %s1354_s15   ;;  %s991_s14 = sphi %s1050_s14, %s1353_s14   ;;  %s987_s13 = sphi %s1048_s13, %s1352_s13   ;;  %s983_s12 = sphi %s1046_s12, %s1351_s12  }
   0xa   : > { %p26_p0 = scmp.ge.s32.totalorder %s25_s24, 7  ;;  %s28_s25 = sadd.s32 1, %s1019_s21 }
   0xb   : > { %s41_s26 = sadd.s32 1, %s1003_s17  ;;  %p48_p1 = scmp.ne.s32.totalorder %s1003_s17, %s999_s16 }
   0xc   : > { %s1362_s24 = smov (%p26_p0, %s25_s24), 0  ;;  %s1364_s25 = smov (!%p26_p0, %s28_s25), %s1019_s21 }
   0xd   : > { %s37_s27 = ssub.s32 %s1015_s20, %s1362_s24  ;;  %p49_p2 = scmp.eq.s32.totalorder %s1023_s22, 0 }
   0xe   : > { %p30_p3 = scmp.ge.s32.totalorder %s1364_s25, 3  ;;  %p39_p4 = scmp.eq.s32.totalorder %s37_s27, 0 }
   0xf   : > { %p1113_p5 = por %p49_p2, %p48_p1  ;;  %s69_s29 = sadd.s32 1, %s995_s15 }
  0x10   : > { %s1366_s25 = smov (%p30_p3, %s1364_s25), 0  ;;  %p76_p6 = scmp.ne.s32.totalorder %s995_s15, %s991_s14 }
  0x11   : > { %1345 = sst [smem:[#allocation6_spill]] %s1366_s25  ;;  %s65_s4 = ssub.s32 %s1019_s21, %s1366_s25 }
  0x12   : > { %s1121_s30 = scalar_select %p39_p4, %s1003_s17, %s41_s26  }
  0x13   : > { %s66_s5 = sor.u32 %s65_s4, %s37_s27  ;;  %p121_p7 = scmp.eq.s32.totalorder %s65_s4, 0 }
  0x14   : > { %p67_p8 = scmp.eq.s32.totalorder %s66_s5, 0  ;;  %p1127_p9 = por %p76_p6, %p49_p2 }
  0x15   : > { %s123_s7 = sadd.s32 1, %s987_s13  ;;  %p133_p10 = scmp.ne.s32.totalorder %s987_s13, %s983_s12 }
  0x16   : > { %s1135_s8 = scalar_select %p67_p8, %s995_s15, %s69_s29  }
  0x17   : > { %s1138_s9 = scalar_select %p121_p7, %s987_s13, %s123_s7  }
  0x18   : > { %p134_p11 = scmp.eq.s32.totalorder %s736_s23, 20  ;;  %p739_p13 = scmp.ge.s32.totalorder %s1023_s22, 21 }
  0x1a   : > { %p1140_p12 = por %p134_p11, %p133_p10  ;;  %156 = sbr.rel (%p739_p13) target bundleno = 73 (0x49), region = 16 }
  0x21   : > { %159 = sbr.rel (!%p1113_p5) target bundleno = 47 (0x2f), region = 20  ;;  %s161_s11 = sand.u32 (%p1113_p5), 1, %s1003_s17  }
  0x22   : > { %s754_s26 = sshll.u32 (%p1113_p5), %s1015_s20, 4  ;;  %s844_s27 = smul.u32 (%p1113_p5), 48, %s161_s11 }
  0x23   : > { %s1348_s0 = sld [smem:[#allocation7_spill]] (%p1113_p5) }
  0x24   : > { %s163_s23 = scalar_lea.vmem (%p1113_p5), [#allocation3], %s844_s27 }
  0x29   : > { %s169_s5 = scalar_lea.vmem %s1348_s0, %s754_s26 }
  0x2a   : > { %v182_v0 = vld [vmem:[%s169_s5] sm:$0xff]  ;;  %v184_v1 = vld [vmem:[%s169_s5 + $0x8] sm:$0xff]  ;;  %v186_v2 = vld [vmem:[%s169_s5 + $0x70] sm:$0xff] }
  0x2b   : > { %v188_v3 = vld [vmem:[%s169_s5 + $0x78] sm:$0xff]  ;;  %v190_v4 = vld [vmem:[%s169_s5 + $0xe0] sm:$0xff]  ;;  %v192_v5 = vld [vmem:[%s169_s5 + $0xe8] sm:$0xff]  ;;  %183 = vst [vmem:[%s163_s23] sm:$0xff] %v182_v0 }
  0x2c   : > { %185 = vst [vmem:[%s163_s23 + $0x8] sm:$0xff] %v184_v1  ;;  %187 = vst [vmem:[%s163_s23 + $0x10] sm:$0xff] %v186_v2 }
  0x2d   : > { %189 = vst [vmem:[%s163_s23 + $0x18] sm:$0xff] %v188_v3  ;;  %191 = vst [vmem:[%s163_s23 + $0x20] sm:$0xff] %v190_v4 }
  0x2e   : > { %193 = vst [vmem:[%s163_s23 + $0x28] sm:$0xff] %v192_v5 }
  0x2f PF: > { %199 = sbr.rel (!%p1127_p9) target bundleno = 73 (0x49), region = 43  ;;  %s201_s28 = sand.u32 (%p1127_p9), 1, %s995_s15  }
  0x30   : > { %s845_s7 = smul.u32 (%p1127_p9), 96, %s1015_s20  ;;  %s742_s11 = sshll.u32 (%p1127_p9), %s201_s28, 8 }
  0x31   : > { %s1349_s1 = sld [smem:[#allocation8_spill]] (%p1127_p9)  ;;  %s1165_s6 = scalar_lea.vmem (%p1127_p9), [#allocation4], %s742_s11 }
  0x32   : > { %s206_s26 = sadd.s32 (%p1127_p9), %s1019_s21, %s845_s7 }
  0x33   : > { %s745_s29 = sshll.u32 (%p1127_p9), %s206_s26, 3 }
  0x37   : > { %s1160_s5 = scalar_lea.vmem %s1349_s1, %s745_s29 }
  0x38   : > { %v298_v6 = vld [vmem:[%s1160_s5] sm:$0xff]  ;;  %v300_v7 = vld [vmem:[%s1160_s5 + $0x18] sm:$0xff]  ;;  %v302_v8 = vld [vmem:[%s1160_s5 + $0x30] sm:$0xff] }
  0x39   : > { %299 = vst [vmem:[%s1165_s6] sm:$0xff] %v298_v6  ;;  %301 = vst [vmem:[%s1165_s6 + $0x8] sm:$0xff] %v300_v7  ;;  %v304_v9 = vld [vmem:[%s1160_s5 + $0x48] sm:$0xff]  ;;  %v306_v10 = vld [vmem:[%s1160_s5 + $0x60] sm:$0xff] }
  0x3a   : > { %303 = vst [vmem:[%s1165_s6 + $0x10] sm:$0xff] %v302_v8  ;;  %v308_v11 = vld [vmem:[%s1160_s5 + $0x78] sm:$0xff]  ;;  %305 = vst [vmem:[%s1165_s6 + $0x18] sm:$0xff] %v304_v9  ;;  %v310_v12 = vld [vmem:[%s1160_s5 + $0x90] sm:$0xff] }
  0x3b   : > { %307 = vst [vmem:[%s1165_s6 + $0x20] sm:$0xff] %v306_v10  ;;  %309 = vst [vmem:[%s1165_s6 + $0x28] sm:$0xff] %v308_v11  ;;  %v312_v13 = vld [vmem:[%s1160_s5 + $0xa8] sm:$0xff]  ;;  %v314_v14 = vld [vmem:[%s1160_s5 + $0xc0] sm:$0xff] }
  0x3c   : > { %311 = vst [vmem:[%s1165_s6 + $0x30] sm:$0xff] %v310_v12  ;;  %313 = vst [vmem:[%s1165_s6 + $0x38] sm:$0xff] %v312_v13  ;;  %v316_v15 = vld [vmem:[%s1160_s5 + $0xd8] sm:$0xff]  ;;  %v318_v16 = vld [vmem:[%s1160_s5 + $0xf0] sm:$0xff] }
  0x3d   : > { %315 = vst [vmem:[%s1165_s6 + $0x40] sm:$0xff] %v314_v14  ;;  %v320_v17 = vld [vmem:[%s1160_s5 + $0x108] sm:$0xff]  ;;  %317 = vst [vmem:[%s1165_s6 + $0x48] sm:$0xff] %v316_v15  ;;  %v322_v18 = vld [vmem:[%s1160_s5 + $0x120] sm:$0xff] }
  0x3e   : > { %319 = vst [vmem:[%s1165_s6 + $0x50] sm:$0xff] %v318_v16  ;;  %321 = vst [vmem:[%s1165_s6 + $0x58] sm:$0xff] %v320_v17  ;;  %v324_v19 = vld [vmem:[%s1160_s5 + $0x138] sm:$0xff]  ;;  %v326_v20 = vld [vmem:[%s1160_s5 + $0x150] sm:$0xff] }
  0x3f   : > { %323 = vst [vmem:[%s1165_s6 + $0x60] sm:$0xff] %v322_v18  ;;  %325 = vst [vmem:[%s1165_s6 + $0x68] sm:$0xff] %v324_v19  ;;  %v328_v21 = vld [vmem:[%s1160_s5 + $0x168] sm:$0xff]  ;;  %v330_v22 = vld [vmem:[%s1160_s5 + $0x180] sm:$0xff] }
  0x40   : > { %327 = vst [vmem:[%s1165_s6 + $0x70] sm:$0xff] %v326_v20  ;;  %v332_v23 = vld [vmem:[%s1160_s5 + $0x198] sm:$0xff]  ;;  %329 = vst [vmem:[%s1165_s6 + $0x78] sm:$0xff] %v328_v21  ;;  %v334_v24 = vld [vmem:[%s1160_s5 + $0x1b0] sm:$0xff] }
  0x41   : > { %331 = vst [vmem:[%s1165_s6 + $0x80] sm:$0xff] %v330_v22  ;;  %333 = vst [vmem:[%s1165_s6 + $0x88] sm:$0xff] %v332_v23  ;;  %v336_v25 = vld [vmem:[%s1160_s5 + $0x1c8] sm:$0xff]  ;;  %v338_v26 = vld [vmem:[%s1160_s5 + $0x1e0] sm:$0xff] }
  0x42   : > { %335 = vst [vmem:[%s1165_s6 + $0x90] sm:$0xff] %v334_v24  ;;  %337 = vst [vmem:[%s1165_s6 + $0x98] sm:$0xff] %v336_v25  ;;  %v340_v27 = vld [vmem:[%s1160_s5 + $0x1f8] sm:$0xff]  ;;  %v342_v28 = vld [vmem:[%s1160_s5 + $0x210] sm:$0xff] }
  0x43   : > { %339 = vst [vmem:[%s1165_s6 + $0xa0] sm:$0xff] %v338_v26  ;;  %v344_v29 = vld [vmem:[%s1160_s5 + $0x228] sm:$0xff]  ;;  %341 = vst [vmem:[%s1165_s6 + $0xa8] sm:$0xff] %v340_v27  ;;  %v346_v30 = vld [vmem:[%s1160_s5 + $0x240] sm:$0xff] }
  0x44   : > { %343 = vst [vmem:[%s1165_s6 + $0xb0] sm:$0xff] %v342_v28  ;;  %345 = vst [vmem:[%s1165_s6 + $0xb8] sm:$0xff] %v344_v29  ;;  %v348_v31 = vld [vmem:[%s1160_s5 + $0x258] sm:$0xff]  ;;  %v350_v32 = vld [vmem:[%s1160_s5 + $0x270] sm:$0xff] }
  0x45   : > { %347 = vst [vmem:[%s1165_s6 + $0xc0] sm:$0xff] %v346_v30  ;;  %349 = vst [vmem:[%s1165_s6 + $0xc8] sm:$0xff] %v348_v31  ;;  %v352_v33 = vld [vmem:[%s1160_s5 + $0x288] sm:$0xff]  ;;  %v354_v34 = vld [vmem:[%s1160_s5 + $0x2a0] sm:$0xff] }
  0x46   : > { %351 = vst [vmem:[%s1165_s6 + $0xd0] sm:$0xff] %v350_v32  ;;  %v356_v35 = vld [vmem:[%s1160_s5 + $0x2b8] sm:$0xff]  ;;  %353 = vst [vmem:[%s1165_s6 + $0xd8] sm:$0xff] %v352_v33  ;;  %v358_v36 = vld [vmem:[%s1160_s5 + $0x2d0] sm:$0xff] }
  0x47   : > { %355 = vst [vmem:[%s1165_s6 + $0xe0] sm:$0xff] %v354_v34  ;;  %357 = vst [vmem:[%s1165_s6 + $0xe8] sm:$0xff] %v356_v35  ;;  %v360_v37 = vld [vmem:[%s1160_s5 + $0x2e8] sm:$0xff] }
  0x48   : > { %359 = vst [vmem:[%s1165_s6 + $0xf0] sm:$0xff] %v358_v36  ;;  %361 = vst [vmem:[%s1165_s6 + $0xf8] sm:$0xff] %v360_v37 }
  0x49 PF: > { %p746_p0 = scmp.ge.s32.totalorder %s1023_s22, 1  ;;  %p372_p1 = scmp.lt.s32.totalorder %s1023_s22, 22 }
  0x4b   : > { %p373_p2 = pnand %p746_p0, %p372_p1 }
  0x4c   : > { %s379_s23 = sand.u32 (!%p373_p2), 1, %s999_s16   ;;  %s386_s28 = sand.u32 (!%p373_p2), 1, %s991_s14  }
  0x4d   : > { %376 = sbr.rel (%p373_p2) target bundleno = 369 (0x171), region = 85  ;;  %s747_s11 = sshll.u32 (!%p373_p2), %s386_s28, 8 }
  0x4e   : > { %s846_s7 = smul.u32 (!%p373_p2), 48, %s379_s23  ;;  %s412_s26 = sand.u32 (!%p373_p2), 1, %s983_s12  }
  0x4f   : > { %s847_s29 = smul.u32 (!%p373_p2), 24, %s412_s26  ;;  %p418_p3 = scmp.lt.s32.totalorder (!%p373_p2), %s1011_s19, 2 }
  0x50   : > { %s1241_s0 = scalar_lea.vmem (!%p373_p2), [#allocation3], %s846_s7  ;;  %s1243_s1 = scalar_lea.vmem (!%p373_p2), [#allocation4], %s747_s11 }
  0x51   : > { %s1245_s25 = scalar_lea.vmem (!%p373_p2), [#allocation5], %s847_s29  ;;  %p748_p4 = scmp.ne.s32.totalorder (!%p373_p2), %s1007_s18, 0 }
  0x54   : > { %s1235_s4 = scalar_select %p418_p3, %s1011_s19, 2 }
  0x55   : > { %425 = sbr.rel (%p748_p4) target bundleno = 92 (0x5c), region = 97  ;;  %v1025_v38 = vmov (!%p748_p4), 0.0  }
  0x56   : > { %s420_s6 = scalar_lea.vmem %s1339_s2, %s1235_s4  ;;  %426 = vst [vmem:[#allocation2] sm:$0xff] (!%p748_p4), %v1025_v38  ;;  %427 = vst [vmem:[#allocation2 + $0x8] sm:$0xff] (!%p748_p4), %v1025_v38 }
  0x57   : > { %428 = vst [vmem:[#allocation2 + $0x10] sm:$0xff] (!%p748_p4), %v1025_v38 }
  0x5c PF: > { %v454_v39 = vld [vmem:[%s1243_s1 + $0x80] sm:$0xff]  ;;  %v455_v40 = vld [vmem:[%s1243_s1 + $0x88] sm:$0xff]  ;;  %v456_v44 = vld [vmem:[%s1243_s1 + $0x90] sm:$0xff]  ;;  %p749_p5 = scmp.ne.s32.totalorder %s1007_s18, 6 }
  0x5d   : > { %v438_v41 = vld [vmem:[%s1243_s1] sm:$0xff]  ;;  %v796_v42 = vpack.c.bf16 %v455_v40, %v454_v39  ;;  %v439_v43 = vld [vmem:[%s1243_s1 + $0x8] sm:$0xff]  ;;  %v457_v45 = vld [vmem:[%s1243_s1 + $0x98] sm:$0xff] }
  0x5e   : > { %v798_v46 = vpack.c.bf16 %v439_v43, %v438_v41  ;;  %v800_v47 = vpack.c.bf16 %v457_v45, %v456_v44  ;;  %v440_v48 = vld [vmem:[%s1243_s1 + $0x10] sm:$0xff]  ;;  %v441_v49 = vld [vmem:[%s1243_s1 + $0x18] sm:$0xff]  ;;  %v458_v50 = vld [vmem:[%s1243_s1 + $0xa0] sm:$0xff] }
  0x5f   : > { %828 = vmatprep.subr.bf16.mxu1 %v796_v42  ;;  %797 = vmatprep.subr.bf16.mxu0 %v796_v42  ;;  %v459_v51 = vld [vmem:[%s1243_s1 + $0xa8] sm:$0xff]  ;;  %v802_v52 = vpack.c.bf16 %v441_v49, %v440_v48  ;;  %v442_v54 = vld [vmem:[%s1243_s1 + $0x20] sm:$0xff]  ;;  %v460_v56 = vld [vmem:[%s1243_s1 + $0xb0] sm:$0xff] }
  0x60   : > { %836 = vmatpush3.bf16.msra.mxu1 %v798_v46  ;;  %799 = vmatpush3.bf16.msra.mxu0 %v798_v46  ;;  %v804_v53 = vpack.c.bf16 %v459_v51, %v458_v50  ;;  %v443_v55 = vld [vmem:[%s1243_s1 + $0x28] sm:$0xff]  ;;  %v461_v57 = vld [vmem:[%s1243_s1 + $0xb8] sm:$0xff]  ;;  %v444_v60 = vld [vmem:[%s1243_s1 + $0x30] sm:$0xff] }
  0x61   : > { %829 = vmatprep.subr.bf16.mxu1 %v800_v47  ;;  %801 = vmatprep.subr.bf16.mxu0 %v800_v47  ;;  %v806_v58 = vpack.c.bf16 %v443_v55, %v442_v54  ;;  %v808_v59 = vpack.c.bf16 %v461_v57, %v460_v56  ;;  %v445_v61 = vld [vmem:[%s1243_s1 + $0x38] sm:$0xff]  ;;  %v462_v62 = vld [vmem:[%s1243_s1 + $0xc0] sm:$0xff]  ;;  %v463_v63 = vld [vmem:[%s1243_s1 + $0xc8] sm:$0xff] }
  0x62   : > { %v435_v0 = vld [vmem:[%s1241_s0 + $0x18] sm:$0xff]  ;;  %v433_v1 = vld [vmem:[%s1241_s0 + $0x8] sm:$0xff]  ;;  %v810_v2 = vpack.c.bf16 %v445_v61, %v444_v60  ;;  %v812_v3 = vpack.c.bf16 %v463_v63, %v462_v62  ;;  %v446_v4 = vld [vmem:[%s1243_s1 + $0x40] sm:$0xff] }
  0x63   : > { %539 = vmatprep.mubr.f32.mxu1 %v435_v0  ;;  %v447_v5 = vld [vmem:[%s1243_s1 + $0x48] sm:$0xff]  ;;  %v464_v6 = vld [vmem:[%s1243_s1 + $0xd0] sm:$0xff]  ;;  %v465_v7 = vld [vmem:[%s1243_s1 + $0xd8] sm:$0xff]  ;;  %534 = vmatprep.mubr.f32.mxu0 %v433_v1 }
  0x64   : > { %837 = vmatpush3.bf16.msra.mxu1 %v802_v52  ;;  %803 = vmatpush3.bf16.msra.mxu0 %v802_v52  ;;  %v814_v8 = vpack.c.bf16 %v447_v5, %v446_v4  ;;  %v816_v9 = vpack.c.bf16 %v465_v7, %v464_v6  ;;  %v448_v10 = vld [vmem:[%s1243_s1 + $0x50] sm:$0xff]  ;;  %v449_v11 = vld [vmem:[%s1243_s1 + $0x58] sm:$0xff]  ;;  %v466_v12 = vld [vmem:[%s1243_s1 + $0xe0] sm:$0xff] }
  0x65   : > { %830 = vmatprep.subr.bf16.mxu1 %v804_v53  ;;  %805 = vmatprep.subr.bf16.mxu0 %v804_v53  ;;  %v467_v13 = vld [vmem:[%s1243_s1 + $0xe8] sm:$0xff]  ;;  %v818_v14 = vpack.c.bf16 %v449_v11, %v448_v10  ;;  %v450_v16 = vld [vmem:[%s1243_s1 + $0x60] sm:$0xff]  ;;  %v468_v18 = vld [vmem:[%s1243_s1 + $0xf0] sm:$0xff] }
  0x66   : > { %v820_v15 = vpack.c.bf16 %v467_v13, %v466_v12  ;;  %v451_v17 = vld [vmem:[%s1243_s1 + $0x68] sm:$0xff]  ;;  %v469_v19 = vld [vmem:[%s1243_s1 + $0xf8] sm:$0xff]  ;;  %v452_v22 = vld [vmem:[%s1243_s1 + $0x70] sm:$0xff] }
  0x67   : > { %v822_v20 = vpack.c.bf16 %v451_v17, %v450_v16  ;;  %v824_v21 = vpack.c.bf16 %v469_v19, %v468_v18  ;;  %v453_v23 = vld [vmem:[%s1243_s1 + $0x78] sm:$0xff]  ;;  %v434_v25 = vld [vmem:[%s1241_s0 + $0x10] sm:$0xff]  ;;  %v432_v26 = vld [vmem:[%s1241_s0] sm:$0xff] }
  0x68   : > { %838 = vmatpush3.bf16.msra.mxu1 %v806_v58  ;;  %807 = vmatpush3.bf16.msra.mxu0 %v806_v58  ;;  %v826_v24 = vpack.c.bf16 %v453_v23, %v452_v22  ;;  %v437_v27 = vld [vmem:[%s1241_s0 + $0x28] sm:$0xff]  ;;  %v436_v28 = vld [vmem:[%s1241_s0 + $0x20] sm:$0xff] }
  0x69   : > { %831 = vmatprep.subr.bf16.mxu1 %v808_v59  ;;  %809 = vmatprep.subr.bf16.mxu0 %v808_v59  ;;  %v430_v31 = vld [vmem:[#allocation2 + $0x8] sm:$0xff]  ;;  %v429_v33 = vld [vmem:[#allocation2] sm:$0xff]  ;;  %v431_v40 = vld [vmem:[#allocation2 + $0x10] sm:$0xff] }
  0x6a   : > { %v750_v45 = vld [vmem:[%s420_s6] ss:$0 sm:$0xff] (!%p749_p5) }
  0x6c   : > { %839 = vmatpush3.bf16.msra.mxu1 %v810_v2  ;;  %811 = vmatpush3.bf16.msra.mxu0 %v810_v2 }
  0x6d   : > { %832 = vmatprep.subr.bf16.mxu1 %v812_v3  ;;  %813 = vmatprep.subr.bf16.mxu0 %v812_v3 }
  0x70   : > { %840 = vmatpush3.bf16.msra.mxu1 %v814_v8  ;;  %815 = vmatpush3.bf16.msra.mxu0 %v814_v8 }
  0x71   : > { %833 = vmatprep.subr.bf16.mxu1 %v816_v9  ;;  %817 = vmatprep.subr.bf16.mxu0 %v816_v9 }
  0x74   : > { %841 = vmatpush3.bf16.msra.mxu1 %v818_v14  ;;  %819 = vmatpush3.bf16.msra.mxu0 %v818_v14 }
  0x75   : > { %834 = vmatprep.subr.bf16.mxu1 %v820_v15  ;;  %821 = vmatprep.subr.bf16.mxu0 %v820_v15 }
  0x78   : > { %842 = vmatpush3.bf16.msra.mxu1 %v822_v20  ;;  %823 = vmatpush3.bf16.msra.mxu0 %v822_v20 }
  0x79   : > { %835 = vmatprep.subr.bf16.mxu1 %v824_v21  ;;  %825 = vmatprep.subr.bf16.mxu0 %v824_v21 }
  0x7c   : > { %843 = vmatpush3.bf16.msra.mxu1 %v826_v24  ;;  %827 = vmatpush3.bf16.msra.mxu0 %v826_v24 }
  0x7f   : > { %540 = vmatmul.mubr.f32.vlgmr.msra.gmra.mrb[0].mxu1 %v434_v25  ;;  %535 = vmatmul.mubr.f32.vlgmr.msra.gmra.mrb[0].mxu0 %v432_v26 }
  0x80   : > { %544 = vmatprep.mubr.f32.mxu1 %v437_v27 }
  0x83   : > { %545 = vmatmul.mubr.f32.gmra.mrb[2].mxu1 %v436_v28 }
 0x152   : > { %v790_v29 = vpop.f32.mrb[0].mxu1  ;;  %v787_v30 = vpop.f32.mrb[0].mxu0 }
 0x153   : > { %v791_v32 = vpop.f32.mrb[1].mxu1  ;;  %v788_v34 = vpop.f32.mrb[1].mxu0 }
 0x154   : > { %v792_v35 = vadd.f32 %v791_v32, %v790_v29  ;;  %v789_v36 = vadd.f32 %v788_v34, %v787_v30 }
 0x156   : > { %v551_v37 = vadd.f32 %v792_v35, %v430_v31  ;;  %v550_v38 = vadd.f32 %v789_v36, %v429_v33  ;;  %v793_v39 = vpop.f32.mrb[2].mxu1  ;;  %559 = sbr.rel (%p749_p5) target bundleno = 361 (0x169), region = 101 }
 0x157   : > { %v794_v41 = vpop.f32.mrb[3].mxu1 }
 0x158   : > { %554 = vst [vmem:[#allocation2 + $0x8] sm:$0xff] %v551_v37  ;;  %553 = vst [vmem:[#allocation2] sm:$0xff] %v550_v38  ;;  %v795_v42 = vadd.f32 %v794_v41, %v793_v39 }
 0x15a   : > { %v552_v43 = vadd.f32 %v795_v42, %v431_v40 }
 0x15c   : > { %555 = vst [vmem:[#allocation2 + $0x10] sm:$0xff] %v552_v43 }
 0x15f   : > { %v560_v44 = vld [vmem:[#allocation2] sm:$0xff]  ;;  %v561_v46 = vld [vmem:[#allocation2 + $0x8] sm:$0xff] }
 0x160   : > { %v570_v47 = vadd.f32 %v750_v45, %v560_v44  ;;  %v571_v48 = vadd.f32 %v750_v45, %v561_v46 }
 0x162   : > { %v573_v51 = vmax.f32 %v570_v47, 0.0  ;;  %v574_v52 = vmax.f32 %v571_v48, 0.0 }
 0x163   : > { %v562_v49 = vld [vmem:[#allocation2 + $0x10] sm:$0xff] }
 0x164   : > { %v572_v50 = vadd.f32 %v750_v45, %v562_v49  ;;  %576 = vst [vmem:[%s1245_s25] sm:$0xff] %v573_v51  ;;  %577 = vst [vmem:[%s1245_s25 + $0x8] sm:$0xff] %v574_v52 }
 0x166   : > { %v575_v53 = vmax.f32 %v572_v50, 0.0 }
 0x168   : > { %578 = vst [vmem:[%s1245_s25 + $0x10] sm:$0xff] %v575_v53 }
 0x169 PF: > { %585 = sbr.rel (!%p1140_p12) target bundleno = 369 (0x171), region = 105  ;;  %s751_s12 = sshll.u32 (%p1140_p12), %s1011_s19, 3 }
 0x16a   : > { %s590_s18 = scalar_lea.vmem (%p1140_p12), %s1340_s3, %s751_s12 }
 0x16b   : > { %v622_v54 = vld [vmem:[%s1245_s25] sm:$0xff] (%p1140_p12)  ;;  %v624_v55 = vld [vmem:[%s1245_s25 + $0x8] sm:$0xff] (%p1140_p12) }
 0x16c   : > { %623 = vst [vmem:[%s590_s18] sm:$0xff] (%p1140_p12), %v622_v54  ;;  %625 = vst [vmem:[%s590_s18 + $0x18] sm:$0xff] (%p1140_p12), %v624_v55 }
 0x16f   : > { %v626_v56 = vld [vmem:[%s1245_s25 + $0x10] sm:$0xff] (%p1140_p12) }
 0x170   : > { %627 = vst [vmem:[%s590_s18 + $0x30] sm:$0xff] %v626_v56 }
 0x171 PF: > { %s13_s22 = sadd.s32 1, %s1023_s22   ;;  %s1350_s25 = sld [smem:[#allocation6_spill]] }
 0x172   : > { %p10_p6 = scmp.ge.s32.totalorder %s13_s22, 23   ;;  %s1351_s12 = smov %s987_s13 }
 0x173   : > { %s1352_s13 = smov %s1138_s9  ;;  %s1353_s14 = smov %s995_s15 }
 0x174   : > { %s1354_s15 = smov %s1135_s8  ;;  %s1355_s16 = smov %s1003_s17 }
 0x175   : > { %s1356_s17 = smov %s1121_s30  ;;  %s1357_s18 = smov %s1015_s20 }
 0x176   : > { %s1358_s19 = smov %s1019_s21  ;;  %s1359_s20 = smov %s1362_s24 }
 0x177   : > { %s1360_s21 = smov %s1350_s25  ;;  %12 = sbr.rel (!%p10_p6) target bundleno = 9 (0x9), region = 185 }

// kernel: alexnet_forward.12
= control target key start
LH: loop header
LB: loop body
LE: loop exit
PB: predicated region body
PF: predicated region fallthrough
CT: control target
= control target key end

     0   :  { %s1337_s0 = inlined_call_operand.vmem [shape: f32[24,3584], index: 0, kind: input, shape index: {}]   ;;  %s1338_s1 = inlined_call_operand.vmem [shape: f32[3584,256], index: 1, kind: input, shape index: {}]   ;;  %s1339_s2 = inlined_call_operand.vmem [shape: f32[1,256], index: 2, kind: input, shape index: {}]   ;;  %s1340_s3 = inlined_call_operand.vmem [shape: f32[24,256], index: 3, kind: output, shape index: {}]  }
   0x1   :  { %1342 = sst [smem:[#allocation7_spill]] %s1337_s0 }
   0x2   :  { %1343 = sst [smem:[#allocation8_spill]] %s1338_s1 }
   0x3   :  { %s1046_s12 = smov 0   ;;  %s1048_s13 = smov 0  }
   0x4   :  { %s1050_s14 = smov 0   ;;  %s1052_s15 = smov 0  }
   0x5   :  { %s1054_s16 = smov 0   ;;  %s1056_s17 = smov 0  }
   0x6   :  { %s1058_s18 = smov 0   ;;  %s1060_s19 = smov 0  }
   0x7   :  { %s1062_s20 = smov 0   ;;  %s1064_s21 = smov 0  }
   0x8   :  { %s1066_s22 = smov 0  }
   0x9 LB: > { %s736_s23 = sadd.s32 4294967295, %s1023_s22   ;;  %s25_s24 = sadd.s32 1, %s1015_s20  ;;  %s1023_s22 = sphi %s1066_s22, %s13_s22   ;;  %s1019_s21 = sphi %s1064_s21, %s1360_s21   ;;  %s1015_s20 = sphi %s1062_s20, %s1359_s20   ;;  %s1011_s19 = sphi %s1060_s19, %s1358_s19   ;;  %s1007_s18 = sphi %s1058_s18, %s1357_s18   ;;  %s1003_s17 = sphi %s1056_s17, %s1356_s17   ;;  %s999_s16 = sphi %s1054_s16, %s1355_s16   ;;  %s995_s15 = sphi %s1052_s15, %s1354_s15   ;;  %s991_s14 = sphi %s1050_s14, %s1353_s14   ;;  %s987_s13 = sphi %s1048_s13, %s1352_s13   ;;  %s983_s12 = sphi %s1046_s12, %s1351_s12  }
   0xa   : > { %p26_p0 = scmp.ge.s32.totalorder %s25_s24, 14  ;;  %s28_s25 = sadd.s32 1, %s1019_s21 }
   0xb   : > { %s41_s26 = sadd.s32 1, %s1003_s17  ;;  %p48_p1 = scmp.ne.s32.totalorder %s1003_s17, %s999_s16 }
   0xc   : > { %s1362_s24 = smov (%p26_p0, %s25_s24), 0  ;;  %s1364_s25 = smov (!%p26_p0, %s28_s25), %s1019_s21 }
   0xd   : > { %s37_s27 = ssub.s32 %s1015_s20, %s1362_s24  ;;  %p49_p2 = scmp.eq.s32.totalorder %s1023_s22, 0 }
   0xe   : > { %p30_p3 = scmp.ge.s32.totalorder %s1364_s25, 2  ;;  %p39_p4 = scmp.eq.s32.totalorder %s37_s27, 0 }
   0xf   : > { %p1113_p5 = por %p49_p2, %p48_p1  ;;  %s69_s29 = sadd.s32 1, %s995_s15 }
  0x10   : > { %s1366_s25 = smov (%p30_p3, %s1364_s25), 0  ;;  %p76_p6 = scmp.ne.s32.totalorder %s995_s15, %s991_s14 }
  0x11   : > { %1345 = sst [smem:[#allocation6_spill]] %s1366_s25  ;;  %s65_s4 = ssub.s32 %s1019_s21, %s1366_s25 }
  0x12   : > { %s1121_s30 = scalar_select %p39_p4, %s1003_s17, %s41_s26  }
  0x13   : > { %s66_s5 = sor.u32 %s65_s4, %s37_s27  ;;  %p121_p7 = scmp.eq.s32.totalorder %s65_s4, 0 }
  0x14   : > { %p67_p8 = scmp.eq.s32.totalorder %s66_s5, 0  ;;  %p1127_p9 = por %p76_p6, %p49_p2 }
  0x15   : > { %s123_s7 = sadd.s32 1, %s987_s13  ;;  %p133_p10 = scmp.ne.s32.totalorder %s987_s13, %s983_s12 }
  0x16   : > { %s1135_s8 = scalar_select %p67_p8, %s995_s15, %s69_s29  }
  0x17   : > { %s1138_s9 = scalar_select %p121_p7, %s987_s13, %s123_s7  }
  0x18   : > { %p134_p11 = scmp.eq.s32.totalorder %s736_s23, 27  ;;  %p739_p13 = scmp.ge.s32.totalorder %s1023_s22, 28 }
  0x1a   : > { %p1140_p12 = por %p134_p11, %p133_p10  ;;  %156 = sbr.rel (%p739_p13) target bundleno = 72 (0x48), region = 16 }
  0x21   : > { %159 = sbr.rel (!%p1113_p5) target bundleno = 46 (0x2e), region = 20  ;;  %s161_s11 = sand.u32 (%p1113_p5), 1, %s1003_s17  }
  0x22   : > { %s754_s26 = sshll.u32 (%p1113_p5), %s1015_s20, 4  ;;  %s845_s27 = smul.u32 (%p1113_p5), 48, %s161_s11 }
  0x23   : > { %s1348_s0 = sld [smem:[#allocation7_spill]] (%p1113_p5) }
  0x24   : > { %s163_s23 = scalar_lea.vmem (%p1113_p5), [#allocation3], %s845_s27 }
  0x29   : > { %s169_s5 = scalar_lea.vmem %s1348_s0, %s754_s26 }
  0x2a   : > { %v182_v0 = vld [vmem:[%s169_s5] sm:$0xff]  ;;  %v184_v1 = vld [vmem:[%s169_s5 + $0x8] sm:$0xff] }
  0x2b   : > { %v186_v2 = vld [vmem:[%s169_s5 + $0xe0] sm:$0xff]  ;;  %v188_v3 = vld [vmem:[%s169_s5 + $0xe8] sm:$0xff]  ;;  %183 = vst [vmem:[%s163_s23] sm:$0xff] %v182_v0  ;;  %185 = vst [vmem:[%s163_s23 + $0x8] sm:$0xff] %v184_v1 }
  0x2c   : > { %v190_v4 = vld [vmem:[%s169_s5 + $0x1c0] sm:$0xff]  ;;  %v192_v5 = vld [vmem:[%s169_s5 + $0x1c8] sm:$0xff]  ;;  %187 = vst [vmem:[%s163_s23 + $0x10] sm:$0xff] %v186_v2  ;;  %189 = vst [vmem:[%s163_s23 + $0x18] sm:$0xff] %v188_v3 }
  0x2d   : > { %191 = vst [vmem:[%s163_s23 + $0x20] sm:$0xff] %v190_v4  ;;  %193 = vst [vmem:[%s163_s23 + $0x28] sm:$0xff] %v192_v5 }
  0x2e PF: > { %199 = sbr.rel (!%p1127_p9) target bundleno = 72 (0x48), region = 43  ;;  %s201_s28 = sand.u32 (%p1127_p9), 1, %s995_s15  }
  0x2f   : > { %s755_s7 = sshll.u32 (%p1127_p9), %s1015_s20, 6  ;;  %s742_s11 = sshll.u32 (%p1127_p9), %s201_s28, 8 }
  0x30   : > { %s206_s26 = sadd.s32 (%p1127_p9), %s1019_s21, %s755_s7  ;;  %s1349_s1 = sld [smem:[#allocation8_spill]] (%p1127_p9) }
  0x31   : > { %s745_s29 = sshll.u32 (%p1127_p9), %s206_s26, 3  ;;  %s1165_s6 = scalar_lea.vmem (%p1127_p9), [#allocation4], %s742_s11 }
  0x36   : > { %s1160_s5 = scalar_lea.vmem %s1349_s1, %s745_s29 }
  0x37   : > { %v298_v6 = vld [vmem:[%s1160_s5] sm:$0xff]  ;;  %v300_v7 = vld [vmem:[%s1160_s5 + $0x10] sm:$0xff] }
  0x38   : > { %v302_v8 = vld [vmem:[%s1160_s5 + $0x20] sm:$0xff]  ;;  %299 = vst [vmem:[%s1165_s6] sm:$0xff] %v298_v6  ;;  %301 = vst [vmem:[%s1165_s6 + $0x8] sm:$0xff] %v300_v7  ;;  %v304_v9 = vld [vmem:[%s1160_s5 + $0x30] sm:$0xff] }
  0x39   : > { %303 = vst [vmem:[%s1165_s6 + $0x10] sm:$0xff] %v302_v8  ;;  %v306_v10 = vld [vmem:[%s1160_s5 + $0x40] sm:$0xff]  ;;  %v308_v11 = vld [vmem:[%s1160_s5 + $0x50] sm:$0xff]  ;;  %305 = vst [vmem:[%s1165_s6 + $0x18] sm:$0xff] %v304_v9 }
  0x3a   : > { %307 = vst [vmem:[%s1165_s6 + $0x20] sm:$0xff] %v306_v10  ;;  %309 = vst [vmem:[%s1165_s6 + $0x28] sm:$0xff] %v308_v11  ;;  %v310_v12 = vld [vmem:[%s1160_s5 + $0x60] sm:$0xff]  ;;  %v312_v13 = vld [vmem:[%s1160_s5 + $0x70] sm:$0xff] }
  0x3b   : > { %v314_v14 = vld [vmem:[%s1160_s5 + $0x80] sm:$0xff]  ;;  %311 = vst [vmem:[%s1165_s6 + $0x30] sm:$0xff] %v310_v12  ;;  %313 = vst [vmem:[%s1165_s6 + $0x38] sm:$0xff] %v312_v13  ;;  %v316_v15 = vld [vmem:[%s1160_s5 + $0x90] sm:$0xff] }
  0x3c   : > { %315 = vst [vmem:[%s1165_s6 + $0x40] sm:$0xff] %v314_v14  ;;  %v318_v16 = vld [vmem:[%s1160_s5 + $0xa0] sm:$0xff]  ;;  %v320_v17 = vld [vmem:[%s1160_s5 + $0xb0] sm:$0xff]  ;;  %317 = vst [vmem:[%s1165_s6 + $0x48] sm:$0xff] %v316_v15 }
  0x3d   : > { %319 = vst [vmem:[%s1165_s6 + $0x50] sm:$0xff] %v318_v16  ;;  %321 = vst [vmem:[%s1165_s6 + $0x58] sm:$0xff] %v320_v17  ;;  %v322_v18 = vld [vmem:[%s1160_s5 + $0xc0] sm:$0xff]  ;;  %v324_v19 = vld [vmem:[%s1160_s5 + $0xd0] sm:$0xff] }
  0x3e   : > { %v326_v20 = vld [vmem:[%s1160_s5 + $0xe0] sm:$0xff]  ;;  %323 = vst [vmem:[%s1165_s6 + $0x60] sm:$0xff] %v322_v18  ;;  %325 = vst [vmem:[%s1165_s6 + $0x68] sm:$0xff] %v324_v19  ;;  %v328_v21 = vld [vmem:[%s1160_s5 + $0xf0] sm:$0xff] }
  0x3f   : > { %327 = vst [vmem:[%s1165_s6 + $0x70] sm:$0xff] %v326_v20  ;;  %v330_v22 = vld [vmem:[%s1160_s5 + $0x100] sm:$0xff]  ;;  %v332_v23 = vld [vmem:[%s1160_s5 + $0x110] sm:$0xff]  ;;  %329 = vst [vmem:[%s1165_s6 + $0x78] sm:$0xff] %v328_v21 }
  0x40   : > { %331 = vst [vmem:[%s1165_s6 + $0x80] sm:$0xff] %v330_v22  ;;  %333 = vst [vmem:[%s1165_s6 + $0x88] sm:$0xff] %v332_v23  ;;  %v334_v24 = vld [vmem:[%s1160_s5 + $0x120] sm:$0xff]  ;;  %v336_v25 = vld [vmem:[%s1160_s5 + $0x130] sm:$0xff] }
  0x41   : > { %v338_v26 = vld [vmem:[%s1160_s5 + $0x140] sm:$0xff]  ;;  %335 = vst [vmem:[%s1165_s6 + $0x90] sm:$0xff] %v334_v24  ;;  %337 = vst [vmem:[%s1165_s6 + $0x98] sm:$0xff] %v336_v25  ;;  %v340_v27 = vld [vmem:[%s1160_s5 + $0x150] sm:$0xff] }
  0x42   : > { %339 = vst [vmem:[%s1165_s6 + $0xa0] sm:$0xff] %v338_v26  ;;  %v342_v28 = vld [vmem:[%s1160_s5 + $0x160] sm:$0xff]  ;;  %v344_v29 = vld [vmem:[%s1160_s5 + $0x170] sm:$0xff]  ;;  %341 = vst [vmem:[%s1165_s6 + $0xa8] sm:$0xff] %v340_v27 }
  0x43   : > { %343 = vst [vmem:[%s1165_s6 + $0xb0] sm:$0xff] %v342_v28  ;;  %345 = vst [vmem:[%s1165_s6 + $0xb8] sm:$0xff] %v344_v29  ;;  %v346_v30 = vld [vmem:[%s1160_s5 + $0x180] sm:$0xff]  ;;  %v348_v31 = vld [vmem:[%s1160_s5 + $0x190] sm:$0xff] }
  0x44   : > { %v350_v32 = vld [vmem:[%s1160_s5 + $0x1a0] sm:$0xff]  ;;  %347 = vst [vmem:[%s1165_s6 + $0xc0] sm:$0xff] %v346_v30  ;;  %349 = vst [vmem:[%s1165_s6 + $0xc8] sm:$0xff] %v348_v31  ;;  %v352_v33 = vld [vmem:[%s1160_s5 + $0x1b0] sm:$0xff] }
  0x45   : > { %351 = vst [vmem:[%s1165_s6 + $0xd0] sm:$0xff] %v350_v32  ;;  %v354_v34 = vld [vmem:[%s1160_s5 + $0x1c0] sm:$0xff]  ;;  %v356_v35 = vld [vmem:[%s1160_s5 + $0x1d0] sm:$0xff]  ;;  %353 = vst [vmem:[%s1165_s6 + $0xd8] sm:$0xff] %v352_v33 }
  0x46   : > { %355 = vst [vmem:[%s1165_s6 + $0xe0] sm:$0xff] %v354_v34  ;;  %357 = vst [vmem:[%s1165_s6 + $0xe8] sm:$0xff] %v356_v35  ;;  %v358_v36 = vld [vmem:[%s1160_s5 + $0x1e0] sm:$0xff]  ;;  %v360_v37 = vld [vmem:[%s1160_s5 + $0x1f0] sm:$0xff] }
  0x47   : > { %359 = vst [vmem:[%s1165_s6 + $0xf0] sm:$0xff] %v358_v36  ;;  %361 = vst [vmem:[%s1165_s6 + $0xf8] sm:$0xff] %v360_v37 }
  0x48 PF: > { %p746_p0 = scmp.ge.s32.totalorder %s1023_s22, 1  ;;  %p372_p1 = scmp.lt.s32.totalorder %s1023_s22, 29 }
  0x4a   : > { %p373_p2 = pnand %p746_p0, %p372_p1 }
  0x4b   : > { %s379_s23 = sand.u32 (!%p373_p2), 1, %s999_s16   ;;  %s386_s28 = sand.u32 (!%p373_p2), 1, %s991_s14  }
  0x4c   : > { %376 = sbr.rel (%p373_p2) target bundleno = 368 (0x170), region = 85  ;;  %s747_s11 = sshll.u32 (!%p373_p2), %s386_s28, 8 }
  0x4d   : > { %s846_s7 = smul.u32 (!%p373_p2), 48, %s379_s23  ;;  %s412_s26 = sand.u32 (!%p373_p2), 1, %s983_s12  }
  0x4e   : > { %s847_s29 = smul.u32 (!%p373_p2), 24, %s412_s26  ;;  %p418_p3 = scmp.lt.s32.totalorder (!%p373_p2), %s1011_s19, 1 }
  0x4f   : > { %s1241_s0 = scalar_lea.vmem (!%p373_p2), [#allocation3], %s846_s7  ;;  %s1243_s1 = scalar_lea.vmem (!%p373_p2), [#allocation4], %s747_s11 }
  0x50   : > { %s1245_s25 = scalar_lea.vmem (!%p373_p2), [#allocation5], %s847_s29  ;;  %p748_p4 = scmp.ne.s32.totalorder (!%p373_p2), %s1007_s18, 0 }
  0x53   : > { %s1235_s4 = scalar_select %p418_p3, %s1011_s19, 1 }
  0x54   : > { %425 = sbr.rel (%p748_p4) target bundleno = 91 (0x5b), region = 97  ;;  %v1025_v38 = vmov (!%p748_p4), 0.0  }
  0x55   : > { %s420_s6 = scalar_lea.vmem %s1339_s2, %s1235_s4  ;;  %426 = vst [vmem:[#allocation2] sm:$0xff] (!%p748_p4), %v1025_v38  ;;  %427 = vst [vmem:[#allocation2 + $0x8] sm:$0xff] (!%p748_p4), %v1025_v38 }
  0x56   : > { %428 = vst [vmem:[#allocation2 + $0x10] sm:$0xff] (!%p748_p4), %v1025_v38 }
  0x5b PF: > { %v454_v39 = vld [vmem:[%s1243_s1 + $0x80] sm:$0xff]  ;;  %v455_v40 = vld [vmem:[%s1243_s1 + $0x88] sm:$0xff]  ;;  %v456_v44 = vld [vmem:[%s1243_s1 + $0x90] sm:$0xff]  ;;  %p749_p5 = scmp.ne.s32.totalorder %s1007_s18, 13 }
  0x5c   : > { %v438_v41 = vld [vmem:[%s1243_s1] sm:$0xff]  ;;  %v797_v42 = vpack.c.bf16 %v455_v40, %v454_v39  ;;  %v439_v43 = vld [vmem:[%s1243_s1 + $0x8] sm:$0xff]  ;;  %v457_v45 = vld [vmem:[%s1243_s1 + $0x98] sm:$0xff] }
  0x5d   : > { %v799_v46 = vpack.c.bf16 %v439_v43, %v438_v41  ;;  %v801_v47 = vpack.c.bf16 %v457_v45, %v456_v44  ;;  %v440_v48 = vld [vmem:[%s1243_s1 + $0x10] sm:$0xff]  ;;  %v441_v49 = vld [vmem:[%s1243_s1 + $0x18] sm:$0xff]  ;;  %v458_v50 = vld [vmem:[%s1243_s1 + $0xa0] sm:$0xff] }
  0x5e   : > { %829 = vmatprep.subr.bf16.mxu1 %v797_v42  ;;  %798 = vmatprep.subr.bf16.mxu0 %v797_v42  ;;  %v459_v51 = vld [vmem:[%s1243_s1 + $0xa8] sm:$0xff]  ;;  %v803_v52 = vpack.c.bf16 %v441_v49, %v440_v48  ;;  %v442_v54 = vld [vmem:[%s1243_s1 + $0x20] sm:$0xff]  ;;  %v460_v56 = vld [vmem:[%s1243_s1 + $0xb0] sm:$0xff] }
  0x5f   : > { %837 = vmatpush3.bf16.msra.mxu1 %v799_v46  ;;  %800 = vmatpush3.bf16.msra.mxu0 %v799_v46  ;;  %v805_v53 = vpack.c.bf16 %v459_v51, %v458_v50  ;;  %v443_v55 = vld [vmem:[%s1243_s1 + $0x28] sm:$0xff]  ;;  %v461_v57 = vld [vmem:[%s1243_s1 + $0xb8] sm:$0xff]  ;;  %v444_v60 = vld [vmem:[%s1243_s1 + $0x30] sm:$0xff] }
  0x60   : > { %830 = vmatprep.subr.bf16.mxu1 %v801_v47  ;;  %802 = vmatprep.subr.bf16.mxu0 %v801_v47  ;;  %v807_v58 = vpack.c.bf16 %v443_v55, %v442_v54  ;;  %v809_v59 = vpack.c.bf16 %v461_v57, %v460_v56  ;;  %v445_v61 = vld [vmem:[%s1243_s1 + $0x38] sm:$0xff]  ;;  %v462_v62 = vld [vmem:[%s1243_s1 + $0xc0] sm:$0xff]  ;;  %v463_v63 = vld [vmem:[%s1243_s1 + $0xc8] sm:$0xff] }
  0x61   : > { %v435_v0 = vld [vmem:[%s1241_s0 + $0x18] sm:$0xff]  ;;  %v433_v1 = vld [vmem:[%s1241_s0 + $0x8] sm:$0xff]  ;;  %v811_v2 = vpack.c.bf16 %v445_v61, %v444_v60  ;;  %v813_v3 = vpack.c.bf16 %v463_v63, %v462_v62  ;;  %v446_v4 = vld [vmem:[%s1243_s1 + $0x40] sm:$0xff] }
  0x62   : > { %539 = vmatprep.mubr.f32.mxu1 %v435_v0  ;;  %v447_v5 = vld [vmem:[%s1243_s1 + $0x48] sm:$0xff]  ;;  %v464_v6 = vld [vmem:[%s1243_s1 + $0xd0] sm:$0xff]  ;;  %v465_v7 = vld [vmem:[%s1243_s1 + $0xd8] sm:$0xff]  ;;  %534 = vmatprep.mubr.f32.mxu0 %v433_v1 }
  0x63   : > { %838 = vmatpush3.bf16.msra.mxu1 %v803_v52  ;;  %804 = vmatpush3.bf16.msra.mxu0 %v803_v52  ;;  %v815_v8 = vpack.c.bf16 %v447_v5, %v446_v4  ;;  %v817_v9 = vpack.c.bf16 %v465_v7, %v464_v6  ;;  %v448_v10 = vld [vmem:[%s1243_s1 + $0x50] sm:$0xff]  ;;  %v449_v11 = vld [vmem:[%s1243_s1 + $0x58] sm:$0xff]  ;;  %v466_v12 = vld [vmem:[%s1243_s1 + $0xe0] sm:$0xff] }
  0x64   : > { %831 = vmatprep.subr.bf16.mxu1 %v805_v53  ;;  %806 = vmatprep.subr.bf16.mxu0 %v805_v53  ;;  %v467_v13 = vld [vmem:[%s1243_s1 + $0xe8] sm:$0xff]  ;;  %v819_v14 = vpack.c.bf16 %v449_v11, %v448_v10  ;;  %v450_v16 = vld [vmem:[%s1243_s1 + $0x60] sm:$0xff]  ;;  %v468_v18 = vld [vmem:[%s1243_s1 + $0xf0] sm:$0xff] }
  0x65   : > { %v821_v15 = vpack.c.bf16 %v467_v13, %v466_v12  ;;  %v451_v17 = vld [vmem:[%s1243_s1 + $0x68] sm:$0xff]  ;;  %v469_v19 = vld [vmem:[%s1243_s1 + $0xf8] sm:$0xff]  ;;  %v452_v22 = vld [vmem:[%s1243_s1 + $0x70] sm:$0xff] }
  0x66   : > { %v823_v20 = vpack.c.bf16 %v451_v17, %v450_v16  ;;  %v825_v21 = vpack.c.bf16 %v469_v19, %v468_v18  ;;  %v453_v23 = vld [vmem:[%s1243_s1 + $0x78] sm:$0xff]  ;;  %v434_v25 = vld [vmem:[%s1241_s0 + $0x10] sm:$0xff]  ;;  %v432_v26 = vld [vmem:[%s1241_s0] sm:$0xff] }
  0x67   : > { %839 = vmatpush3.bf16.msra.mxu1 %v807_v58  ;;  %808 = vmatpush3.bf16.msra.mxu0 %v807_v58  ;;  %v827_v24 = vpack.c.bf16 %v453_v23, %v452_v22  ;;  %v437_v27 = vld [vmem:[%s1241_s0 + $0x28] sm:$0xff]  ;;  %v436_v28 = vld [vmem:[%s1241_s0 + $0x20] sm:$0xff] }
  0x68   : > { %832 = vmatprep.subr.bf16.mxu1 %v809_v59  ;;  %810 = vmatprep.subr.bf16.mxu0 %v809_v59  ;;  %v430_v31 = vld [vmem:[#allocation2 + $0x8] sm:$0xff]  ;;  %v429_v33 = vld [vmem:[#allocation2] sm:$0xff]  ;;  %v431_v40 = vld [vmem:[#allocation2 + $0x10] sm:$0xff] }
  0x69   : > { %v750_v45 = vld [vmem:[%s420_s6] ss:$0 sm:$0xff] (!%p749_p5) }
  0x6b   : > { %840 = vmatpush3.bf16.msra.mxu1 %v811_v2  ;;  %812 = vmatpush3.bf16.msra.mxu0 %v811_v2 }
  0x6c   : > { %833 = vmatprep.subr.bf16.mxu1 %v813_v3  ;;  %814 = vmatprep.subr.bf16.mxu0 %v813_v3 }
  0x6f   : > { %841 = vmatpush3.bf16.msra.mxu1 %v815_v8  ;;  %816 = vmatpush3.bf16.msra.mxu0 %v815_v8 }
  0x70   : > { %834 = vmatprep.subr.bf16.mxu1 %v817_v9  ;;  %818 = vmatprep.subr.bf16.mxu0 %v817_v9 }
  0x73   : > { %842 = vmatpush3.bf16.msra.mxu1 %v819_v14  ;;  %820 = vmatpush3.bf16.msra.mxu0 %v819_v14 }
  0x74   : > { %835 = vmatprep.subr.bf16.mxu1 %v821_v15  ;;  %822 = vmatprep.subr.bf16.mxu0 %v821_v15 }
  0x77   : > { %843 = vmatpush3.bf16.msra.mxu1 %v823_v20  ;;  %824 = vmatpush3.bf16.msra.mxu0 %v823_v20 }
  0x78   : > { %836 = vmatprep.subr.bf16.mxu1 %v825_v21  ;;  %826 = vmatprep.subr.bf16.mxu0 %v825_v21 }
  0x7b   : > { %844 = vmatpush3.bf16.msra.mxu1 %v827_v24  ;;  %828 = vmatpush3.bf16.msra.mxu0 %v827_v24 }
  0x7e   : > { %540 = vmatmul.mubr.f32.vlgmr.msra.gmra.mrb[0].mxu1 %v434_v25  ;;  %535 = vmatmul.mubr.f32.vlgmr.msra.gmra.mrb[0].mxu0 %v432_v26 }
  0x7f   : > { %544 = vmatprep.mubr.f32.mxu1 %v437_v27 }
  0x82   : > { %545 = vmatmul.mubr.f32.gmra.mrb[2].mxu1 %v436_v28 }
 0x151   : > { %v791_v29 = vpop.f32.mrb[0].mxu1  ;;  %v788_v30 = vpop.f32.mrb[0].mxu0 }
 0x152   : > { %v792_v32 = vpop.f32.mrb[1].mxu1  ;;  %v789_v34 = vpop.f32.mrb[1].mxu0 }
 0x153   : > { %v793_v35 = vadd.f32 %v792_v32, %v791_v29  ;;  %v790_v36 = vadd.f32 %v789_v34, %v788_v30 }
 0x155   : > { %v551_v37 = vadd.f32 %v793_v35, %v430_v31  ;;  %v550_v38 = vadd.f32 %v790_v36, %v429_v33  ;;  %v794_v39 = vpop.f32.mrb[2].mxu1  ;;  %559 = sbr.rel (%p749_p5) target bundleno = 360 (0x168), region = 101 }
 0x156   : > { %v795_v41 = vpop.f32.mrb[3].mxu1 }
 0x157   : > { %554 = vst [vmem:[#allocation2 + $0x8] sm:$0xff] %v551_v37  ;;  %553 = vst [vmem:[#allocation2] sm:$0xff] %v550_v38  ;;  %v796_v42 = vadd.f32 %v795_v41, %v794_v39 }
 0x159   : > { %v552_v43 = vadd.f32 %v796_v42, %v431_v40 }
 0x15b   : > { %555 = vst [vmem:[#allocation2 + $0x10] sm:$0xff] %v552_v43 }
 0x15e   : > { %v560_v44 = vld [vmem:[#allocation2] sm:$0xff]  ;;  %v561_v46 = vld [vmem:[#allocation2 + $0x8] sm:$0xff] }
 0x15f   : > { %v570_v47 = vadd.f32 %v750_v45, %v560_v44  ;;  %v571_v48 = vadd.f32 %v750_v45, %v561_v46 }
 0x161   : > { %v573_v51 = vmax.f32 %v570_v47, 0.0  ;;  %v574_v52 = vmax.f32 %v571_v48, 0.0 }
 0x162   : > { %v562_v49 = vld [vmem:[#allocation2 + $0x10] sm:$0xff] }
 0x163   : > { %v572_v50 = vadd.f32 %v750_v45, %v562_v49  ;;  %576 = vst [vmem:[%s1245_s25] sm:$0xff] %v573_v51  ;;  %577 = vst [vmem:[%s1245_s25 + $0x8] sm:$0xff] %v574_v52 }
 0x165   : > { %v575_v53 = vmax.f32 %v572_v50, 0.0 }
 0x167   : > { %578 = vst [vmem:[%s1245_s25 + $0x10] sm:$0xff] %v575_v53 }
 0x168 PF: > { %585 = sbr.rel (!%p1140_p12) target bundleno = 368 (0x170), region = 105  ;;  %s751_s12 = sshll.u32 (%p1140_p12), %s1011_s19, 3 }
 0x169   : > { %s590_s18 = scalar_lea.vmem (%p1140_p12), %s1340_s3, %s751_s12 }
 0x16a   : > { %v622_v54 = vld [vmem:[%s1245_s25] sm:$0xff] (%p1140_p12)  ;;  %v624_v55 = vld [vmem:[%s1245_s25 + $0x8] sm:$0xff] (%p1140_p12) }
 0x16b   : > { %623 = vst [vmem:[%s590_s18] sm:$0xff] (%p1140_p12), %v622_v54  ;;  %625 = vst [vmem:[%s590_s18 + $0x10] sm:$0xff] (%p1140_p12), %v624_v55 }
 0x16e   : > { %v626_v56 = vld [vmem:[%s1245_s25 + $0x10] sm:$0xff] (%p1140_p12) }
 0x16f   : > { %627 = vst [vmem:[%s590_s18 + $0x20] sm:$0xff] %v626_v56 }
 0x170 PF: > { %s13_s22 = sadd.s32 1, %s1023_s22   ;;  %s1350_s25 = sld [smem:[#allocation6_spill]] }
 0x171   : > { %p10_p6 = scmp.ge.s32.totalorder %s13_s22, 30   ;;  %s1351_s12 = smov %s987_s13 }
 0x172   : > { %s1352_s13 = smov %s1138_s9  ;;  %s1353_s14 = smov %s995_s15 }
 0x173   : > { %s1354_s15 = smov %s1135_s8  ;;  %s1355_s16 = smov %s1003_s17 }
 0x174   : > { %s1356_s17 = smov %s1121_s30  ;;  %s1357_s18 = smov %s1015_s20 }
 0x175   : > { %s1358_s19 = smov %s1019_s21  ;;  %s1359_s20 = smov %s1362_s24 }
 0x176   : > { %s1360_s21 = smov %s1350_s25  ;;  %12 = sbr.rel (!%p10_p6) target bundleno = 9 (0x9), region = 185 }

// kernel: alexnet_forward.13
= control target key start
LH: loop header
LB: loop body
LE: loop exit
PB: predicated region body
PF: predicated region fallthrough
CT: control target
= control target key end

     0   :  { %s1337_s0 = inlined_call_operand.vmem [shape: f32[24,2304], index: 0, kind: input, shape index: {}]   ;;  %s1338_s1 = inlined_call_operand.vmem [shape: f32[2304,256], index: 1, kind: input, shape index: {}]   ;;  %s1339_s2 = inlined_call_operand.vmem [shape: f32[1,256], index: 2, kind: input, shape index: {}]   ;;  %s1340_s3 = inlined_call_operand.vmem [shape: f32[24,256], index: 3, kind: output, shape index: {}]  }
   0x1   :  { %1342 = sst [smem:[#allocation7_spill]] %s1337_s0 }
   0x2   :  { %1343 = sst [smem:[#allocation8_spill]] %s1338_s1 }
   0x3   :  { %s1046_s12 = smov 0   ;;  %s1048_s13 = smov 0  }
   0x4   :  { %s1050_s14 = smov 0   ;;  %s1052_s15 = smov 0  }
   0x5   :  { %s1054_s16 = smov 0   ;;  %s1056_s17 = smov 0  }
   0x6   :  { %s1058_s18 = smov 0   ;;  %s1060_s19 = smov 0  }
   0x7   :  { %s1062_s20 = smov 0   ;;  %s1064_s21 = smov 0  }
   0x8   :  { %s1066_s22 = smov 0  }
   0x9 LB: > { %s736_s23 = sadd.s32 4294967295, %s1023_s22   ;;  %s25_s24 = sadd.s32 1, %s1015_s20  ;;  %s1023_s22 = sphi %s1066_s22, %s13_s22   ;;  %s1019_s21 = sphi %s1064_s21, %s1360_s21   ;;  %s1015_s20 = sphi %s1062_s20, %s1359_s20   ;;  %s1011_s19 = sphi %s1060_s19, %s1358_s19   ;;  %s1007_s18 = sphi %s1058_s18, %s1357_s18   ;;  %s1003_s17 = sphi %s1056_s17, %s1356_s17   ;;  %s999_s16 = sphi %s1054_s16, %s1355_s16   ;;  %s995_s15 = sphi %s1052_s15, %s1354_s15   ;;  %s991_s14 = sphi %s1050_s14, %s1353_s14   ;;  %s987_s13 = sphi %s1048_s13, %s1352_s13   ;;  %s983_s12 = sphi %s1046_s12, %s1351_s12  }
   0xa   : > { %p26_p0 = scmp.ge.s32.totalorder %s25_s24, 9  ;;  %s28_s25 = sadd.s32 1, %s1019_s21 }
   0xb   : > { %s41_s26 = sadd.s32 1, %s1003_s17  ;;  %p48_p1 = scmp.ne.s32.totalorder %s1003_s17, %s999_s16 }
   0xc   : > { %s1362_s24 = smov (%p26_p0, %s25_s24), 0  ;;  %s1364_s25 = smov (!%p26_p0, %s28_s25), %s1019_s21 }
   0xd   : > { %s37_s27 = ssub.s32 %s1015_s20, %s1362_s24  ;;  %p49_p2 = scmp.eq.s32.totalorder %s1023_s22, 0 }
   0xe   : > { %p30_p3 = scmp.ge.s32.totalorder %s1364_s25, 2  ;;  %p39_p4 = scmp.eq.s32.totalorder %s37_s27, 0 }
   0xf   : > { %p1113_p5 = por %p49_p2, %p48_p1  ;;  %s69_s29 = sadd.s32 1, %s995_s15 }
  0x10   : > { %s1366_s25 = smov (%p30_p3, %s1364_s25), 0  ;;  %p76_p6 = scmp.ne.s32.totalorder %s995_s15, %s991_s14 }
  0x11   : > { %1345 = sst [smem:[#allocation6_spill]] %s1366_s25  ;;  %s65_s4 = ssub.s32 %s1019_s21, %s1366_s25 }
  0x12   : > { %s1121_s30 = scalar_select %p39_p4, %s1003_s17, %s41_s26  }
  0x13   : > { %s66_s5 = sor.u32 %s65_s4, %s37_s27  ;;  %p121_p7 = scmp.eq.s32.totalorder %s65_s4, 0 }
  0x14   : > { %p67_p8 = scmp.eq.s32.totalorder %s66_s5, 0  ;;  %p1127_p9 = por %p76_p6, %p49_p2 }
  0x15   : > { %s123_s7 = sadd.s32 1, %s987_s13  ;;  %p133_p10 = scmp.ne.s32.totalorder %s987_s13, %s983_s12 }
  0x16   : > { %s1135_s8 = scalar_select %p67_p8, %s995_s15, %s69_s29  }
  0x17   : > { %s1138_s9 = scalar_select %p121_p7, %s987_s13, %s123_s7  }
  0x18   : > { %p134_p11 = scmp.eq.s32.totalorder %s736_s23, 17  ;;  %p739_p13 = scmp.ge.s32.totalorder %s1023_s22, 18 }
  0x1a   : > { %p1140_p12 = por %p134_p11, %p133_p10  ;;  %156 = sbr.rel (%p739_p13) target bundleno = 73 (0x49), region = 16 }
  0x21   : > { %159 = sbr.rel (!%p1113_p5) target bundleno = 47 (0x2f), region = 20  ;;  %s161_s11 = sand.u32 (%p1113_p5), 1, %s1003_s17  }
  0x22   : > { %s754_s26 = sshll.u32 (%p1113_p5), %s1015_s20, 4  ;;  %s845_s27 = smul.u32 (%p1113_p5), 48, %s161_s11 }
  0x23   : > { %s1348_s0 = sld [smem:[#allocation7_spill]] (%p1113_p5) }
  0x24   : > { %s163_s23 = scalar_lea.vmem (%p1113_p5), [#allocation3], %s845_s27 }
  0x29   : > { %s169_s5 = scalar_lea.vmem %s1348_s0, %s754_s26 }
  0x2a   : > { %v182_v0 = vld [vmem:[%s169_s5] sm:$0xff]  ;;  %v184_v1 = vld [vmem:[%s169_s5 + $0x8] sm:$0xff]  ;;  %v186_v2 = vld [vmem:[%s169_s5 + $0x90] sm:$0xff] }
  0x2b   : > { %v188_v3 = vld [vmem:[%s169_s5 + $0x98] sm:$0xff]  ;;  %v190_v4 = vld [vmem:[%s169_s5 + $0x120] sm:$0xff]  ;;  %v192_v5 = vld [vmem:[%s169_s5 + $0x128] sm:$0xff]  ;;  %183 = vst [vmem:[%s163_s23] sm:$0xff] %v182_v0 }
  0x2c   : > { %185 = vst [vmem:[%s163_s23 + $0x8] sm:$0xff] %v184_v1  ;;  %187 = vst [vmem:[%s163_s23 + $0x10] sm:$0xff] %v186_v2 }
  0x2d   : > { %189 = vst [vmem:[%s163_s23 + $0x18] sm:$0xff] %v188_v3  ;;  %191 = vst [vmem:[%s163_s23 + $0x20] sm:$0xff] %v190_v4 }
  0x2e   : > { %193 = vst [vmem:[%s163_s23 + $0x28] sm:$0xff] %v192_v5 }
  0x2f PF: > { %199 = sbr.rel (!%p1127_p9) target bundleno = 73 (0x49), region = 43  ;;  %s201_s28 = sand.u32 (%p1127_p9), 1, %s995_s15  }
  0x30   : > { %s755_s7 = sshll.u32 (%p1127_p9), %s1015_s20, 6  ;;  %s742_s11 = sshll.u32 (%p1127_p9), %s201_s28, 8 }
  0x31   : > { %s206_s26 = sadd.s32 (%p1127_p9), %s1019_s21, %s755_s7  ;;  %s1349_s1 = sld [smem:[#allocation8_spill]] (%p1127_p9) }
  0x32   : > { %s745_s29 = sshll.u32 (%p1127_p9), %s206_s26, 3  ;;  %s1165_s6 = scalar_lea.vmem (%p1127_p9), [#allocation4], %s742_s11 }
  0x37   : > { %s1160_s5 = scalar_lea.vmem %s1349_s1, %s745_s29 }
  0x38   : > { %v298_v6 = vld [vmem:[%s1160_s5] sm:$0xff]  ;;  %v300_v7 = vld [vmem:[%s1160_s5 + $0x10] sm:$0xff] }
  0x39   : > { %v302_v8 = vld [vmem:[%s1160_s5 + $0x20] sm:$0xff]  ;;  %299 = vst [vmem:[%s1165_s6] sm:$0xff] %v298_v6  ;;  %301 = vst [vmem:[%s1165_s6 + $0x8] sm:$0xff] %v300_v7  ;;  %v304_v9 = vld [vmem:[%s1160_s5 + $0x30] sm:$0xff] }
  0x3a   : > { %303 = vst [vmem:[%s1165_s6 + $0x10] sm:$0xff] %v302_v8  ;;  %v306_v10 = vld [vmem:[%s1160_s5 + $0x40] sm:$0xff]  ;;  %v308_v11 = vld [vmem:[%s1160_s5 + $0x50] sm:$0xff]  ;;  %305 = vst [vmem:[%s1165_s6 + $0x18] sm:$0xff] %v304_v9 }
  0x3b   : > { %307 = vst [vmem:[%s1165_s6 + $0x20] sm:$0xff] %v306_v10  ;;  %309 = vst [vmem:[%s1165_s6 + $0x28] sm:$0xff] %v308_v11  ;;  %v310_v12 = vld [vmem:[%s1160_s5 + $0x60] sm:$0xff]  ;;  %v312_v13 = vld [vmem:[%s1160_s5 + $0x70] sm:$0xff] }
  0x3c   : > { %v314_v14 = vld [vmem:[%s1160_s5 + $0x80] sm:$0xff]  ;;  %311 = vst [vmem:[%s1165_s6 + $0x30] sm:$0xff] %v310_v12  ;;  %313 = vst [vmem:[%s1165_s6 + $0x38] sm:$0xff] %v312_v13  ;;  %v316_v15 = vld [vmem:[%s1160_s5 + $0x90] sm:$0xff] }
  0x3d   : > { %315 = vst [vmem:[%s1165_s6 + $0x40] sm:$0xff] %v314_v14  ;;  %v318_v16 = vld [vmem:[%s1160_s5 + $0xa0] sm:$0xff]  ;;  %v320_v17 = vld [vmem:[%s1160_s5 + $0xb0] sm:$0xff]  ;;  %317 = vst [vmem:[%s1165_s6 + $0x48] sm:$0xff] %v316_v15 }
  0x3e   : > { %319 = vst [vmem:[%s1165_s6 + $0x50] sm:$0xff] %v318_v16  ;;  %321 = vst [vmem:[%s1165_s6 + $0x58] sm:$0xff] %v320_v17  ;;  %v322_v18 = vld [vmem:[%s1160_s5 + $0xc0] sm:$0xff]  ;;  %v324_v19 = vld [vmem:[%s1160_s5 + $0xd0] sm:$0xff] }
  0x3f   : > { %v326_v20 = vld [vmem:[%s1160_s5 + $0xe0] sm:$0xff]  ;;  %323 = vst [vmem:[%s1165_s6 + $0x60] sm:$0xff] %v322_v18  ;;  %325 = vst [vmem:[%s1165_s6 + $0x68] sm:$0xff] %v324_v19  ;;  %v328_v21 = vld [vmem:[%s1160_s5 + $0xf0] sm:$0xff] }
  0x40   : > { %327 = vst [vmem:[%s1165_s6 + $0x70] sm:$0xff] %v326_v20  ;;  %v330_v22 = vld [vmem:[%s1160_s5 + $0x100] sm:$0xff]  ;;  %v332_v23 = vld [vmem:[%s1160_s5 + $0x110] sm:$0xff]  ;;  %329 = vst [vmem:[%s1165_s6 + $0x78] sm:$0xff] %v328_v21 }
  0x41   : > { %331 = vst [vmem:[%s1165_s6 + $0x80] sm:$0xff] %v330_v22  ;;  %333 = vst [vmem:[%s1165_s6 + $0x88] sm:$0xff] %v332_v23  ;;  %v334_v24 = vld [vmem:[%s1160_s5 + $0x120] sm:$0xff]  ;;  %v336_v25 = vld [vmem:[%s1160_s5 + $0x130] sm:$0xff] }
  0x42   : > { %v338_v26 = vld [vmem:[%s1160_s5 + $0x140] sm:$0xff]  ;;  %335 = vst [vmem:[%s1165_s6 + $0x90] sm:$0xff] %v334_v24  ;;  %337 = vst [vmem:[%s1165_s6 + $0x98] sm:$0xff] %v336_v25  ;;  %v340_v27 = vld [vmem:[%s1160_s5 + $0x150] sm:$0xff] }
  0x43   : > { %339 = vst [vmem:[%s1165_s6 + $0xa0] sm:$0xff] %v338_v26  ;;  %v342_v28 = vld [vmem:[%s1160_s5 + $0x160] sm:$0xff]  ;;  %v344_v29 = vld [vmem:[%s1160_s5 + $0x170] sm:$0xff]  ;;  %341 = vst [vmem:[%s1165_s6 + $0xa8] sm:$0xff] %v340_v27 }
  0x44   : > { %343 = vst [vmem:[%s1165_s6 + $0xb0] sm:$0xff] %v342_v28  ;;  %345 = vst [vmem:[%s1165_s6 + $0xb8] sm:$0xff] %v344_v29  ;;  %v346_v30 = vld [vmem:[%s1160_s5 + $0x180] sm:$0xff]  ;;  %v348_v31 = vld [vmem:[%s1160_s5 + $0x190] sm:$0xff] }
  0x45   : > { %v350_v32 = vld [vmem:[%s1160_s5 + $0x1a0] sm:$0xff]  ;;  %347 = vst [vmem:[%s1165_s6 + $0xc0] sm:$0xff] %v346_v30  ;;  %349 = vst [vmem:[%s1165_s6 + $0xc8] sm:$0xff] %v348_v31  ;;  %v352_v33 = vld [vmem:[%s1160_s5 + $0x1b0] sm:$0xff] }
  0x46   : > { %351 = vst [vmem:[%s1165_s6 + $0xd0] sm:$0xff] %v350_v32  ;;  %v354_v34 = vld [vmem:[%s1160_s5 + $0x1c0] sm:$0xff]  ;;  %v356_v35 = vld [vmem:[%s1160_s5 + $0x1d0] sm:$0xff]  ;;  %353 = vst [vmem:[%s1165_s6 + $0xd8] sm:$0xff] %v352_v33 }
  0x47   : > { %355 = vst [vmem:[%s1165_s6 + $0xe0] sm:$0xff] %v354_v34  ;;  %357 = vst [vmem:[%s1165_s6 + $0xe8] sm:$0xff] %v356_v35  ;;  %v358_v36 = vld [vmem:[%s1160_s5 + $0x1e0] sm:$0xff]  ;;  %v360_v37 = vld [vmem:[%s1160_s5 + $0x1f0] sm:$0xff] }
  0x48   : > { %359 = vst [vmem:[%s1165_s6 + $0xf0] sm:$0xff] %v358_v36  ;;  %361 = vst [vmem:[%s1165_s6 + $0xf8] sm:$0xff] %v360_v37 }
  0x49 PF: > { %p746_p0 = scmp.ge.s32.totalorder %s1023_s22, 1  ;;  %p372_p1 = scmp.lt.s32.totalorder %s1023_s22, 19 }
  0x4b   : > { %p373_p2 = pnand %p746_p0, %p372_p1 }
  0x4c   : > { %s379_s23 = sand.u32 (!%p373_p2), 1, %s999_s16   ;;  %s386_s28 = sand.u32 (!%p373_p2), 1, %s991_s14  }
  0x4d   : > { %376 = sbr.rel (%p373_p2) target bundleno = 369 (0x171), region = 85  ;;  %s747_s11 = sshll.u32 (!%p373_p2), %s386_s28, 8 }
  0x4e   : > { %s846_s7 = smul.u32 (!%p373_p2), 48, %s379_s23  ;;  %s412_s26 = sand.u32 (!%p373_p2), 1, %s983_s12  }
  0x4f   : > { %s847_s29 = smul.u32 (!%p373_p2), 24, %s412_s26  ;;  %p418_p3 = scmp.lt.s32.totalorder (!%p373_p2), %s1011_s19, 1 }
  0x50   : > { %s1241_s0 = scalar_lea.vmem (!%p373_p2), [#allocation3], %s846_s7  ;;  %s1243_s1 = scalar_lea.vmem (!%p373_p2), [#allocation4], %s747_s11 }
  0x51   : > { %s1245_s25 = scalar_lea.vmem (!%p373_p2), [#allocation5], %s847_s29  ;;  %p748_p4 = scmp.ne.s32.totalorder (!%p373_p2), %s1007_s18, 0 }
  0x54   : > { %s1235_s4 = scalar_select %p418_p3, %s1011_s19, 1 }
  0x55   : > { %425 = sbr.rel (%p748_p4) target bundleno = 92 (0x5c), region = 97  ;;  %v1025_v38 = vmov (!%p748_p4), 0.0  }
  0x56   : > { %s420_s6 = scalar_lea.vmem %s1339_s2, %s1235_s4  ;;  %426 = vst [vmem:[#allocation2] sm:$0xff] (!%p748_p4), %v1025_v38  ;;  %427 = vst [vmem:[#allocation2 + $0x8] sm:$0xff] (!%p748_p4), %v1025_v38 }
  0x57   : > { %428 = vst [vmem:[#allocation2 + $0x10] sm:$0xff] (!%p748_p4), %v1025_v38 }
  0x5c PF: > { %v454_v39 = vld [vmem:[%s1243_s1 + $0x80] sm:$0xff]  ;;  %v455_v40 = vld [vmem:[%s1243_s1 + $0x88] sm:$0xff]  ;;  %v456_v44 = vld [vmem:[%s1243_s1 + $0x90] sm:$0xff]  ;;  %p749_p5 = scmp.ne.s32.totalorder %s1007_s18, 8 }
  0x5d   : > { %v438_v41 = vld [vmem:[%s1243_s1] sm:$0xff]  ;;  %v797_v42 = vpack.c.bf16 %v455_v40, %v454_v39  ;;  %v439_v43 = vld [vmem:[%s1243_s1 + $0x8] sm:$0xff]  ;;  %v457_v45 = vld [vmem:[%s1243_s1 + $0x98] sm:$0xff] }
  0x5e   : > { %v799_v46 = vpack.c.bf16 %v439_v43, %v438_v41  ;;  %v801_v47 = vpack.c.bf16 %v457_v45, %v456_v44  ;;  %v440_v48 = vld [vmem:[%s1243_s1 + $0x10] sm:$0xff]  ;;  %v441_v49 = vld [vmem:[%s1243_s1 + $0x18] sm:$0xff]  ;;  %v458_v50 = vld [vmem:[%s1243_s1 + $0xa0] sm:$0xff] }
  0x5f   : > { %829 = vmatprep.subr.bf16.mxu1 %v797_v42  ;;  %798 = vmatprep.subr.bf16.mxu0 %v797_v42  ;;  %v459_v51 = vld [vmem:[%s1243_s1 + $0xa8] sm:$0xff]  ;;  %v803_v52 = vpack.c.bf16 %v441_v49, %v440_v48  ;;  %v442_v54 = vld [vmem:[%s1243_s1 + $0x20] sm:$0xff]  ;;  %v460_v56 = vld [vmem:[%s1243_s1 + $0xb0] sm:$0xff] }
  0x60   : > { %837 = vmatpush3.bf16.msra.mxu1 %v799_v46  ;;  %800 = vmatpush3.bf16.msra.mxu0 %v799_v46  ;;  %v805_v53 = vpack.c.bf16 %v459_v51, %v458_v50  ;;  %v443_v55 = vld [vmem:[%s1243_s1 + $0x28] sm:$0xff]  ;;  %v461_v57 = vld [vmem:[%s1243_s1 + $0xb8] sm:$0xff]  ;;  %v444_v60 = vld [vmem:[%s1243_s1 + $0x30] sm:$0xff] }
  0x61   : > { %830 = vmatprep.subr.bf16.mxu1 %v801_v47  ;;  %802 = vmatprep.subr.bf16.mxu0 %v801_v47  ;;  %v807_v58 = vpack.c.bf16 %v443_v55, %v442_v54  ;;  %v809_v59 = vpack.c.bf16 %v461_v57, %v460_v56  ;;  %v445_v61 = vld [vmem:[%s1243_s1 + $0x38] sm:$0xff]  ;;  %v462_v62 = vld [vmem:[%s1243_s1 + $0xc0] sm:$0xff]  ;;  %v463_v63 = vld [vmem:[%s1243_s1 + $0xc8] sm:$0xff] }
  0x62   : > { %v435_v0 = vld [vmem:[%s1241_s0 + $0x18] sm:$0xff]  ;;  %v433_v1 = vld [vmem:[%s1241_s0 + $0x8] sm:$0xff]  ;;  %v811_v2 = vpack.c.bf16 %v445_v61, %v444_v60  ;;  %v813_v3 = vpack.c.bf16 %v463_v63, %v462_v62  ;;  %v446_v4 = vld [vmem:[%s1243_s1 + $0x40] sm:$0xff] }
  0x63   : > { %539 = vmatprep.mubr.f32.mxu1 %v435_v0  ;;  %v447_v5 = vld [vmem:[%s1243_s1 + $0x48] sm:$0xff]  ;;  %v464_v6 = vld [vmem:[%s1243_s1 + $0xd0] sm:$0xff]  ;;  %v465_v7 = vld [vmem:[%s1243_s1 + $0xd8] sm:$0xff]  ;;  %534 = vmatprep.mubr.f32.mxu0 %v433_v1 }
  0x64   : > { %838 = vmatpush3.bf16.msra.mxu1 %v803_v52  ;;  %804 = vmatpush3.bf16.msra.mxu0 %v803_v52  ;;  %v815_v8 = vpack.c.bf16 %v447_v5, %v446_v4  ;;  %v817_v9 = vpack.c.bf16 %v465_v7, %v464_v6  ;;  %v448_v10 = vld [vmem:[%s1243_s1 + $0x50] sm:$0xff]  ;;  %v449_v11 = vld [vmem:[%s1243_s1 + $0x58] sm:$0xff]  ;;  %v466_v12 = vld [vmem:[%s1243_s1 + $0xe0] sm:$0xff] }
  0x65   : > { %831 = vmatprep.subr.bf16.mxu1 %v805_v53  ;;  %806 = vmatprep.subr.bf16.mxu0 %v805_v53  ;;  %v467_v13 = vld [vmem:[%s1243_s1 + $0xe8] sm:$0xff]  ;;  %v819_v14 = vpack.c.bf16 %v449_v11, %v448_v10  ;;  %v450_v16 = vld [vmem:[%s1243_s1 + $0x60] sm:$0xff]  ;;  %v468_v18 = vld [vmem:[%s1243_s1 + $0xf0] sm:$0xff] }
  0x66   : > { %v821_v15 = vpack.c.bf16 %v467_v13, %v466_v12  ;;  %v451_v17 = vld [vmem:[%s1243_s1 + $0x68] sm:$0xff]  ;;  %v469_v19 = vld [vmem:[%s1243_s1 + $0xf8] sm:$0xff]  ;;  %v452_v22 = vld [vmem:[%s1243_s1 + $0x70] sm:$0xff] }
  0x67   : > { %v823_v20 = vpack.c.bf16 %v451_v17, %v450_v16  ;;  %v825_v21 = vpack.c.bf16 %v469_v19, %v468_v18  ;;  %v453_v23 = vld [vmem:[%s1243_s1 + $0x78] sm:$0xff]  ;;  %v434_v25 = vld [vmem:[%s1241_s0 + $0x10] sm:$0xff]  ;;  %v432_v26 = vld [vmem:[%s1241_s0] sm:$0xff] }
  0x68   : > { %839 = vmatpush3.bf16.msra.mxu1 %v807_v58  ;;  %808 = vmatpush3.bf16.msra.mxu0 %v807_v58  ;;  %v827_v24 = vpack.c.bf16 %v453_v23, %v452_v22  ;;  %v437_v27 = vld [vmem:[%s1241_s0 + $0x28] sm:$0xff]  ;;  %v436_v28 = vld [vmem:[%s1241_s0 + $0x20] sm:$0xff] }
  0x69   : > { %832 = vmatprep.subr.bf16.mxu1 %v809_v59  ;;  %810 = vmatprep.subr.bf16.mxu0 %v809_v59  ;;  %v430_v31 = vld [vmem:[#allocation2 + $0x8] sm:$0xff]  ;;  %v429_v33 = vld [vmem:[#allocation2] sm:$0xff]  ;;  %v431_v40 = vld [vmem:[#allocation2 + $0x10] sm:$0xff] }
  0x6a   : > { %v750_v45 = vld [vmem:[%s420_s6] ss:$0 sm:$0xff] (!%p749_p5) }
  0x6c   : > { %840 = vmatpush3.bf16.msra.mxu1 %v811_v2  ;;  %812 = vmatpush3.bf16.msra.mxu0 %v811_v2 }
  0x6d   : > { %833 = vmatprep.subr.bf16.mxu1 %v813_v3  ;;  %814 = vmatprep.subr.bf16.mxu0 %v813_v3 }
  0x70   : > { %841 = vmatpush3.bf16.msra.mxu1 %v815_v8  ;;  %816 = vmatpush3.bf16.msra.mxu0 %v815_v8 }
  0x71   : > { %834 = vmatprep.subr.bf16.mxu1 %v817_v9  ;;  %818 = vmatprep.subr.bf16.mxu0 %v817_v9 }
  0x74   : > { %842 = vmatpush3.bf16.msra.mxu1 %v819_v14  ;;  %820 = vmatpush3.bf16.msra.mxu0 %v819_v14 }
  0x75   : > { %835 = vmatprep.subr.bf16.mxu1 %v821_v15  ;;  %822 = vmatprep.subr.bf16.mxu0 %v821_v15 }
  0x78   : > { %843 = vmatpush3.bf16.msra.mxu1 %v823_v20  ;;  %824 = vmatpush3.bf16.msra.mxu0 %v823_v20 }
  0x79   : > { %836 = vmatprep.subr.bf16.mxu1 %v825_v21  ;;  %826 = vmatprep.subr.bf16.mxu0 %v825_v21 }
  0x7c   : > { %844 = vmatpush3.bf16.msra.mxu1 %v827_v24  ;;  %828 = vmatpush3.bf16.msra.mxu0 %v827_v24 }
  0x7f   : > { %540 = vmatmul.mubr.f32.vlgmr.msra.gmra.mrb[0].mxu1 %v434_v25  ;;  %535 = vmatmul.mubr.f32.vlgmr.msra.gmra.mrb[0].mxu0 %v432_v26 }
  0x80   : > { %544 = vmatprep.mubr.f32.mxu1 %v437_v27 }
  0x83   : > { %545 = vmatmul.mubr.f32.gmra.mrb[2].mxu1 %v436_v28 }
 0x152   : > { %v791_v29 = vpop.f32.mrb[0].mxu1  ;;  %v788_v30 = vpop.f32.mrb[0].mxu0 }
 0x153   : > { %v792_v32 = vpop.f32.mrb[1].mxu1  ;;  %v789_v34 = vpop.f32.mrb[1].mxu0 }
 0x154   : > { %v793_v35 = vadd.f32 %v792_v32, %v791_v29  ;;  %v790_v36 = vadd.f32 %v789_v34, %v788_v30 }
 0x156   : > { %v551_v37 = vadd.f32 %v793_v35, %v430_v31  ;;  %v550_v38 = vadd.f32 %v790_v36, %v429_v33  ;;  %v794_v39 = vpop.f32.mrb[2].mxu1  ;;  %559 = sbr.rel (%p749_p5) target bundleno = 361 (0x169), region = 101 }
 0x157   : > { %v795_v41 = vpop.f32.mrb[3].mxu1 }
 0x158   : > { %554 = vst [vmem:[#allocation2 + $0x8] sm:$0xff] %v551_v37  ;;  %553 = vst [vmem:[#allocation2] sm:$0xff] %v550_v38  ;;  %v796_v42 = vadd.f32 %v795_v41, %v794_v39 }
 0x15a   : > { %v552_v43 = vadd.f32 %v796_v42, %v431_v40 }
 0x15c   : > { %555 = vst [vmem:[#allocation2 + $0x10] sm:$0xff] %v552_v43 }
 0x15f   : > { %v560_v44 = vld [vmem:[#allocation2] sm:$0xff]  ;;  %v561_v46 = vld [vmem:[#allocation2 + $0x8] sm:$0xff] }
 0x160   : > { %v570_v47 = vadd.f32 %v750_v45, %v560_v44  ;;  %v571_v48 = vadd.f32 %v750_v45, %v561_v46 }
 0x162   : > { %v573_v51 = vmax.f32 %v570_v47, 0.0  ;;  %v574_v52 = vmax.f32 %v571_v48, 0.0 }
 0x163   : > { %v562_v49 = vld [vmem:[#allocation2 + $0x10] sm:$0xff] }
 0x164   : > { %v572_v50 = vadd.f32 %v750_v45, %v562_v49  ;;  %576 = vst [vmem:[%s1245_s25] sm:$0xff] %v573_v51  ;;  %577 = vst [vmem:[%s1245_s25 + $0x8] sm:$0xff] %v574_v52 }
 0x166   : > { %v575_v53 = vmax.f32 %v572_v50, 0.0 }
 0x168   : > { %578 = vst [vmem:[%s1245_s25 + $0x10] sm:$0xff] %v575_v53 }
 0x169 PF: > { %585 = sbr.rel (!%p1140_p12) target bundleno = 369 (0x171), region = 105  ;;  %s751_s12 = sshll.u32 (%p1140_p12), %s1011_s19, 3 }
 0x16a   : > { %s590_s18 = scalar_lea.vmem (%p1140_p12), %s1340_s3, %s751_s12 }
 0x16b   : > { %v622_v54 = vld [vmem:[%s1245_s25] sm:$0xff] (%p1140_p12)  ;;  %v624_v55 = vld [vmem:[%s1245_s25 + $0x8] sm:$0xff] (%p1140_p12) }
 0x16c   : > { %623 = vst [vmem:[%s590_s18] sm:$0xff] (%p1140_p12), %v622_v54  ;;  %625 = vst [vmem:[%s590_s18 + $0x10] sm:$0xff] (%p1140_p12), %v624_v55 }
 0x16f   : > { %v626_v56 = vld [vmem:[%s1245_s25 + $0x10] sm:$0xff] (%p1140_p12) }
 0x170   : > { %627 = vst [vmem:[%s590_s18 + $0x20] sm:$0xff] %v626_v56 }
 0x171 PF: > { %s13_s22 = sadd.s32 1, %s1023_s22   ;;  %s1350_s25 = sld [smem:[#allocation6_spill]] }
 0x172   : > { %p10_p6 = scmp.ge.s32.totalorder %s13_s22, 20   ;;  %s1351_s12 = smov %s987_s13 }
 0x173   : > { %s1352_s13 = smov %s1138_s9  ;;  %s1353_s14 = smov %s995_s15 }
 0x174   : > { %s1354_s15 = smov %s1135_s8  ;;  %s1355_s16 = smov %s1003_s17 }
 0x175   : > { %s1356_s17 = smov %s1121_s30  ;;  %s1357_s18 = smov %s1015_s20 }
 0x176   : > { %s1358_s19 = smov %s1019_s21  ;;  %s1359_s20 = smov %s1362_s24 }
 0x177   : > { %s1360_s21 = smov %s1350_s25  ;;  %12 = sbr.rel (!%p10_p6) target bundleno = 9 (0x9), region = 185 }

</bundles_post_ra>
